<compile_context>
chip_gen: v5e
topology: v5e:2x2
jax: 0.10.0
libtpu: 0.0.40
codegen_flags: <defaults>
</compile_context>

<pallas_src>
import functools
import math

import jax
import jax.numpy as jnp
from jax import lax
from jax.experimental import pallas as pl
from jax.experimental.pallas import tpu as pltpu

_BN_EPS = 1e-5  # torch.nn.BatchNorm2d default


def _erf_gelu(x):
    # exact GELU, matches torch.nn.functional.gelu default (erf formulation)
    return 0.5 * x * (1.0 + lax.erf(x * (1.0 / math.sqrt(2.0))))


def _compiler_params():
    return pltpu.CompilerParams(
        dimension_semantics=("parallel",),          # batch axis -> megacore-shardable
        vmem_limit_bytes=32 * 1024 * 1024,
    )


# ----------------------------------------------------------------------------------
# Kernels
# ----------------------------------------------------------------------------------
def _pointwise_kernel(x_ref, w_ref, s_ref, o_ref, *, apply_gelu):
    """o = [gelu]( W(N,K) @ X(K,HW) + shift(N,1) ) for one image."""
    y = jnp.dot(w_ref[...], x_ref[...], preferred_element_type=jnp.float32)
    y = y + s_ref[...]
    if apply_gelu:
        y = _erf_gelu(y)
    o_ref[...] = y.astype(o_ref.dtype)


def _accum_conv3x3_taps(acc_ref, x_ref, w_ref, H, W):
    """acc[co, h*W + w] += sum_{ky,kx,ci} w_ref[ky*3+kx, co, ci] * x[ci, h+ky-1, w+kx-1]
    with zero padding outside the image.  x_ref is (Cin, H*W) for ONE image.

    Each tap is a static lane-slice of x (no roll/gather), a small MXU matmul, a
    boundary mask multiply for the horizontal taps, and a slice-accumulate into the
    f32 scratch.  The vertical (row) boundary is handled purely by the slice range.
    """
    HW = H * W
    lane = lax.broadcasted_iota(jnp.int32, (1, HW), 1)
    col = lane % W
    mask_l = (col >= 1).astype(jnp.float32)        # ox = -1 needs w-1 >= 0
    mask_r = (col <= W - 2).astype(jnp.float32)    # ox = +1 needs w+1 <  W
    for ky in range(3):
        for kx in range(3):
            oy, ox = ky - 1, kx - 1
            s = oy * W + ox                        # flat lane shift within the image
            lo = max(0, -s)
            hi = HW - max(0, s)
            L = hi - lo                            # output lanes touched by this tap
            wt = w_ref[ky * 3 + kx]                                   # (Cout, Cin)
            xs = x_ref[:, pl.ds(lo + s, L)]                           # (Cin,  L)
            contrib = jnp.dot(wt, xs, preferred_element_type=jnp.float32)
            if ox == -1:
                contrib = contrib * mask_l[:, lo:hi]
            elif ox == 1:
                contrib = contrib * mask_r[:, lo:hi]
            acc_ref[:, pl.ds(lo, L)] = acc_ref[:, pl.ds(lo, L)] + contrib


def _conv3x3_kernel(x_ref, w_ref, s_ref, o_ref, acc_ref, *, H, W, apply_gelu):
    acc_ref[...] = jnp.zeros_like(acc_ref)
    _accum_conv3x3_taps(acc_ref, x_ref, w_ref, H, W)
    y = acc_ref[...] + s_ref[...]
    if apply_gelu:
        y = _erf_gelu(y)
    o_ref[...] = y.astype(o_ref.dtype)


def _conv3x3_cat_kernel(xa_ref, xb_ref, wa_ref, wb_ref, s_ref, o_ref, acc_ref,
                        *, H, W, apply_gelu):
    """3x3 conv over the virtual concat [xa, xb] along channels (concat never built)."""
    acc_ref[...] = jnp.zeros_like(acc_ref)
    _accum_conv3x3_taps(acc_ref, xa_ref, wa_ref, H, W)
    _accum_conv3x3_taps(acc_ref, xb_ref, wb_ref, H, W)
    y = acc_ref[...] + s_ref[...]
    if apply_gelu:
        y = _erf_gelu(y)
    o_ref[...] = y.astype(o_ref.dtype)


# ----------------------------------------------------------------------------------
# pallas_call wrappers (grid over batch, per-image blocks)
# ----------------------------------------------------------------------------------
def pointwise_conv(x, w, shift, *, apply_gelu=False):
    """x: (B, K, HW); w: (N, K); shift: (N,).  Returns (B, N, HW)."""
    B, K, HW = x.shape
    N, Kw = w.shape
    assert K == Kw, (K, Kw)
    return pl.pallas_call(
        functools.partial(_pointwise_kernel, apply_gelu=apply_gelu),
        out_shape=jax.ShapeDtypeStruct((B, N, HW), jnp.float32),
        grid_spec=pltpu.PrefetchScalarGridSpec(
            num_scalar_prefetch=0,
            grid=(B,),
            in_specs=[
                pl.BlockSpec((None, K, HW), lambda b: (b, 0, 0)),   # per-image activations
                pl.BlockSpec((N, K), lambda b: (0, 0)),             # resident weights
                pl.BlockSpec((N, 1), lambda b: (0, 0)),             # per-channel shift
            ],
            out_specs=pl.BlockSpec((None, N, HW), lambda b: (b, 0, 0)),
        ),
        compiler_params=_compiler_params(),
    )(x, w.astype(jnp.float32), shift.reshape(N, 1).astype(jnp.float32))


def conv3x3_fused(x, w_taps, shift, H, W, *, apply_gelu):
    """x: (B, Cin, H*W); w_taps: (9, Cout, Cin); shift: (Cout,)."""
    B, Cin, HW = x.shape
    Cout = w_taps.shape[1]
    assert HW == H * W
    return pl.pallas_call(
        functools.partial(_conv3x3_kernel, H=H, W=W, apply_gelu=apply_gelu),
        out_shape=jax.ShapeDtypeStruct((B, Cout, HW), jnp.float32),
        grid_spec=pltpu.PrefetchScalarGridSpec(
            num_scalar_prefetch=0,
            grid=(B,),
            in_specs=[
                pl.BlockSpec((None, Cin, HW), lambda b: (b, 0, 0)),
                pl.BlockSpec((9, Cout, Cin), lambda b: (0, 0, 0)),
                pl.BlockSpec((Cout, 1), lambda b: (0, 0)),
            ],
            out_specs=pl.BlockSpec((None, Cout, HW), lambda b: (b, 0, 0)),
            scratch_shapes=[pltpu.VMEM((Cout, HW), jnp.float32)],
        ),
        compiler_params=_compiler_params(),
    )(x, w_taps.astype(jnp.float32), shift.reshape(Cout, 1).astype(jnp.float32))


def conv3x3_cat_fused(xa, xb, wa_taps, wb_taps, shift, H, W, *, apply_gelu):
    """3x3 conv over concat([xa, xb], channel) without materializing the concat."""
    B, Ca, HW = xa.shape
    Cb = xb.shape[1]
    Cout = wa_taps.shape[1]
    assert xb.shape == (B, Cb, HW) and HW == H * W
    return pl.pallas_call(
        functools.partial(_conv3x3_cat_kernel, H=H, W=W, apply_gelu=apply_gelu),
        out_shape=jax.ShapeDtypeStruct((B, Cout, HW), jnp.float32),
        grid_spec=pltpu.PrefetchScalarGridSpec(
            num_scalar_prefetch=0,
            grid=(B,),
            in_specs=[
                pl.BlockSpec((None, Ca, HW), lambda b: (b, 0, 0)),
                pl.BlockSpec((None, Cb, HW), lambda b: (b, 0, 0)),
                pl.BlockSpec((9, Cout, Ca), lambda b: (0, 0, 0)),
                pl.BlockSpec((9, Cout, Cb), lambda b: (0, 0, 0)),
                pl.BlockSpec((Cout, 1), lambda b: (0, 0)),
            ],
            out_specs=pl.BlockSpec((None, Cout, HW), lambda b: (b, 0, 0)),
            scratch_shapes=[pltpu.VMEM((Cout, HW), jnp.float32)],
        ),
        compiler_params=_compiler_params(),
    )(xa, xb, wa_taps.astype(jnp.float32), wb_taps.astype(jnp.float32),
      shift.reshape(Cout, 1).astype(jnp.float32))


# ----------------------------------------------------------------------------------
# Layer plumbing (weights stay in PyTorch layout; folding/reshape happens at trace time)
# ----------------------------------------------------------------------------------
def _fold_bn(w, b, bn):
    """Fold inference BatchNorm into conv weight; returns (scaled weight, shift)."""
    gamma, beta, mean, var = bn
    scale = gamma * lax.rsqrt(var + _BN_EPS)               # (Cout,)
    w_folded = w * scale[:, None, None, None]              # (Cout, Cin, 3, 3)
    shift = (b - mean) * scale + beta
    return w_folded, shift


def _taps(w):
    """(Cout, Cin, 3, 3) -> (9, Cout, Cin), tap index = ky*3 + kx."""
    return jnp.transpose(w, (2, 3, 0, 1)).reshape(9, w.shape[0], w.shape[1])


def upsample_2x(x, w, b, H, W):
    """ConvTranspose2d(k=2, s=2).  x: (B, Cin, H*W); w: (Cin, Cout, 2, 2); b: (Cout,)."""
    B, Cin, HW = x.shape
    Cout = w.shape[1]
    wmat = jnp.transpose(w, (2, 3, 1, 0)).reshape(4 * Cout, Cin)   # rows = (ky, kx, co)
    shift = jnp.tile(b, 4)                                         # bias per (ky,kx,co)
    y4 = pointwise_conv(x, wmat, shift, apply_gelu=False)          # (B, 4*Cout, HW)
    # Pixel shuffle (ky,kx,co,h,w) -> (co, 2h+ky, 2w+kx).
    # TODO(synk): wrapper-level layout op (one HBM round trip of the upsampled tensor);
    # fusing it into the kernel needs strided lane scatter and was left out for safety.
    y = y4.reshape(B, 2, 2, Cout, H, W)
    y = jnp.transpose(y, (0, 3, 4, 1, 5, 2)).reshape(B, Cout, (2 * H) * (2 * W))
    return y, 2 * H, 2 * W


def conv_block(up, skip, p, H, W):
    """ConvBlock on the virtual concat [up, skip]: conv3x3+BN+GELU, dropout(eval), conv3x3+BN+GELU."""
    C1 = up.shape[1]
    w1f, s1 = _fold_bn(p["w1"], p["b1"], p["bn1"])
    x = conv3x3_cat_fused(up, skip, _taps(w1f[:, :C1]), _taps(w1f[:, C1:]), s1, H, W,
                          apply_gelu=True)
    # TODO(synk): nn.Dropout2d is identity in eval mode; training-mode dropout not implemented.
    w2f, s2 = _fold_bn(p["w2"], p["b2"], p["bn2"])
    x = conv3x3_fused(x, _taps(w2f), s2, H, W, apply_gelu=True)
    return x


def decoder_forward_pallas(x_nchw, skip_connections_nchw, params):
    """Matches Decoder.forward (eval mode).  x and skips are NCHW like PyTorch."""
    B, C, H, W = x_nchw.shape
    x = x_nchw.reshape(B, C, H * W)                 # channel-major, pixels on lanes
    skips = list(skip_connections_nchw)[::-1]
    skip_flat = [s.reshape(s.shape[0], s.shape[1], -1) for s in skips]
    skip_hw = [s.shape[2:] for s in skips]
    for i, stage in enumerate(params["stages"]):
        up, H, W = upsample_2x(x, stage["up_w"], stage["up_b"], H, W)
        # TODO(synk): F.interpolate(bilinear) fallback for mismatched spatial sizes is
        # not implemented; it is never triggered for stride-2 power-of-two sizes.
        assert (H, W) == tuple(skip_hw[i]), ((H, W), skip_hw[i])
        x = conv_block(up, skip_flat[i], stage["block"], H, W)
    Cf = params["final_w"].shape[0]
    x = pointwise_conv(x, params["final_w"].reshape(Cf, -1), params["final_b"],
                       apply_gelu=False)            # final 1x1 conv
    return x.reshape(B, Cf, H, W)                   # already NCHW


# ----------------------------------------------------------------------------------
# Pure-JAX reference (no Pallas) for correctness checking
# ----------------------------------------------------------------------------------
def _ref_conv_transpose(x, w, b):
    B, H, W, _ = x.shape
    Cout = w.shape[1]
    y = jnp.einsum("bhwi,iokl->bhwokl", x, w)
    y = jnp.transpose(y, (0, 1, 4, 2, 5, 3)).reshape(B, 2 * H, 2 * W, Cout)
    return y + b


def _ref_conv3x3(x, w, b):
    w_hwio = jnp.transpose(w, (2, 3, 1, 0))
    y = lax.conv_general_dilated(
        x, w_hwio, (1, 1), "SAME", dimension_numbers=("NHWC", "HWIO", "NHWC"))
    return y + b


def _ref_bn(x, bn):
    gamma, beta, mean, var = bn
    return (x - mean) * lax.rsqrt(var + _BN_EPS) * gamma + beta


def decoder_forward_ref(x_nchw, skip_connections_nchw, params):
    x = jnp.transpose(x_nchw, (0, 2, 3, 1))
    skips = [jnp.transpose(s, (0, 2, 3, 1)) for s in skip_connections_nchw][::-1]
    for i, stage in enumerate(params["stages"]):
        x = _ref_conv_transpose(x, stage["up_w"], stage["up_b"])
        x = jnp.concatenate([x, skips[i]], axis=-1)
        p = stage["block"]
        x = _erf_gelu(_ref_bn(_ref_conv3x3(x, p["w1"], p["b1"]), p["bn1"]))
        x = _erf_gelu(_ref_bn(_ref_conv3x3(x, p["w2"], p["b2"]), p["bn2"]))
    wf, bf = params["final_w"], params["final_b"]
    x = jnp.einsum("bhwi,oi->bhwo", x, wf.reshape(wf.shape[0], wf.shape[1])) + bf
    return jnp.transpose(x, (0, 3, 1, 2))


# ----------------------------------------------------------------------------------
# Parameter construction + example run
# ----------------------------------------------------------------------------------
def init_params(key, encoder_channels, decoder_channels, out_channels):
    skip_channels = encoder_channels[::-1]
    keys = iter(jax.random.split(key, 64))

    def nrm(shape, s=0.1):
        return s * jax.random.normal(next(keys), shape, jnp.float32)

    stages = []
    for i in range(len(decoder_channels) - 1):
        cin, cout = decoder_channels[i], decoder_channels[i + 1]
        bc_in = cout + skip_channels[i]
        stages.append({
            "up_w": nrm((cin, cout, 2, 2)),
            "up_b": nrm((cout,)),
            "block": {
                "w1": nrm((cout, bc_in, 3, 3)),
                "b1": nrm((cout,)),
                "bn1": (1.0 + nrm((cout,)), nrm((cout,)), nrm((cout,)),
                        1.0 + 0.1 * jnp.abs(nrm((cout,)))),
                "w2": nrm((cout, cout, 3, 3)),
                "b2": nrm((cout,)),
                "bn2": (1.0 + nrm((cout,)), nrm((cout,)), nrm((cout,)),
                        1.0 + 0.1 * jnp.abs(nrm((cout,)))),
            },
        })
    return {
        "stages": stages,
        "final_w": nrm((out_channels, decoder_channels[-1], 1, 1)),
        "final_b": nrm((out_channels,)),
    }


if __name__ == "__main__":
    key = jax.random.PRNGKey(0)
    kx, ks0, ks1, kp = jax.random.split(key, 4)

    B = 2
    encoder_channels = [8, 16]           # encoder order: shallow/high-res first
    decoder_channels = [32, 16, 8]
    out_channels = 4
    H0 = W0 = 4                          # bottleneck spatial size

    x = jax.random.normal(kx, (B, decoder_channels[0], H0, W0), jnp.float32)
    skip_connections = [
        jax.random.normal(ks0, (B, encoder_channels[0], 4 * H0, 4 * W0), jnp.float32),
        jax.random.normal(ks1, (B, encoder_channels[1], 2 * H0, 2 * W0), jnp.float32),
    ]
    params = init_params(kp, encoder_channels, decoder_channels, out_channels)

    fwd = jax.jit(decoder_forward_pallas)
    out = fwd(x, skip_connections, params)
    out = jax.block_until_ready(out)

    ref = decoder_forward_ref(x, skip_connections, params)
    assert out.shape == (B, out_channels, 4 * H0, 4 * W0), out.shape
    err = float(jnp.max(jnp.abs(out - ref)))
    assert jnp.allclose(out, ref, rtol=1e-3, atol=1e-3), err
    print("KERNEL_OK")
</pallas_src>

<mosaic_0001>
module attributes {stable_mosaic.version = 11 : i64} {
  func.func @_pointwise_kernel(%arg0: i32, %arg1: memref<1x32x16xf32, #tpu.memory_space<vmem>>, %arg2: memref<64x32xf32, #tpu.memory_space<vmem>>, %arg3: memref<64x1xf32, #tpu.memory_space<vmem>>, %arg4: memref<1x64x16xf32, #tpu.memory_space<vmem>>) attributes {dimension_semantics = [#tpu.dimension_semantics<parallel>], iteration_bounds = array<i64: 2>, scalar_prefetch = 0 : i64, scratch_operands = 0 : i64, tpu.core_type = #tpu.core_type<tc>, window_params = [{transform_indices = @transform_0, window_bounds = array<i64: 1, 32, 16>}, {pipeline_mode = #tpu.pipeline_mode<synchronous>, transform_indices = @transform_1, window_bounds = array<i64: 64, 32>}, {pipeline_mode = #tpu.pipeline_mode<synchronous>, transform_indices = @transform_2, window_bounds = array<i64: 64, 1>}, {transform_indices = @transform_3, window_bounds = array<i64: 1, 64, 16>}]} {
    %c0 = arith.constant 0 : index
    %c0_0 = arith.constant 0 : index
    %0 = vector.load %arg2[%c0, %c0_0] : memref<64x32xf32, #tpu.memory_space<vmem>>, vector<64x32xf32>
    %c0_1 = arith.constant 0 : index
    %c0_2 = arith.constant 0 : index
    %c0_3 = arith.constant 0 : index
    %1 = vector.load %arg1[%c0_1, %c0_2, %c0_3] : memref<1x32x16xf32, #tpu.memory_space<vmem>>, vector<1x32x16xf32>
    %2 = vector.shape_cast %1 : vector<1x32x16xf32> to vector<32x16xf32>
    %cst = arith.constant dense<0.000000e+00> : vector<64x16xf32>
    %3 = tpu.matmul %0, %2, %cst {dimension_numbers = #tpu.dot_dimension_numbers<[1], [0], [0], [1], [0, 0, 1, 1], [], []>} : vector<64x32xf32>, vector<32x16xf32>, vector<64x16xf32> -> vector<64x16xf32>
    %c0_4 = arith.constant 0 : index
    %c0_5 = arith.constant 0 : index
    %4 = vector.load %arg3[%c0_4, %c0_5] : memref<64x1xf32, #tpu.memory_space<vmem>>, vector<64x1xf32>
    %5 = vector.broadcast %4 : vector<64x1xf32> to vector<64x16xf32>
    %6 = arith.addf %3, %5 : vector<64x16xf32>
    %c0_6 = arith.constant 0 : index
    %c0_7 = arith.constant 0 : index
    %c0_8 = arith.constant 0 : index
    %7 = vector.load %arg4[%c0_6, %c0_7, %c0_8] : memref<1x64x16xf32, #tpu.memory_space<vmem>>, vector<1x64x16xf32>
    %8 = vector.shape_cast %7 : vector<1x64x16xf32> to vector<64x16xf32>
    %9 = vector.shape_cast %6 : vector<64x16xf32> to vector<1x64x16xf32>
    tpu.vector_store %arg4[%c0_6, %c0_7, %c0_8], %9 {strides = array<i32>} : memref<1x64x16xf32, #tpu.memory_space<vmem>>, vector<1x64x16xf32>,
    return
  }
  func.func @transform_0(%arg0: i32) -> (i32, i32, i32) {
    %c0_i32 = arith.constant 0 : i32
    %c0_i32_0 = arith.constant 0 : i32
    %c0_i32_1 = arith.constant 0 : i32
    return %arg0, %c0_i32, %c0_i32_0 : i32, i32, i32
  }
  func.func @transform_1(%arg0: i32) -> (i32, i32) {
    %c0_i32 = arith.constant 0 : i32
    %c0_i32_0 = arith.constant 0 : i32
    %c0_i32_1 = arith.constant 0 : i32
    return %c0_i32, %c0_i32_0 : i32, i32
  }
  func.func @transform_2(%arg0: i32) -> (i32, i32) {
    %c0_i32 = arith.constant 0 : i32
    %c0_i32_0 = arith.constant 0 : i32
    %c0_i32_1 = arith.constant 0 : i32
    return %c0_i32, %c0_i32_0 : i32, i32
  }
  func.func @transform_3(%arg0: i32) -> (i32, i32, i32) {
    %c0_i32 = arith.constant 0 : i32
    %c0_i32_0 = arith.constant 0 : i32
    %c0_i32_1 = arith.constant 0 : i32
    return %arg0, %c0_i32, %c0_i32_0 : i32, i32, i32
  }
}

module attributes {stable_mosaic.version = 11 : i64} {
  func.func @_conv3x3_kernel(%arg0: i32, %arg1: memref<1x16x64xf32, #tpu.memory_space<vmem>>, %arg2: memref<9x16x16xf32, #tpu.memory_space<vmem>>, %arg3: memref<16x1xf32, #tpu.memory_space<vmem>>, %arg4: memref<1x16x64xf32, #tpu.memory_space<vmem>>, %arg5: memref<16x64xf32, #tpu.memory_space<vmem>>) attributes {dimension_semantics = [#tpu.dimension_semantics<parallel>], iteration_bounds = array<i64: 2>, scalar_prefetch = 0 : i64, scratch_operands = 1 : i64, tpu.core_type = #tpu.core_type<tc>, window_params = [{transform_indices = @transform_0, window_bounds = array<i64: 1, 16, 64>}, {pipeline_mode = #tpu.pipeline_mode<synchronous>, transform_indices = @transform_1, window_bounds = array<i64: 9, 16, 16>}, {pipeline_mode = #tpu.pipeline_mode<synchronous>, transform_indices = @transform_2, window_bounds = array<i64: 16, 1>}, {transform_indices = @transform_3, window_bounds = array<i64: 1, 16, 64>}]} {
    %cst = arith.constant 0.000000e+00 : f32
    %0 = vector.broadcast %cst : f32 to vector<16x64xf32>
    %c0 = arith.constant 0 : index
    %c0_0 = arith.constant 0 : index
    %1 = vector.load %arg5[%c0, %c0_0] : memref<16x64xf32, #tpu.memory_space<vmem>>, vector<16x64xf32>
    tpu.vector_store %arg5[%c0, %c0_0], %0 {strides = array<i32>} : memref<16x64xf32, #tpu.memory_space<vmem>>, vector<16x64xf32>,
    %2 = tpu.iota {dimensions = array<i32: 1>} : vector<1x64xi32>
    %c8_i32 = arith.constant 8 : i32
    %c0_i32 = arith.constant 0 : i32
    %3 = arith.cmpi eq, %c8_i32, %c0_i32 : i32
    %c1_i32 = arith.constant 1 : i32
    %4 = arith.select %3, %c1_i32, %c8_i32 : i32
    %5 = vector.broadcast %4 : i32 to vector<1x64xi32>
    %6 = arith.remsi %2, %5 : vector<1x64xi32>
    %c0_i32_1 = arith.constant 0 : i32
    %7 = vector.broadcast %c0_i32_1 : i32 to vector<1x64xi32>
    %8 = arith.cmpi ne, %6, %7 : vector<1x64xi32>
    %c0_i32_2 = arith.constant 0 : i32
    %9 = vector.broadcast %c0_i32_2 : i32 to vector<1x64xi32>
    %10 = arith.cmpi slt, %6, %9 : vector<1x64xi32>
    %c0_i32_3 = arith.constant 0 : i32
    %11 = arith.cmpi slt, %4, %c0_i32_3 : i32
    %12 = vector.broadcast %11 : i1 to vector<1x64xi1>
    %13 = vector.broadcast %12 : vector<1x64xi1> to vector<1x64xi1>
    %14 = arith.xori %10, %13 : vector<1x64xi1>
    %15 = arith.andi %14, %8 : vector<1x64xi1>
    %16 = vector.broadcast %4 : i32 to vector<1x64xi32>
    %17 = arith.addi %6, %16 : vector<1x64xi32>
    %18 = arith.select %15, %17, %6 : vector<1x64xi1>, vector<1x64xi32>
    %c1_i32_4 = arith.constant 1 : i32
    %19 = vector.broadcast %c1_i32_4 : i32 to vector<1x64xi32>
    %20 = arith.cmpi sge, %18, %19 : vector<1x64xi32>
    %21 = arith.extui %20 : vector<1x64xi1> to vector<1x64xi32>
    %22 = arith.sitofp %21 : vector<1x64xi32> to vector<1x64xf32>
    %c6_i32 = arith.constant 6 : i32
    %23 = vector.broadcast %c6_i32 : i32 to vector<1x64xi32>
    %24 = arith.cmpi sle, %18, %23 : vector<1x64xi32>
    %25 = arith.extui %24 : vector<1x64xi1> to vector<1x64xi32>
    %26 = arith.sitofp %25 : vector<1x64xi32> to vector<1x64xf32>
    %c0_5 = arith.constant 0 : index
    %c0_6 = arith.constant 0 : index
    %c0_7 = arith.constant 0 : index
    %27 = vector.load %arg2[%c0_5, %c0_6, %c0_7] : memref<9x16x16xf32, #tpu.memory_space<vmem>>, vector<1x16x16xf32>
    %28 = vector.shape_cast %27 : vector<1x16x16xf32> to vector<16x16xf32>
    %c0_8 = arith.constant 0 : index
    %c0_9 = arith.constant 0 : index
    %c0_10 = arith.constant 0 : index
    %29 = vector.load %arg1[%c0_8, %c0_9, %c0_10] : memref<1x16x64xf32, #tpu.memory_space<vmem>>, vector<1x16x55xf32>
    %30 = vector.shape_cast %29 : vector<1x16x55xf32> to vector<16x55xf32>
    %cst_11 = arith.constant dense<0.000000e+00> : vector<16x55xf32>
    %31 = tpu.matmul %28, %30, %cst_11 {dimension_numbers = #tpu.dot_dimension_numbers<[1], [0], [0], [1], [0, 0, 1, 1], [], []>} : vector<16x16xf32>, vector<16x55xf32>, vector<16x55xf32> -> vector<16x55xf32>
    %32 = vector.extract_strided_slice %22 {offsets = [0, 9], sizes = [1, 55], strides = [1, 1]} : vector<1x64xf32> to vector<1x55xf32>
    %33 = vector.broadcast %32 : vector<1x55xf32> to vector<16x55xf32>
    %34 = arith.mulf %31, %33 : vector<16x55xf32>
    %c0_12 = arith.constant 0 : index
    %c9 = arith.constant 9 : index
    %35 = vector.load %arg5[%c0_12, %c9] : memref<16x64xf32, #tpu.memory_space<vmem>>, vector<16x55xf32>
    %36 = arith.addf %35, %34 : vector<16x55xf32>
    %c0_13 = arith.constant 0 : index
    %c9_14 = arith.constant 9 : index
    %37 = vector.load %arg5[%c0_13, %c9_14] : memref<16x64xf32, #tpu.memory_space<vmem>>, vector<16x55xf32>
    tpu.vector_store %arg5[%c0_13, %c9_14], %36 {strides = array<i32>} : memref<16x64xf32, #tpu.memory_space<vmem>>, vector<16x55xf32>,
    %c1 = arith.constant 1 : index
    %c0_15 = arith.constant 0 : index
    %c0_16 = arith.constant 0 : index
    %38 = vector.load %arg2[%c1, %c0_15, %c0_16] : memref<9x16x16xf32, #tpu.memory_space<vmem>>, vector<1x16x16xf32>
    %39 = vector.shape_cast %38 : vector<1x16x16xf32> to vector<16x16xf32>
    %c0_17 = arith.constant 0 : index
    %c0_18 = arith.constant 0 : index
    %c0_19 = arith.constant 0 : index
    %40 = vector.load %arg1[%c0_17, %c0_18, %c0_19] : memref<1x16x64xf32, #tpu.memory_space<vmem>>, vector<1x16x56xf32>
    %41 = vector.shape_cast %40 : vector<1x16x56xf32> to vector<16x56xf32>
    %cst_20 = arith.constant dense<0.000000e+00> : vector<16x56xf32>
    %42 = tpu.matmul %39, %41, %cst_20 {dimension_numbers = #tpu.dot_dimension_numbers<[1], [0], [0], [1], [0, 0, 1, 1], [], []>} : vector<16x16xf32>, vector<16x56xf32>, vector<16x56xf32> -> vector<16x56xf32>
    %c0_21 = arith.constant 0 : index
    %c8 = arith.constant 8 : index
    %43 = vector.load %arg5[%c0_21, %c8] : memref<16x64xf32, #tpu.memory_space<vmem>>, vector<16x56xf32>
    %44 = arith.addf %43, %42 : vector<16x56xf32>
    %c0_22 = arith.constant 0 : index
    %c8_23 = arith.constant 8 : index
    %45 = vector.load %arg5[%c0_22, %c8_23] : memref<16x64xf32, #tpu.memory_space<vmem>>, vector<16x56xf32>
    tpu.vector_store %arg5[%c0_22, %c8_23], %44 {strides = array<i32>} : memref<16x64xf32, #tpu.memory_space<vmem>>, vector<16x56xf32>,
    %c2 = arith.constant 2 : index
    %c0_24 = arith.constant 0 : index
    %c0_25 = arith.constant 0 : index
    %46 = vector.load %arg2[%c2, %c0_24, %c0_25] : memref<9x16x16xf32, #tpu.memory_space<vmem>>, vector<1x16x16xf32>
    %47 = vector.shape_cast %46 : vector<1x16x16xf32> to vector<16x16xf32>
    %c0_26 = arith.constant 0 : index
    %c0_27 = arith.constant 0 : index
    %c0_28 = arith.constant 0 : index
    %48 = vector.load %arg1[%c0_26, %c0_27, %c0_28] : memref<1x16x64xf32, #tpu.memory_space<vmem>>, vector<1x16x57xf32>
    %49 = vector.shape_cast %48 : vector<1x16x57xf32> to vector<16x57xf32>
    %cst_29 = arith.constant dense<0.000000e+00> : vector<16x57xf32>
    %50 = tpu.matmul %47, %49, %cst_29 {dimension_numbers = #tpu.dot_dimension_numbers<[1], [0], [0], [1], [0, 0, 1, 1], [], []>} : vector<16x16xf32>, vector<16x57xf32>, vector<16x57xf32> -> vector<16x57xf32>
    %51 = vector.extract_strided_slice %26 {offsets = [0, 7], sizes = [1, 57], strides = [1, 1]} : vector<1x64xf32> to vector<1x57xf32>
    %52 = vector.broadcast %51 : vector<1x57xf32> to vector<16x57xf32>
    %53 = arith.mulf %50, %52 : vector<16x57xf32>
    %c0_30 = arith.constant 0 : index
    %c7 = arith.constant 7 : index
    %54 = vector.load %arg5[%c0_30, %c7] : memref<16x64xf32, #tpu.memory_space<vmem>>, vector<16x57xf32>
    %55 = arith.addf %54, %53 : vector<16x57xf32>
    %c0_31 = arith.constant 0 : index
    %c7_32 = arith.constant 7 : index
    %56 = vector.load %arg5[%c0_31, %c7_32] : memref<16x64xf32, #tpu.memory_space<vmem>>, vector<16x57xf32>
    tpu.vector_store %arg5[%c0_31, %c7_32], %55 {strides = array<i32>} : memref<16x64xf32, #tpu.memory_space<vmem>>, vector<16x57xf32>,
    %c3 = arith.constant 3 : index
    %c0_33 = arith.constant 0 : index
    %c0_34 = arith.constant 0 : index
    %57 = vector.load %arg2[%c3, %c0_33, %c0_34] : memref<9x16x16xf32, #tpu.memory_space<vmem>>, vector<1x16x16xf32>
    %58 = vector.shape_cast %57 : vector<1x16x16xf32> to vector<16x16xf32>
    %c0_35 = arith.constant 0 : index
    %c0_36 = arith.constant 0 : index
    %c0_37 = arith.constant 0 : index
    %59 = vector.load %arg1[%c0_35, %c0_36, %c0_37] : memref<1x16x64xf32, #tpu.memory_space<vmem>>, vector<1x16x63xf32>
    %60 = vector.shape_cast %59 : vector<1x16x63xf32> to vector<16x63xf32>
    %cst_38 = arith.constant dense<0.000000e+00> : vector<16x63xf32>
    %61 = tpu.matmul %58, %60, %cst_38 {dimension_numbers = #tpu.dot_dimension_numbers<[1], [0], [0], [1], [0, 0, 1, 1], [], []>} : vector<16x16xf32>, vector<16x63xf32>, vector<16x63xf32> -> vector<16x63xf32>
    %62 = vector.extract_strided_slice %22 {offsets = [0, 1], sizes = [1, 63], strides = [1, 1]} : vector<1x64xf32> to vector<1x63xf32>
    %63 = vector.broadcast %62 : vector<1x63xf32> to vector<16x63xf32>
    %64 = arith.mulf %61, %63 : vector<16x63xf32>
    %c0_39 = arith.constant 0 : index
    %c1_40 = arith.constant 1 : index
    %65 = vector.load %arg5[%c0_39, %c1_40] : memref<16x64xf32, #tpu.memory_space<vmem>>, vector<16x63xf32>
    %66 = arith.addf %65, %64 : vector<16x63xf32>
    %c0_41 = arith.constant 0 : index
    %c1_42 = arith.constant 1 : index
    %67 = vector.load %arg5[%c0_41, %c1_42] : memref<16x64xf32, #tpu.memory_space<vmem>>, vector<16x63xf32>
    tpu.vector_store %arg5[%c0_41, %c1_42], %66 {strides = array<i32>} : memref<16x64xf32, #tpu.memory_space<vmem>>, vector<16x63xf32>,
    %c4 = arith.constant 4 : index
    %c0_43 = arith.constant 0 : index
    %c0_44 = arith.constant 0 : index
    %68 = vector.load %arg2[%c4, %c0_43, %c0_44] : memref<9x16x16xf32, #tpu.memory_space<vmem>>, vector<1x16x16xf32>
    %69 = vector.shape_cast %68 : vector<1x16x16xf32> to vector<16x16xf32>
    %c0_45 = arith.constant 0 : index
    %c0_46 = arith.constant 0 : index
    %c0_47 = arith.constant 0 : index
    %70 = vector.load %arg1[%c0_45, %c0_46, %c0_47] : memref<1x16x64xf32, #tpu.memory_space<vmem>>, vector<1x16x64xf32>
    %71 = vector.shape_cast %70 : vector<1x16x64xf32> to vector<16x64xf32>
    %cst_48 = arith.constant dense<0.000000e+00> : vector<16x64xf32>
    %72 = tpu.matmul %69, %71, %cst_48 {dimension_numbers = #tpu.dot_dimension_numbers<[1], [0], [0], [1], [0, 0, 1, 1], [], []>} : vector<16x16xf32>, vector<16x64xf32>, vector<16x64xf32> -> vector<16x64xf32>
    %c0_49 = arith.constant 0 : index
    %c0_50 = arith.constant 0 : index
    %73 = vector.load %arg5[%c0_49, %c0_50] : memref<16x64xf32, #tpu.memory_space<vmem>>, vector<16x64xf32>
    %74 = arith.addf %73, %72 : vector<16x64xf32>
    %c0_51 = arith.constant 0 : index
    %c0_52 = arith.constant 0 : index
    %75 = vector.load %arg5[%c0_51, %c0_52] : memref<16x64xf32, #tpu.memory_space<vmem>>, vector<16x64xf32>
    tpu.vector_store %arg5[%c0_51, %c0_52], %74 {strides = array<i32>} : memref<16x64xf32, #tpu.memory_space<vmem>>, vector<16x64xf32>,
    %c5 = arith.constant 5 : index
    %c0_53 = arith.constant 0 : index
    %c0_54 = arith.constant 0 : index
    %76 = vector.load %arg2[%c5, %c0_53, %c0_54] : memref<9x16x16xf32, #tpu.memory_space<vmem>>, vector<1x16x16xf32>
    %77 = vector.shape_cast %76 : vector<1x16x16xf32> to vector<16x16xf32>
    %c0_55 = arith.constant 0 : index
    %c0_56 = arith.constant 0 : index
    %c1_57 = arith.constant 1 : index
    %78 = vector.load %arg1[%c0_55, %c0_56, %c1_57] : memref<1x16x64xf32, #tpu.memory_space<vmem>>, vector<1x16x63xf32>
    %79 = vector.shape_cast %78 : vector<1x16x63xf32> to vector<16x63xf32>
    %cst_58 = arith.constant dense<0.000000e+00> : vector<16x63xf32>
    %80 = tpu.matmul %77, %79, %cst_58 {dimension_numbers = #tpu.dot_dimension_numbers<[1], [0], [0], [1], [0, 0, 1, 1], [], []>} : vector<16x16xf32>, vector<16x63xf32>, vector<16x63xf32> -> vector<16x63xf32>
    %81 = vector.extract_strided_slice %26 {offsets = [0, 0], sizes = [1, 63], strides = [1, 1]} : vector<1x64xf32> to vector<1x63xf32>
    %82 = vector.broadcast %81 : vector<1x63xf32> to vector<16x63xf32>
    %83 = arith.mulf %80, %82 : vector<16x63xf32>
    %c0_59 = arith.constant 0 : index
    %c0_60 = arith.constant 0 : index
    %84 = vector.load %arg5[%c0_59, %c0_60] : memref<16x64xf32, #tpu.memory_space<vmem>>, vector<16x63xf32>
    %85 = arith.addf %84, %83 : vector<16x63xf32>
    %c0_61 = arith.constant 0 : index
    %c0_62 = arith.constant 0 : index
    %86 = vector.load %arg5[%c0_61, %c0_62] : memref<16x64xf32, #tpu.memory_space<vmem>>, vector<16x63xf32>
    tpu.vector_store %arg5[%c0_61, %c0_62], %85 {strides = array<i32>} : memref<16x64xf32, #tpu.memory_space<vmem>>, vector<16x63xf32>,
    %c6 = arith.constant 6 : index
    %c0_63 = arith.constant 0 : index
    %c0_64 = arith.constant 0 : index
    %87 = vector.load %arg2[%c6, %c0_63, %c0_64] : memref<9x16x16xf32, #tpu.memory_space<vmem>>, vector<1x16x16xf32>
    %88 = vector.shape_cast %87 : vector<1x16x16xf32> to vector<16x16xf32>
    %c0_65 = arith.constant 0 : index
    %c0_66 = arith.constant 0 : index
    %c7_67 = arith.constant 7 : index
    %89 = vector.load %arg1[%c0_65, %c0_66, %c7_67] : memref<1x16x64xf32, #tpu.memory_space<vmem>>, vector<1x16x57xf32>
    %90 = vector.shape_cast %89 : vector<1x16x57xf32> to vector<16x57xf32>
    %cst_68 = arith.constant dense<0.000000e+00> : vector<16x57xf32>
    %91 = tpu.matmul %88, %90, %cst_68 {dimension_numbers = #tpu.dot_dimension_numbers<[1], [0], [0], [1], [0, 0, 1, 1], [], []>} : vector<16x16xf32>, vector<16x57xf32>, vector<16x57xf32> -> vector<16x57xf32>
    %92 = vector.extract_strided_slice %22 {offsets = [0, 0], sizes = [1, 57], strides = [1, 1]} : vector<1x64xf32> to vector<1x57xf32>
    %93 = vector.broadcast %92 : vector<1x57xf32> to vector<16x57xf32>
    %94 = arith.mulf %91, %93 : vector<16x57xf32>
    %c0_69 = arith.constant 0 : index
    %c0_70 = arith.constant 0 : index
    %95 = vector.load %arg5[%c0_69, %c0_70] : memref<16x64xf32, #tpu.memory_space<vmem>>, vector<16x57xf32>
    %96 = arith.addf %95, %94 : vector<16x57xf32>
    %c0_71 = arith.constant 0 : index
    %c0_72 = arith.constant 0 : index
    %97 = vector.load %arg5[%c0_71, %c0_72] : memref<16x64xf32, #tpu.memory_space<vmem>>, vector<16x57xf32>
    tpu.vector_store %arg5[%c0_71, %c0_72], %96 {strides = array<i32>} : memref<16x64xf32, #tpu.memory_space<vmem>>, vector<16x57xf32>,
    %c7_73 = arith.constant 7 : index
    %c0_74 = arith.constant 0 : index
    %c0_75 = arith.constant 0 : index
    %98 = vector.load %arg2[%c7_73, %c0_74, %c0_75] : memref<9x16x16xf32, #tpu.memory_space<vmem>>, vector<1x16x16xf32>
    %99 = vector.shape_cast %98 : vector<1x16x16xf32> to vector<16x16xf32>
    %c0_76 = arith.constant 0 : index
    %c0_77 = arith.constant 0 : index
    %c8_78 = arith.constant 8 : index
    %100 = vector.load %arg1[%c0_76, %c0_77, %c8_78] : memref<1x16x64xf32, #tpu.memory_space<vmem>>, vector<1x16x56xf32>
    %101 = vector.shape_cast %100 : vector<1x16x56xf32> to vector<16x56xf32>
    %cst_79 = arith.constant dense<0.000000e+00> : vector<16x56xf32>
    %102 = tpu.matmul %99, %101, %cst_79 {dimension_numbers = #tpu.dot_dimension_numbers<[1], [0], [0], [1], [0, 0, 1, 1], [], []>} : vector<16x16xf32>, vector<16x56xf32>, vector<16x56xf32> -> vector<16x56xf32>
    %c0_80 = arith.constant 0 : index
    %c0_81 = arith.constant 0 : index
    %103 = vector.load %arg5[%c0_80, %c0_81] : memref<16x64xf32, #tpu.memory_space<vmem>>, vector<16x56xf32>
    %104 = arith.addf %103, %102 : vector<16x56xf32>
    %c0_82 = arith.constant 0 : index
    %c0_83 = arith.constant 0 : index
    %105 = vector.load %arg5[%c0_82, %c0_83] : memref<16x64xf32, #tpu.memory_space<vmem>>, vector<16x56xf32>
    tpu.vector_store %arg5[%c0_82, %c0_83], %104 {strides = array<i32>} : memref<16x64xf32, #tpu.memory_space<vmem>>, vector<16x56xf32>,
    %c8_84 = arith.constant 8 : index
    %c0_85 = arith.constant 0 : index
    %c0_86 = arith.constant 0 : index
    %106 = vector.load %arg2[%c8_84, %c0_85, %c0_86] : memref<9x16x16xf32, #tpu.memory_space<vmem>>, vector<1x16x16xf32>
    %107 = vector.shape_cast %106 : vector<1x16x16xf32> to vector<16x16xf32>
    %c0_87 = arith.constant 0 : index
    %c0_88 = arith.constant 0 : index
    %c9_89 = arith.constant 9 : index
    %108 = vector.load %arg1[%c0_87, %c0_88, %c9_89] : memref<1x16x64xf32, #tpu.memory_space<vmem>>, vector<1x16x55xf32>
    %109 = vector.shape_cast %108 : vector<1x16x55xf32> to vector<16x55xf32>
    %cst_90 = arith.constant dense<0.000000e+00> : vector<16x55xf32>
    %110 = tpu.matmul %107, %109, %cst_90 {dimension_numbers = #tpu.dot_dimension_numbers<[1], [0], [0], [1], [0, 0, 1, 1], [], []>} : vector<16x16xf32>, vector<16x55xf32>, vector<16x55xf32> -> vector<16x55xf32>
    %111 = vector.extract_strided_slice %26 {offsets = [0, 0], sizes = [1, 55], strides = [1, 1]} : vector<1x64xf32> to vector<1x55xf32>
    %112 = vector.broadcast %111 : vector<1x55xf32> to vector<16x55xf32>
    %113 = arith.mulf %110, %112 : vector<16x55xf32>
    %c0_91 = arith.constant 0 : index
    %c0_92 = arith.constant 0 : index
    %114 = vector.load %arg5[%c0_91, %c0_92] : memref<16x64xf32, #tpu.memory_space<vmem>>, vector<16x55xf32>
    %115 = arith.addf %114, %113 : vector<16x55xf32>
    %c0_93 = arith.constant 0 : index
    %c0_94 = arith.constant 0 : index
    %116 = vector.load %arg5[%c0_93, %c0_94] : memref<16x64xf32, #tpu.memory_space<vmem>>, vector<16x55xf32>
    tpu.vector_store %arg5[%c0_93, %c0_94], %115 {strides = array<i32>} : memref<16x64xf32, #tpu.memory_space<vmem>>, vector<16x55xf32>,
    %c0_95 = arith.constant 0 : index
    %c0_96 = arith.constant 0 : index
    %117 = vector.load %arg5[%c0_95, %c0_96] : memref<16x64xf32, #tpu.memory_space<vmem>>, vector<16x64xf32>
    %c0_97 = arith.constant 0 : index
    %c0_98 = arith.constant 0 : index
    %118 = vector.load %arg3[%c0_97, %c0_98] : memref<16x1xf32, #tpu.memory_space<vmem>>, vector<16x1xf32>
    %119 = vector.broadcast %118 : vector<16x1xf32> to vector<16x64xf32>
    %120 = arith.addf %117, %119 : vector<16x64xf32>
    %cst_99 = arith.constant 5.000000e-01 : f32
    %121 = vector.broadcast %cst_99 : f32 to vector<16x64xf32>
    %122 = arith.mulf %121, %120 : vector<16x64xf32>
    %cst_100 = arith.constant 0.707106769 : f32
    %123 = vector.broadcast %cst_100 : f32 to vector<16x64xf32>
    %124 = arith.mulf %120, %123 : vector<16x64xf32>
    %125 = math.erf %124 : vector<16x64xf32>
    %cst_101 = arith.constant 1.000000e+00 : f32
    %126 = vector.broadcast %cst_101 : f32 to vector<16x64xf32>
    %127 = arith.addf %126, %125 : vector<16x64xf32>
    %128 = arith.mulf %122, %127 : vector<16x64xf32>
    %c0_102 = arith.constant 0 : index
    %c0_103 = arith.constant 0 : index
    %c0_104 = arith.constant 0 : index
    %129 = vector.load %arg4[%c0_102, %c0_103, %c0_104] : memref<1x16x64xf32, #tpu.memory_space<vmem>>, vector<1x16x64xf32>
    %130 = vector.shape_cast %129 : vector<1x16x64xf32> to vector<16x64xf32>
    %131 = vector.shape_cast %128 : vector<16x64xf32> to vector<1x16x64xf32>
    tpu.vector_store %arg4[%c0_102, %c0_103, %c0_104], %131 {strides = array<i32>} : memref<1x16x64xf32, #tpu.memory_space<vmem>>, vector<1x16x64xf32>,
    return
  }
  func.func @transform_0(%arg0: i32) -> (i32, i32, i32) {
    %c0_i32 = arith.constant 0 : i32
    %c0_i32_0 = arith.constant 0 : i32
    %c0_i32_1 = arith.constant 0 : i32
    return %arg0, %c0_i32, %c0_i32_0 : i32, i32, i32
  }
  func.func @transform_1(%arg0: i32) -> (i32, i32, i32) {
    %c0_i32 = arith.constant 0 : i32
    %c0_i32_0 = arith.constant 0 : i32
    %c0_i32_1 = arith.constant 0 : i32
    %c0_i32_2 = arith.constant 0 : i32
    return %c0_i32, %c0_i32_0, %c0_i32_1 : i32, i32, i32
  }
  func.func @transform_2(%arg0: i32) -> (i32, i32) {
    %c0_i32 = arith.constant 0 : i32
    %c0_i32_0 = arith.constant 0 : i32
    %c0_i32_1 = arith.constant 0 : i32
    return %c0_i32, %c0_i32_0 : i32, i32
  }
  func.func @transform_3(%arg0: i32) -> (i32, i32, i32) {
    %c0_i32 = arith.constant 0 : i32
    %c0_i32_0 = arith.constant 0 : i32
    %c0_i32_1 = arith.constant 0 : i32
    return %arg0, %c0_i32, %c0_i32_0 : i32, i32, i32
  }
}

module attributes {stable_mosaic.version = 11 : i64} {
  func.func @_conv3x3_cat_kernel(%arg0: i32, %arg1: memref<1x16x64xf32, #tpu.memory_space<vmem>>, %arg2: memref<1x16x64xf32, #tpu.memory_space<vmem>>, %arg3: memref<9x16x16xf32, #tpu.memory_space<vmem>>, %arg4: memref<9x16x16xf32, #tpu.memory_space<vmem>>, %arg5: memref<16x1xf32, #tpu.memory_space<vmem>>, %arg6: memref<1x16x64xf32, #tpu.memory_space<vmem>>, %arg7: memref<16x64xf32, #tpu.memory_space<vmem>>) attributes {dimension_semantics = [#tpu.dimension_semantics<parallel>], iteration_bounds = array<i64: 2>, scalar_prefetch = 0 : i64, scratch_operands = 1 : i64, tpu.core_type = #tpu.core_type<tc>, window_params = [{transform_indices = @transform_0, window_bounds = array<i64: 1, 16, 64>}, {transform_indices = @transform_1, window_bounds = array<i64: 1, 16, 64>}, {pipeline_mode = #tpu.pipeline_mode<synchronous>, transform_indices = @transform_2, window_bounds = array<i64: 9, 16, 16>}, {pipeline_mode = #tpu.pipeline_mode<synchronous>, transform_indices = @transform_3, window_bounds = array<i64: 9, 16, 16>}, {pipeline_mode = #tpu.pipeline_mode<synchronous>, transform_indices = @transform_4, window_bounds = array<i64: 16, 1>}, {transform_indices = @transform_5, window_bounds = array<i64: 1, 16, 64>}]} {
    %cst = arith.constant 0.000000e+00 : f32
    %0 = vector.broadcast %cst : f32 to vector<16x64xf32>
    %c0 = arith.constant 0 : index
    %c0_0 = arith.constant 0 : index
    %1 = vector.load %arg7[%c0, %c0_0] : memref<16x64xf32, #tpu.memory_space<vmem>>, vector<16x64xf32>
    tpu.vector_store %arg7[%c0, %c0_0], %0 {strides = array<i32>} : memref<16x64xf32, #tpu.memory_space<vmem>>, vector<16x64xf32>,
    %2 = tpu.iota {dimensions = array<i32: 1>} : vector<1x64xi32>
    %c8_i32 = arith.constant 8 : i32
    %c0_i32 = arith.constant 0 : i32
    %3 = arith.cmpi eq, %c8_i32, %c0_i32 : i32
    %c1_i32 = arith.constant 1 : i32
    %4 = arith.select %3, %c1_i32, %c8_i32 : i32
    %5 = vector.broadcast %4 : i32 to vector<1x64xi32>
    %6 = arith.remsi %2, %5 : vector<1x64xi32>
    %c0_i32_1 = arith.constant 0 : i32
    %7 = vector.broadcast %c0_i32_1 : i32 to vector<1x64xi32>
    %8 = arith.cmpi ne, %6, %7 : vector<1x64xi32>
    %c0_i32_2 = arith.constant 0 : i32
    %9 = vector.broadcast %c0_i32_2 : i32 to vector<1x64xi32>
    %10 = arith.cmpi slt, %6, %9 : vector<1x64xi32>
    %c0_i32_3 = arith.constant 0 : i32
    %11 = arith.cmpi slt, %4, %c0_i32_3 : i32
    %12 = vector.broadcast %11 : i1 to vector<1x64xi1>
    %13 = vector.broadcast %12 : vector<1x64xi1> to vector<1x64xi1>
    %14 = arith.xori %10, %13 : vector<1x64xi1>
    %15 = arith.andi %14, %8 : vector<1x64xi1>
    %16 = vector.broadcast %4 : i32 to vector<1x64xi32>
    %17 = arith.addi %6, %16 : vector<1x64xi32>
    %18 = arith.select %15, %17, %6 : vector<1x64xi1>, vector<1x64xi32>
    %c1_i32_4 = arith.constant 1 : i32
    %19 = vector.broadcast %c1_i32_4 : i32 to vector<1x64xi32>
    %20 = arith.cmpi sge, %18, %19 : vector<1x64xi32>
    %21 = arith.extui %20 : vector<1x64xi1> to vector<1x64xi32>
    %22 = arith.sitofp %21 : vector<1x64xi32> to vector<1x64xf32>
    %c6_i32 = arith.constant 6 : i32
    %23 = vector.broadcast %c6_i32 : i32 to vector<1x64xi32>
    %24 = arith.cmpi sle, %18, %23 : vector<1x64xi32>
    %25 = arith.extui %24 : vector<1x64xi1> to vector<1x64xi32>
    %26 = arith.sitofp %25 : vector<1x64xi32> to vector<1x64xf32>
    %c0_5 = arith.constant 0 : index
    %c0_6 = arith.constant 0 : index
    %c0_7 = arith.constant 0 : index
    %27 = vector.load %arg3[%c0_5, %c0_6, %c0_7] : memref<9x16x16xf32, #tpu.memory_space<vmem>>, vector<1x16x16xf32>
    %28 = vector.shape_cast %27 : vector<1x16x16xf32> to vector<16x16xf32>
    %c0_8 = arith.constant 0 : index
    %c0_9 = arith.constant 0 : index
    %c0_10 = arith.constant 0 : index
    %29 = vector.load %arg1[%c0_8, %c0_9, %c0_10] : memref<1x16x64xf32, #tpu.memory_space<vmem>>, vector<1x16x55xf32>
    %30 = vector.shape_cast %29 : vector<1x16x55xf32> to vector<16x55xf32>
    %cst_11 = arith.constant dense<0.000000e+00> : vector<16x55xf32>
    %31 = tpu.matmul %28, %30, %cst_11 {dimension_numbers = #tpu.dot_dimension_numbers<[1], [0], [0], [1], [0, 0, 1, 1], [], []>} : vector<16x16xf32>, vector<16x55xf32>, vector<16x55xf32> -> vector<16x55xf32>
    %32 = vector.extract_strided_slice %22 {offsets = [0, 9], sizes = [1, 55], strides = [1, 1]} : vector<1x64xf32> to vector<1x55xf32>
    %33 = vector.broadcast %32 : vector<1x55xf32> to vector<16x55xf32>
    %34 = arith.mulf %31, %33 : vector<16x55xf32>
    %c0_12 = arith.constant 0 : index
    %c9 = arith.constant 9 : index
    %35 = vector.load %arg7[%c0_12, %c9] : memref<16x64xf32, #tpu.memory_space<vmem>>, vector<16x55xf32>
    %36 = arith.addf %35, %34 : vector<16x55xf32>
    %c0_13 = arith.constant 0 : index
    %c9_14 = arith.constant 9 : index
    %37 = vector.load %arg7[%c0_13, %c9_14] : memref<16x64xf32, #tpu.memory_space<vmem>>, vector<16x55xf32>
    tpu.vector_store %arg7[%c0_13, %c9_14], %36 {strides = array<i32>} : memref<16x64xf32, #tpu.memory_space<vmem>>, vector<16x55xf32>,
    %c1 = arith.constant 1 : index
    %c0_15 = arith.constant 0 : index
    %c0_16 = arith.constant 0 : index
    %38 = vector.load %arg3[%c1, %c0_15, %c0_16] : memref<9x16x16xf32, #tpu.memory_space<vmem>>, vector<1x16x16xf32>
    %39 = vector.shape_cast %38 : vector<1x16x16xf32> to vector<16x16xf32>
    %c0_17 = arith.constant 0 : index
    %c0_18 = arith.constant 0 : index
    %c0_19 = arith.constant 0 : index
    %40 = vector.load %arg1[%c0_17, %c0_18, %c0_19] : memref<1x16x64xf32, #tpu.memory_space<vmem>>, vector<1x16x56xf32>
    %41 = vector.shape_cast %40 : vector<1x16x56xf32> to vector<16x56xf32>
    %cst_20 = arith.constant dense<0.000000e+00> : vector<16x56xf32>
    %42 = tpu.matmul %39, %41, %cst_20 {dimension_numbers = #tpu.dot_dimension_numbers<[1], [0], [0], [1], [0, 0, 1, 1], [], []>} : vector<16x16xf32>, vector<16x56xf32>, vector<16x56xf32> -> vector<16x56xf32>
    %c0_21 = arith.constant 0 : index
    %c8 = arith.constant 8 : index
    %43 = vector.load %arg7[%c0_21, %c8] : memref<16x64xf32, #tpu.memory_space<vmem>>, vector<16x56xf32>
    %44 = arith.addf %43, %42 : vector<16x56xf32>
    %c0_22 = arith.constant 0 : index
    %c8_23 = arith.constant 8 : index
    %45 = vector.load %arg7[%c0_22, %c8_23] : memref<16x64xf32, #tpu.memory_space<vmem>>, vector<16x56xf32>
    tpu.vector_store %arg7[%c0_22, %c8_23], %44 {strides = array<i32>} : memref<16x64xf32, #tpu.memory_space<vmem>>, vector<16x56xf32>,
    %c2 = arith.constant 2 : index
    %c0_24 = arith.constant 0 : index
    %c0_25 = arith.constant 0 : index
    %46 = vector.load %arg3[%c2, %c0_24, %c0_25] : memref<9x16x16xf32, #tpu.memory_space<vmem>>, vector<1x16x16xf32>
    %47 = vector.shape_cast %46 : vector<1x16x16xf32> to vector<16x16xf32>
    %c0_26 = arith.constant 0 : index
    %c0_27 = arith.constant 0 : index
    %c0_28 = arith.constant 0 : index
    %48 = vector.load %arg1[%c0_26, %c0_27, %c0_28] : memref<1x16x64xf32, #tpu.memory_space<vmem>>, vector<1x16x57xf32>
    %49 = vector.shape_cast %48 : vector<1x16x57xf32> to vector<16x57xf32>
    %cst_29 = arith.constant dense<0.000000e+00> : vector<16x57xf32>
    %50 = tpu.matmul %47, %49, %cst_29 {dimension_numbers = #tpu.dot_dimension_numbers<[1], [0], [0], [1], [0, 0, 1, 1], [], []>} : vector<16x16xf32>, vector<16x57xf32>, vector<16x57xf32> -> vector<16x57xf32>
    %51 = vector.extract_strided_slice %26 {offsets = [0, 7], sizes = [1, 57], strides = [1, 1]} : vector<1x64xf32> to vector<1x57xf32>
    %52 = vector.broadcast %51 : vector<1x57xf32> to vector<16x57xf32>
    %53 = arith.mulf %50, %52 : vector<16x57xf32>
    %c0_30 = arith.constant 0 : index
    %c7 = arith.constant 7 : index
    %54 = vector.load %arg7[%c0_30, %c7] : memref<16x64xf32, #tpu.memory_space<vmem>>, vector<16x57xf32>
    %55 = arith.addf %54, %53 : vector<16x57xf32>
    %c0_31 = arith.constant 0 : index
    %c7_32 = arith.constant 7 : index
    %56 = vector.load %arg7[%c0_31, %c7_32] : memref<16x64xf32, #tpu.memory_space<vmem>>, vector<16x57xf32>
    tpu.vector_store %arg7[%c0_31, %c7_32], %55 {strides = array<i32>} : memref<16x64xf32, #tpu.memory_space<vmem>>, vector<16x57xf32>,
    %c3 = arith.constant 3 : index
    %c0_33 = arith.constant 0 : index
    %c0_34 = arith.constant 0 : index
    %57 = vector.load %arg3[%c3, %c0_33, %c0_34] : memref<9x16x16xf32, #tpu.memory_space<vmem>>, vector<1x16x16xf32>
    %58 = vector.shape_cast %57 : vector<1x16x16xf32> to vector<16x16xf32>
    %c0_35 = arith.constant 0 : index
    %c0_36 = arith.constant 0 : index
    %c0_37 = arith.constant 0 : index
    %59 = vector.load %arg1[%c0_35, %c0_36, %c0_37] : memref<1x16x64xf32, #tpu.memory_space<vmem>>, vector<1x16x63xf32>
    %60 = vector.shape_cast %59 : vector<1x16x63xf32> to vector<16x63xf32>
    %cst_38 = arith.constant dense<0.000000e+00> : vector<16x63xf32>
    %61 = tpu.matmul %58, %60, %cst_38 {dimension_numbers = #tpu.dot_dimension_numbers<[1], [0], [0], [1], [0, 0, 1, 1], [], []>} : vector<16x16xf32>, vector<16x63xf32>, vector<16x63xf32> -> vector<16x63xf32>
    %62 = vector.extract_strided_slice %22 {offsets = [0, 1], sizes = [1, 63], strides = [1, 1]} : vector<1x64xf32> to vector<1x63xf32>
    %63 = vector.broadcast %62 : vector<1x63xf32> to vector<16x63xf32>
    %64 = arith.mulf %61, %63 : vector<16x63xf32>
    %c0_39 = arith.constant 0 : index
    %c1_40 = arith.constant 1 : index
    %65 = vector.load %arg7[%c0_39, %c1_40] : memref<16x64xf32, #tpu.memory_space<vmem>>, vector<16x63xf32>
    %66 = arith.addf %65, %64 : vector<16x63xf32>
    %c0_41 = arith.constant 0 : index
    %c1_42 = arith.constant 1 : index
    %67 = vector.load %arg7[%c0_41, %c1_42] : memref<16x64xf32, #tpu.memory_space<vmem>>, vector<16x63xf32>
    tpu.vector_store %arg7[%c0_41, %c1_42], %66 {strides = array<i32>} : memref<16x64xf32, #tpu.memory_space<vmem>>, vector<16x63xf32>,
    %c4 = arith.constant 4 : index
    %c0_43 = arith.constant 0 : index
    %c0_44 = arith.constant 0 : index
    %68 = vector.load %arg3[%c4, %c0_43, %c0_44] : memref<9x16x16xf32, #tpu.memory_space<vmem>>, vector<1x16x16xf32>
    %69 = vector.shape_cast %68 : vector<1x16x16xf32> to vector<16x16xf32>
    %c0_45 = arith.constant 0 : index
    %c0_46 = arith.constant 0 : index
    %c0_47 = arith.constant 0 : index
    %70 = vector.load %arg1[%c0_45, %c0_46, %c0_47] : memref<1x16x64xf32, #tpu.memory_space<vmem>>, vector<1x16x64xf32>
    %71 = vector.shape_cast %70 : vector<1x16x64xf32> to vector<16x64xf32>
    %cst_48 = arith.constant dense<0.000000e+00> : vector<16x64xf32>
    %72 = tpu.matmul %69, %71, %cst_48 {dimension_numbers = #tpu.dot_dimension_numbers<[1], [0], [0], [1], [0, 0, 1, 1], [], []>} : vector<16x16xf32>, vector<16x64xf32>, vector<16x64xf32> -> vector<16x64xf32>
    %c0_49 = arith.constant 0 : index
    %c0_50 = arith.constant 0 : index
    %73 = vector.load %arg7[%c0_49, %c0_50] : memref<16x64xf32, #tpu.memory_space<vmem>>, vector<16x64xf32>
    %74 = arith.addf %73, %72 : vector<16x64xf32>
    %c0_51 = arith.constant 0 : index
    %c0_52 = arith.constant 0 : index
    %75 = vector.load %arg7[%c0_51, %c0_52] : memref<16x64xf32, #tpu.memory_space<vmem>>, vector<16x64xf32>
    tpu.vector_store %arg7[%c0_51, %c0_52], %74 {strides = array<i32>} : memref<16x64xf32, #tpu.memory_space<vmem>>, vector<16x64xf32>,
    %c5 = arith.constant 5 : index
    %c0_53 = arith.constant 0 : index
    %c0_54 = arith.constant 0 : index
    %76 = vector.load %arg3[%c5, %c0_53, %c0_54] : memref<9x16x16xf32, #tpu.memory_space<vmem>>, vector<1x16x16xf32>
    %77 = vector.shape_cast %76 : vector<1x16x16xf32> to vector<16x16xf32>
    %c0_55 = arith.constant 0 : index
    %c0_56 = arith.constant 0 : index
    %c1_57 = arith.constant 1 : index
    %78 = vector.load %arg1[%c0_55, %c0_56, %c1_57] : memref<1x16x64xf32, #tpu.memory_space<vmem>>, vector<1x16x63xf32>
    %79 = vector.shape_cast %78 : vector<1x16x63xf32> to vector<16x63xf32>
    %cst_58 = arith.constant dense<0.000000e+00> : vector<16x63xf32>
    %80 = tpu.matmul %77, %79, %cst_58 {dimension_numbers = #tpu.dot_dimension_numbers<[1], [0], [0], [1], [0, 0, 1, 1], [], []>} : vector<16x16xf32>, vector<16x63xf32>, vector<16x63xf32> -> vector<16x63xf32>
    %81 = vector.extract_strided_slice %26 {offsets = [0, 0], sizes = [1, 63], strides = [1, 1]} : vector<1x64xf32> to vector<1x63xf32>
    %82 = vector.broadcast %81 : vector<1x63xf32> to vector<16x63xf32>
    %83 = arith.mulf %80, %82 : vector<16x63xf32>
    %c0_59 = arith.constant 0 : index
    %c0_60 = arith.constant 0 : index
    %84 = vector.load %arg7[%c0_59, %c0_60] : memref<16x64xf32, #tpu.memory_space<vmem>>, vector<16x63xf32>
    %85 = arith.addf %84, %83 : vector<16x63xf32>
    %c0_61 = arith.constant 0 : index
    %c0_62 = arith.constant 0 : index
    %86 = vector.load %arg7[%c0_61, %c0_62] : memref<16x64xf32, #tpu.memory_space<vmem>>, vector<16x63xf32>
    tpu.vector_store %arg7[%c0_61, %c0_62], %85 {strides = array<i32>} : memref<16x64xf32, #tpu.memory_space<vmem>>, vector<16x63xf32>,
    %c6 = arith.constant 6 : index
    %c0_63 = arith.constant 0 : index
    %c0_64 = arith.constant 0 : index
    %87 = vector.load %arg3[%c6, %c0_63, %c0_64] : memref<9x16x16xf32, #tpu.memory_space<vmem>>, vector<1x16x16xf32>
    %88 = vector.shape_cast %87 : vector<1x16x16xf32> to vector<16x16xf32>
    %c0_65 = arith.constant 0 : index
    %c0_66 = arith.constant 0 : index
    %c7_67 = arith.constant 7 : index
    %89 = vector.load %arg1[%c0_65, %c0_66, %c7_67] : memref<1x16x64xf32, #tpu.memory_space<vmem>>, vector<1x16x57xf32>
    %90 = vector.shape_cast %89 : vector<1x16x57xf32> to vector<16x57xf32>
    %cst_68 = arith.constant dense<0.000000e+00> : vector<16x57xf32>
    %91 = tpu.matmul %88, %90, %cst_68 {dimension_numbers = #tpu.dot_dimension_numbers<[1], [0], [0], [1], [0, 0, 1, 1], [], []>} : vector<16x16xf32>, vector<16x57xf32>, vector<16x57xf32> -> vector<16x57xf32>
    %92 = vector.extract_strided_slice %22 {offsets = [0, 0], sizes = [1, 57], strides = [1, 1]} : vector<1x64xf32> to vector<1x57xf32>
    %93 = vector.broadcast %92 : vector<1x57xf32> to vector<16x57xf32>
    %94 = arith.mulf %91, %93 : vector<16x57xf32>
    %c0_69 = arith.constant 0 : index
    %c0_70 = arith.constant 0 : index
    %95 = vector.load %arg7[%c0_69, %c0_70] : memref<16x64xf32, #tpu.memory_space<vmem>>, vector<16x57xf32>
    %96 = arith.addf %95, %94 : vector<16x57xf32>
    %c0_71 = arith.constant 0 : index
    %c0_72 = arith.constant 0 : index
    %97 = vector.load %arg7[%c0_71, %c0_72] : memref<16x64xf32, #tpu.memory_space<vmem>>, vector<16x57xf32>
    tpu.vector_store %arg7[%c0_71, %c0_72], %96 {strides = array<i32>} : memref<16x64xf32, #tpu.memory_space<vmem>>, vector<16x57xf32>,
    %c7_73 = arith.constant 7 : index
    %c0_74 = arith.constant 0 : index
    %c0_75 = arith.constant 0 : index
    %98 = vector.load %arg3[%c7_73, %c0_74, %c0_75] : memref<9x16x16xf32, #tpu.memory_space<vmem>>, vector<1x16x16xf32>
    %99 = vector.shape_cast %98 : vector<1x16x16xf32> to vector<16x16xf32>
    %c0_76 = arith.constant 0 : index
    %c0_77 = arith.constant 0 : index
    %c8_78 = arith.constant 8 : index
    %100 = vector.load %arg1[%c0_76, %c0_77, %c8_78] : memref<1x16x64xf32, #tpu.memory_space<vmem>>, vector<1x16x56xf32>
    %101 = vector.shape_cast %100 : vector<1x16x56xf32> to vector<16x56xf32>
    %cst_79 = arith.constant dense<0.000000e+00> : vector<16x56xf32>
    %102 = tpu.matmul %99, %101, %cst_79 {dimension_numbers = #tpu.dot_dimension_numbers<[1], [0], [0], [1], [0, 0, 1, 1], [], []>} : vector<16x16xf32>, vector<16x56xf32>, vector<16x56xf32> -> vector<16x56xf32>
    %c0_80 = arith.constant 0 : index
    %c0_81 = arith.constant 0 : index
    %103 = vector.load %arg7[%c0_80, %c0_81] : memref<16x64xf32, #tpu.memory_space<vmem>>, vector<16x56xf32>
    %104 = arith.addf %103, %102 : vector<16x56xf32>
    %c0_82 = arith.constant 0 : index
    %c0_83 = arith.constant 0 : index
    %105 = vector.load %arg7[%c0_82, %c0_83] : memref<16x64xf32, #tpu.memory_space<vmem>>, vector<16x56xf32>
    tpu.vector_store %arg7[%c0_82, %c0_83], %104 {strides = array<i32>} : memref<16x64xf32, #tpu.memory_space<vmem>>, vector<16x56xf32>,
    %c8_84 = arith.constant 8 : index
    %c0_85 = arith.constant 0 : index
    %c0_86 = arith.constant 0 : index
    %106 = vector.load %arg3[%c8_84, %c0_85, %c0_86] : memref<9x16x16xf32, #tpu.memory_space<vmem>>, vector<1x16x16xf32>
    %107 = vector.shape_cast %106 : vector<1x16x16xf32> to vector<16x16xf32>
    %c0_87 = arith.constant 0 : index
    %c0_88 = arith.constant 0 : index
    %c9_89 = arith.constant 9 : index
    %108 = vector.load %arg1[%c0_87, %c0_88, %c9_89] : memref<1x16x64xf32, #tpu.memory_space<vmem>>, vector<1x16x55xf32>
    %109 = vector.shape_cast %108 : vector<1x16x55xf32> to vector<16x55xf32>
    %cst_90 = arith.constant dense<0.000000e+00> : vector<16x55xf32>
    %110 = tpu.matmul %107, %109, %cst_90 {dimension_numbers = #tpu.dot_dimension_numbers<[1], [0], [0], [1], [0, 0, 1, 1], [], []>} : vector<16x16xf32>, vector<16x55xf32>, vector<16x55xf32> -> vector<16x55xf32>
    %111 = vector.extract_strided_slice %26 {offsets = [0, 0], sizes = [1, 55], strides = [1, 1]} : vector<1x64xf32> to vector<1x55xf32>
    %112 = vector.broadcast %111 : vector<1x55xf32> to vector<16x55xf32>
    %113 = arith.mulf %110, %112 : vector<16x55xf32>
    %c0_91 = arith.constant 0 : index
    %c0_92 = arith.constant 0 : index
    %114 = vector.load %arg7[%c0_91, %c0_92] : memref<16x64xf32, #tpu.memory_space<vmem>>, vector<16x55xf32>
    %115 = arith.addf %114, %113 : vector<16x55xf32>
    %c0_93 = arith.constant 0 : index
    %c0_94 = arith.constant 0 : index
    %116 = vector.load %arg7[%c0_93, %c0_94] : memref<16x64xf32, #tpu.memory_space<vmem>>, vector<16x55xf32>
    tpu.vector_store %arg7[%c0_93, %c0_94], %115 {strides = array<i32>} : memref<16x64xf32, #tpu.memory_space<vmem>>, vector<16x55xf32>,
    %117 = tpu.iota {dimensions = array<i32: 1>} : vector<1x64xi32>
    %c8_i32_95 = arith.constant 8 : i32
    %c0_i32_96 = arith.constant 0 : i32
    %118 = arith.cmpi eq, %c8_i32_95, %c0_i32_96 : i32
    %c1_i32_97 = arith.constant 1 : i32
    %119 = arith.select %118, %c1_i32_97, %c8_i32_95 : i32
    %120 = vector.broadcast %119 : i32 to vector<1x64xi32>
    %121 = arith.remsi %117, %120 : vector<1x64xi32>
    %c0_i32_98 = arith.constant 0 : i32
    %122 = vector.broadcast %c0_i32_98 : i32 to vector<1x64xi32>
    %123 = arith.cmpi ne, %121, %122 : vector<1x64xi32>
    %c0_i32_99 = arith.constant 0 : i32
    %124 = vector.broadcast %c0_i32_99 : i32 to vector<1x64xi32>
    %125 = arith.cmpi slt, %121, %124 : vector<1x64xi32>
    %c0_i32_100 = arith.constant 0 : i32
    %126 = arith.cmpi slt, %119, %c0_i32_100 : i32
    %127 = vector.broadcast %126 : i1 to vector<1x64xi1>
    %128 = vector.broadcast %127 : vector<1x64xi1> to vector<1x64xi1>
    %129 = arith.xori %125, %128 : vector<1x64xi1>
    %130 = arith.andi %129, %123 : vector<1x64xi1>
    %131 = vector.broadcast %119 : i32 to vector<1x64xi32>
    %132 = arith.addi %121, %131 : vector<1x64xi32>
    %133 = arith.select %130, %132, %121 : vector<1x64xi1>, vector<1x64xi32>
    %c1_i32_101 = arith.constant 1 : i32
    %134 = vector.broadcast %c1_i32_101 : i32 to vector<1x64xi32>
    %135 = arith.cmpi sge, %133, %134 : vector<1x64xi32>
    %136 = arith.extui %135 : vector<1x64xi1> to vector<1x64xi32>
    %137 = arith.sitofp %136 : vector<1x64xi32> to vector<1x64xf32>
    %c6_i32_102 = arith.constant 6 : i32
    %138 = vector.broadcast %c6_i32_102 : i32 to vector<1x64xi32>
    %139 = arith.cmpi sle, %133, %138 : vector<1x64xi32>
    %140 = arith.extui %139 : vector<1x64xi1> to vector<1x64xi32>
    %141 = arith.sitofp %140 : vector<1x64xi32> to vector<1x64xf32>
    %c0_103 = arith.constant 0 : index
    %c0_104 = arith.constant 0 : index
    %c0_105 = arith.constant 0 : index
    %142 = vector.load %arg4[%c0_103, %c0_104, %c0_105] : memref<9x16x16xf32, #tpu.memory_space<vmem>>, vector<1x16x16xf32>
    %143 = vector.shape_cast %142 : vector<1x16x16xf32> to vector<16x16xf32>
    %c0_106 = arith.constant 0 : index
    %c0_107 = arith.constant 0 : index
    %c0_108 = arith.constant 0 : index
    %144 = vector.load %arg2[%c0_106, %c0_107, %c0_108] : memref<1x16x64xf32, #tpu.memory_space<vmem>>, vector<1x16x55xf32>
    %145 = vector.shape_cast %144 : vector<1x16x55xf32> to vector<16x55xf32>
    %cst_109 = arith.constant dense<0.000000e+00> : vector<16x55xf32>
    %146 = tpu.matmul %143, %145, %cst_109 {dimension_numbers = #tpu.dot_dimension_numbers<[1], [0], [0], [1], [0, 0, 1, 1], [], []>} : vector<16x16xf32>, vector<16x55xf32>, vector<16x55xf32> -> vector<16x55xf32>
    %147 = vector.extract_strided_slice %137 {offsets = [0, 9], sizes = [1, 55], strides = [1, 1]} : vector<1x64xf32> to vector<1x55xf32>
    %148 = vector.broadcast %147 : vector<1x55xf32> to vector<16x55xf32>
    %149 = arith.mulf %146, %148 : vector<16x55xf32>
    %c0_110 = arith.constant 0 : index
    %c9_111 = arith.constant 9 : index
    %150 = vector.load %arg7[%c0_110, %c9_111] : memref<16x64xf32, #tpu.memory_space<vmem>>, vector<16x55xf32>
    %151 = arith.addf %150, %149 : vector<16x55xf32>
    %c0_112 = arith.constant 0 : index
    %c9_113 = arith.constant 9 : index
    %152 = vector.load %arg7[%c0_112, %c9_113] : memref<16x64xf32, #tpu.memory_space<vmem>>, vector<16x55xf32>
    tpu.vector_store %arg7[%c0_112, %c9_113], %151 {strides = array<i32>} : memref<16x64xf32, #tpu.memory_space<vmem>>, vector<16x55xf32>,
    %c1_114 = arith.constant 1 : index
    %c0_115 = arith.constant 0 : index
    %c0_116 = arith.constant 0 : index
    %153 = vector.load %arg4[%c1_114, %c0_115, %c0_116] : memref<9x16x16xf32, #tpu.memory_space<vmem>>, vector<1x16x16xf32>
    %154 = vector.shape_cast %153 : vector<1x16x16xf32> to vector<16x16xf32>
    %c0_117 = arith.constant 0 : index
    %c0_118 = arith.constant 0 : index
    %c0_119 = arith.constant 0 : index
    %155 = vector.load %arg2[%c0_117, %c0_118, %c0_119] : memref<1x16x64xf32, #tpu.memory_space<vmem>>, vector<1x16x56xf32>
    %156 = vector.shape_cast %155 : vector<1x16x56xf32> to vector<16x56xf32>
    %cst_120 = arith.constant dense<0.000000e+00> : vector<16x56xf32>
    %157 = tpu.matmul %154, %156, %cst_120 {dimension_numbers = #tpu.dot_dimension_numbers<[1], [0], [0], [1], [0, 0, 1, 1], [], []>} : vector<16x16xf32>, vector<16x56xf32>, vector<16x56xf32> -> vector<16x56xf32>
    %c0_121 = arith.constant 0 : index
    %c8_122 = arith.constant 8 : index
    %158 = vector.load %arg7[%c0_121, %c8_122] : memref<16x64xf32, #tpu.memory_space<vmem>>, vector<16x56xf32>
    %159 = arith.addf %158, %157 : vector<16x56xf32>
    %c0_123 = arith.constant 0 : index
    %c8_124 = arith.constant 8 : index
    %160 = vector.load %arg7[%c0_123, %c8_124] : memref<16x64xf32, #tpu.memory_space<vmem>>, vector<16x56xf32>
    tpu.vector_store %arg7[%c0_123, %c8_124], %159 {strides = array<i32>} : memref<16x64xf32, #tpu.memory_space<vmem>>, vector<16x56xf32>,
    %c2_125 = arith.constant 2 : index
    %c0_126 = arith.constant 0 : index
    %c0_127 = arith.constant 0 : index
    %161 = vector.load %arg4[%c2_125, %c0_126, %c0_127] : memref<9x16x16xf32, #tpu.memory_space<vmem>>, vector<1x16x16xf32>
    %162 = vector.shape_cast %161 : vector<1x16x16xf32> to vector<16x16xf32>
    %c0_128 = arith.constant 0 : index
    %c0_129 = arith.constant 0 : index
    %c0_130 = arith.constant 0 : index
    %163 = vector.load %arg2[%c0_128, %c0_129, %c0_130] : memref<1x16x64xf32, #tpu.memory_space<vmem>>, vector<1x16x57xf32>
    %164 = vector.shape_cast %163 : vector<1x16x57xf32> to vector<16x57xf32>
    %cst_131 = arith.constant dense<0.000000e+00> : vector<16x57xf32>
    %165 = tpu.matmul %162, %164, %cst_131 {dimension_numbers = #tpu.dot_dimension_numbers<[1], [0], [0], [1], [0, 0, 1, 1], [], []>} : vector<16x16xf32>, vector<16x57xf32>, vector<16x57xf32> -> vector<16x57xf32>
    %166 = vector.extract_strided_slice %141 {offsets = [0, 7], sizes = [1, 57], strides = [1, 1]} : vector<1x64xf32> to vector<1x57xf32>
    %167 = vector.broadcast %166 : vector<1x57xf32> to vector<16x57xf32>
    %168 = arith.mulf %165, %167 : vector<16x57xf32>
    %c0_132 = arith.constant 0 : index
    %c7_133 = arith.constant 7 : index
    %169 = vector.load %arg7[%c0_132, %c7_133] : memref<16x64xf32, #tpu.memory_space<vmem>>, vector<16x57xf32>
    %170 = arith.addf %169, %168 : vector<16x57xf32>
    %c0_134 = arith.constant 0 : index
    %c7_135 = arith.constant 7 : index
    %171 = vector.load %arg7[%c0_134, %c7_135] : memref<16x64xf32, #tpu.memory_space<vmem>>, vector<16x57xf32>
    tpu.vector_store %arg7[%c0_134, %c7_135], %170 {strides = array<i32>} : memref<16x64xf32, #tpu.memory_space<vmem>>, vector<16x57xf32>,
    %c3_136 = arith.constant 3 : index
    %c0_137 = arith.constant 0 : index
    %c0_138 = arith.constant 0 : index
    %172 = vector.load %arg4[%c3_136, %c0_137, %c0_138] : memref<9x16x16xf32, #tpu.memory_space<vmem>>, vector<1x16x16xf32>
    %173 = vector.shape_cast %172 : vector<1x16x16xf32> to vector<16x16xf32>
    %c0_139 = arith.constant 0 : index
    %c0_140 = arith.constant 0 : index
    %c0_141 = arith.constant 0 : index
    %174 = vector.load %arg2[%c0_139, %c0_140, %c0_141] : memref<1x16x64xf32, #tpu.memory_space<vmem>>, vector<1x16x63xf32>
    %175 = vector.shape_cast %174 : vector<1x16x63xf32> to vector<16x63xf32>
    %cst_142 = arith.constant dense<0.000000e+00> : vector<16x63xf32>
    %176 = tpu.matmul %173, %175, %cst_142 {dimension_numbers = #tpu.dot_dimension_numbers<[1], [0], [0], [1], [0, 0, 1, 1], [], []>} : vector<16x16xf32>, vector<16x63xf32>, vector<16x63xf32> -> vector<16x63xf32>
    %177 = vector.extract_strided_slice %137 {offsets = [0, 1], sizes = [1, 63], strides = [1, 1]} : vector<1x64xf32> to vector<1x63xf32>
    %178 = vector.broadcast %177 : vector<1x63xf32> to vector<16x63xf32>
    %179 = arith.mulf %176, %178 : vector<16x63xf32>
    %c0_143 = arith.constant 0 : index
    %c1_144 = arith.constant 1 : index
    %180 = vector.load %arg7[%c0_143, %c1_144] : memref<16x64xf32, #tpu.memory_space<vmem>>, vector<16x63xf32>
    %181 = arith.addf %180, %179 : vector<16x63xf32>
    %c0_145 = arith.constant 0 : index
    %c1_146 = arith.constant 1 : index
    %182 = vector.load %arg7[%c0_145, %c1_146] : memref<16x64xf32, #tpu.memory_space<vmem>>, vector<16x63xf32>
    tpu.vector_store %arg7[%c0_145, %c1_146], %181 {strides = array<i32>} : memref<16x64xf32, #tpu.memory_space<vmem>>, vector<16x63xf32>,
    %c4_147 = arith.constant 4 : index
    %c0_148 = arith.constant 0 : index
    %c0_149 = arith.constant 0 : index
    %183 = vector.load %arg4[%c4_147, %c0_148, %c0_149] : memref<9x16x16xf32, #tpu.memory_space<vmem>>, vector<1x16x16xf32>
    %184 = vector.shape_cast %183 : vector<1x16x16xf32> to vector<16x16xf32>
    %c0_150 = arith.constant 0 : index
    %c0_151 = arith.constant 0 : index
    %c0_152 = arith.constant 0 : index
    %185 = vector.load %arg2[%c0_150, %c0_151, %c0_152] : memref<1x16x64xf32, #tpu.memory_space<vmem>>, vector<1x16x64xf32>
    %186 = vector.shape_cast %185 : vector<1x16x64xf32> to vector<16x64xf32>
    %cst_153 = arith.constant dense<0.000000e+00> : vector<16x64xf32>
    %187 = tpu.matmul %184, %186, %cst_153 {dimension_numbers = #tpu.dot_dimension_numbers<[1], [0], [0], [1], [0, 0, 1, 1], [], []>} : vector<16x16xf32>, vector<16x64xf32>, vector<16x64xf32> -> vector<16x64xf32>
    %c0_154 = arith.constant 0 : index
    %c0_155 = arith.constant 0 : index
    %188 = vector.load %arg7[%c0_154, %c0_155] : memref<16x64xf32, #tpu.memory_space<vmem>>, vector<16x64xf32>
    %189 = arith.addf %188, %187 : vector<16x64xf32>
    %c0_156 = arith.constant 0 : index
    %c0_157 = arith.constant 0 : index
    %190 = vector.load %arg7[%c0_156, %c0_157] : memref<16x64xf32, #tpu.memory_space<vmem>>, vector<16x64xf32>
    tpu.vector_store %arg7[%c0_156, %c0_157], %189 {strides = array<i32>} : memref<16x64xf32, #tpu.memory_space<vmem>>, vector<16x64xf32>,
    %c5_158 = arith.constant 5 : index
    %c0_159 = arith.constant 0 : index
    %c0_160 = arith.constant 0 : index
    %191 = vector.load %arg4[%c5_158, %c0_159, %c0_160] : memref<9x16x16xf32, #tpu.memory_space<vmem>>, vector<1x16x16xf32>
    %192 = vector.shape_cast %191 : vector<1x16x16xf32> to vector<16x16xf32>
    %c0_161 = arith.constant 0 : index
    %c0_162 = arith.constant 0 : index
    %c1_163 = arith.constant 1 : index
    %193 = vector.load %arg2[%c0_161, %c0_162, %c1_163] : memref<1x16x64xf32, #tpu.memory_space<vmem>>, vector<1x16x63xf32>
    %194 = vector.shape_cast %193 : vector<1x16x63xf32> to vector<16x63xf32>
    %cst_164 = arith.constant dense<0.000000e+00> : vector<16x63xf32>
    %195 = tpu.matmul %192, %194, %cst_164 {dimension_numbers = #tpu.dot_dimension_numbers<[1], [0], [0], [1], [0, 0, 1, 1], [], []>} : vector<16x16xf32>, vector<16x63xf32>, vector<16x63xf32> -> vector<16x63xf32>
    %196 = vector.extract_strided_slice %141 {offsets = [0, 0], sizes = [1, 63], strides = [1, 1]} : vector<1x64xf32> to vector<1x63xf32>
    %197 = vector.broadcast %196 : vector<1x63xf32> to vector<16x63xf32>
    %198 = arith.mulf %195, %197 : vector<16x63xf32>
    %c0_165 = arith.constant 0 : index
    %c0_166 = arith.constant 0 : index
    %199 = vector.load %arg7[%c0_165, %c0_166] : memref<16x64xf32, #tpu.memory_space<vmem>>, vector<16x63xf32>
    %200 = arith.addf %199, %198 : vector<16x63xf32>
    %c0_167 = arith.constant 0 : index
    %c0_168 = arith.constant 0 : index
    %201 = vector.load %arg7[%c0_167, %c0_168] : memref<16x64xf32, #tpu.memory_space<vmem>>, vector<16x63xf32>
    tpu.vector_store %arg7[%c0_167, %c0_168], %200 {strides = array<i32>} : memref<16x64xf32, #tpu.memory_space<vmem>>, vector<16x63xf32>,
    %c6_169 = arith.constant 6 : index
    %c0_170 = arith.constant 0 : index
    %c0_171 = arith.constant 0 : index
    %202 = vector.load %arg4[%c6_169, %c0_170, %c0_171] : memref<9x16x16xf32, #tpu.memory_space<vmem>>, vector<1x16x16xf32>
    %203 = vector.shape_cast %202 : vector<1x16x16xf32> to vector<16x16xf32>
    %c0_172 = arith.constant 0 : index
    %c0_173 = arith.constant 0 : index
    %c7_174 = arith.constant 7 : index
    %204 = vector.load %arg2[%c0_172, %c0_173, %c7_174] : memref<1x16x64xf32, #tpu.memory_space<vmem>>, vector<1x16x57xf32>
    %205 = vector.shape_cast %204 : vector<1x16x57xf32> to vector<16x57xf32>
    %cst_175 = arith.constant dense<0.000000e+00> : vector<16x57xf32>
    %206 = tpu.matmul %203, %205, %cst_175 {dimension_numbers = #tpu.dot_dimension_numbers<[1], [0], [0], [1], [0, 0, 1, 1], [], []>} : vector<16x16xf32>, vector<16x57xf32>, vector<16x57xf32> -> vector<16x57xf32>
    %207 = vector.extract_strided_slice %137 {offsets = [0, 0], sizes = [1, 57], strides = [1, 1]} : vector<1x64xf32> to vector<1x57xf32>
    %208 = vector.broadcast %207 : vector<1x57xf32> to vector<16x57xf32>
    %209 = arith.mulf %206, %208 : vector<16x57xf32>
    %c0_176 = arith.constant 0 : index
    %c0_177 = arith.constant 0 : index
    %210 = vector.load %arg7[%c0_176, %c0_177] : memref<16x64xf32, #tpu.memory_space<vmem>>, vector<16x57xf32>
    %211 = arith.addf %210, %209 : vector<16x57xf32>
    %c0_178 = arith.constant 0 : index
    %c0_179 = arith.constant 0 : index
    %212 = vector.load %arg7[%c0_178, %c0_179] : memref<16x64xf32, #tpu.memory_space<vmem>>, vector<16x57xf32>
    tpu.vector_store %arg7[%c0_178, %c0_179], %211 {strides = array<i32>} : memref<16x64xf32, #tpu.memory_space<vmem>>, vector<16x57xf32>,
    %c7_180 = arith.constant 7 : index
    %c0_181 = arith.constant 0 : index
    %c0_182 = arith.constant 0 : index
    %213 = vector.load %arg4[%c7_180, %c0_181, %c0_182] : memref<9x16x16xf32, #tpu.memory_space<vmem>>, vector<1x16x16xf32>
    %214 = vector.shape_cast %213 : vector<1x16x16xf32> to vector<16x16xf32>
    %c0_183 = arith.constant 0 : index
    %c0_184 = arith.constant 0 : index
    %c8_185 = arith.constant 8 : index
    %215 = vector.load %arg2[%c0_183, %c0_184, %c8_185] : memref<1x16x64xf32, #tpu.memory_space<vmem>>, vector<1x16x56xf32>
    %216 = vector.shape_cast %215 : vector<1x16x56xf32> to vector<16x56xf32>
    %cst_186 = arith.constant dense<0.000000e+00> : vector<16x56xf32>
    %217 = tpu.matmul %214, %216, %cst_186 {dimension_numbers = #tpu.dot_dimension_numbers<[1], [0], [0], [1], [0, 0, 1, 1], [], []>} : vector<16x16xf32>, vector<16x56xf32>, vector<16x56xf32> -> vector<16x56xf32>
    %c0_187 = arith.constant 0 : index
    %c0_188 = arith.constant 0 : index
    %218 = vector.load %arg7[%c0_187, %c0_188] : memref<16x64xf32, #tpu.memory_space<vmem>>, vector<16x56xf32>
    %219 = arith.addf %218, %217 : vector<16x56xf32>
    %c0_189 = arith.constant 0 : index
    %c0_190 = arith.constant 0 : index
    %220 = vector.load %arg7[%c0_189, %c0_190] : memref<16x64xf32, #tpu.memory_space<vmem>>, vector<16x56xf32>
    tpu.vector_store %arg7[%c0_189, %c0_190], %219 {strides = array<i32>} : memref<16x64xf32, #tpu.memory_space<vmem>>, vector<16x56xf32>,
    %c8_191 = arith.constant 8 : index
    %c0_192 = arith.constant 0 : index
    %c0_193 = arith.constant 0 : index
    %221 = vector.load %arg4[%c8_191, %c0_192, %c0_193] : memref<9x16x16xf32, #tpu.memory_space<vmem>>, vector<1x16x16xf32>
    %222 = vector.shape_cast %221 : vector<1x16x16xf32> to vector<16x16xf32>
    %c0_194 = arith.constant 0 : index
    %c0_195 = arith.constant 0 : index
    %c9_196 = arith.constant 9 : index
    %223 = vector.load %arg2[%c0_194, %c0_195, %c9_196] : memref<1x16x64xf32, #tpu.memory_space<vmem>>, vector<1x16x55xf32>
    %224 = vector.shape_cast %223 : vector<1x16x55xf32> to vector<16x55xf32>
    %cst_197 = arith.constant dense<0.000000e+00> : vector<16x55xf32>
    %225 = tpu.matmul %222, %224, %cst_197 {dimension_numbers = #tpu.dot_dimension_numbers<[1], [0], [0], [1], [0, 0, 1, 1], [], []>} : vector<16x16xf32>, vector<16x55xf32>, vector<16x55xf32> -> vector<16x55xf32>
    %226 = vector.extract_strided_slice %141 {offsets = [0, 0], sizes = [1, 55], strides = [1, 1]} : vector<1x64xf32> to vector<1x55xf32>
    %227 = vector.broadcast %226 : vector<1x55xf32> to vector<16x55xf32>
    %228 = arith.mulf %225, %227 : vector<16x55xf32>
    %c0_198 = arith.constant 0 : index
    %c0_199 = arith.constant 0 : index
    %229 = vector.load %arg7[%c0_198, %c0_199] : memref<16x64xf32, #tpu.memory_space<vmem>>, vector<16x55xf32>
    %230 = arith.addf %229, %228 : vector<16x55xf32>
    %c0_200 = arith.constant 0 : index
    %c0_201 = arith.constant 0 : index
    %231 = vector.load %arg7[%c0_200, %c0_201] : memref<16x64xf32, #tpu.memory_space<vmem>>, vector<16x55xf32>
    tpu.vector_store %arg7[%c0_200, %c0_201], %230 {strides = array<i32>} : memref<16x64xf32, #tpu.memory_space<vmem>>, vector<16x55xf32>,
    %c0_202 = arith.constant 0 : index
    %c0_203 = arith.constant 0 : index
    %232 = vector.load %arg7[%c0_202, %c0_203] : memref<16x64xf32, #tpu.memory_space<vmem>>, vector<16x64xf32>
    %c0_204 = arith.constant 0 : index
    %c0_205 = arith.constant 0 : index
    %233 = vector.load %arg5[%c0_204, %c0_205] : memref<16x1xf32, #tpu.memory_space<vmem>>, vector<16x1xf32>
    %234 = vector.broadcast %233 : vector<16x1xf32> to vector<16x64xf32>
    %235 = arith.addf %232, %234 : vector<16x64xf32>
    %cst_206 = arith.constant 5.000000e-01 : f32
    %236 = vector.broadcast %cst_206 : f32 to vector<16x64xf32>
    %237 = arith.mulf %236, %235 : vector<16x64xf32>
    %cst_207 = arith.constant 0.707106769 : f32
    %238 = vector.broadcast %cst_207 : f32 to vector<16x64xf32>
    %239 = arith.mulf %235, %238 : vector<16x64xf32>
    %240 = math.erf %239 : vector<16x64xf32>
    %cst_208 = arith.constant 1.000000e+00 : f32
    %241 = vector.broadcast %cst_208 : f32 to vector<16x64xf32>
    %242 = arith.addf %241, %240 : vector<16x64xf32>
    %243 = arith.mulf %237, %242 : vector<16x64xf32>
    %c0_209 = arith.constant 0 : index
    %c0_210 = arith.constant 0 : index
    %c0_211 = arith.constant 0 : index
    %244 = vector.load %arg6[%c0_209, %c0_210, %c0_211] : memref<1x16x64xf32, #tpu.memory_space<vmem>>, vector<1x16x64xf32>
    %245 = vector.shape_cast %244 : vector<1x16x64xf32> to vector<16x64xf32>
    %246 = vector.shape_cast %243 : vector<16x64xf32> to vector<1x16x64xf32>
    tpu.vector_store %arg6[%c0_209, %c0_210, %c0_211], %246 {strides = array<i32>} : memref<1x16x64xf32, #tpu.memory_space<vmem>>, vector<1x16x64xf32>,
    return
  }
  func.func @transform_0(%arg0: i32) -> (i32, i32, i32) {
    %c0_i32 = arith.constant 0 : i32
    %c0_i32_0 = arith.constant 0 : i32
    %c0_i32_1 = arith.constant 0 : i32
    return %arg0, %c0_i32, %c0_i32_0 : i32, i32, i32
  }
  func.func @transform_1(%arg0: i32) -> (i32, i32, i32) {
    %c0_i32 = arith.constant 0 : i32
    %c0_i32_0 = arith.constant 0 : i32
    %c0_i32_1 = arith.constant 0 : i32
    return %arg0, %c0_i32, %c0_i32_0 : i32, i32, i32
  }
  func.func @transform_2(%arg0: i32) -> (i32, i32, i32) {
    %c0_i32 = arith.constant 0 : i32
    %c0_i32_0 = arith.constant 0 : i32
    %c0_i32_1 = arith.constant 0 : i32
    %c0_i32_2 = arith.constant 0 : i32
    return %c0_i32, %c0_i32_0, %c0_i32_1 : i32, i32, i32
  }
  func.func @transform_3(%arg0: i32) -> (i32, i32, i32) {
    %c0_i32 = arith.constant 0 : i32
    %c0_i32_0 = arith.constant 0 : i32
    %c0_i32_1 = arith.constant 0 : i32
    %c0_i32_2 = arith.constant 0 : i32
    return %c0_i32, %c0_i32_0, %c0_i32_1 : i32, i32, i32
  }
  func.func @transform_4(%arg0: i32) -> (i32, i32) {
    %c0_i32 = arith.constant 0 : i32
    %c0_i32_0 = arith.constant 0 : i32
    %c0_i32_1 = arith.constant 0 : i32
    return %c0_i32, %c0_i32_0 : i32, i32
  }
  func.func @transform_5(%arg0: i32) -> (i32, i32, i32) {
    %c0_i32 = arith.constant 0 : i32
    %c0_i32_0 = arith.constant 0 : i32
    %c0_i32_1 = arith.constant 0 : i32
    return %arg0, %c0_i32, %c0_i32_0 : i32, i32, i32
  }
}

module attributes {stable_mosaic.version = 11 : i64} {
  func.func @_pointwise_kernel(%arg0: i32, %arg1: memref<1x16x64xf32, #tpu.memory_space<vmem>>, %arg2: memref<32x16xf32, #tpu.memory_space<vmem>>, %arg3: memref<32x1xf32, #tpu.memory_space<vmem>>, %arg4: memref<1x32x64xf32, #tpu.memory_space<vmem>>) attributes {dimension_semantics = [#tpu.dimension_semantics<parallel>], iteration_bounds = array<i64: 2>, scalar_prefetch = 0 : i64, scratch_operands = 0 : i64, tpu.core_type = #tpu.core_type<tc>, window_params = [{transform_indices = @transform_0, window_bounds = array<i64: 1, 16, 64>}, {pipeline_mode = #tpu.pipeline_mode<synchronous>, transform_indices = @transform_1, window_bounds = array<i64: 32, 16>}, {pipeline_mode = #tpu.pipeline_mode<synchronous>, transform_indices = @transform_2, window_bounds = array<i64: 32, 1>}, {transform_indices = @transform_3, window_bounds = array<i64: 1, 32, 64>}]} {
    %c0 = arith.constant 0 : index
    %c0_0 = arith.constant 0 : index
    %0 = vector.load %arg2[%c0, %c0_0] : memref<32x16xf32, #tpu.memory_space<vmem>>, vector<32x16xf32>
    %c0_1 = arith.constant 0 : index
    %c0_2 = arith.constant 0 : index
    %c0_3 = arith.constant 0 : index
    %1 = vector.load %arg1[%c0_1, %c0_2, %c0_3] : memref<1x16x64xf32, #tpu.memory_space<vmem>>, vector<1x16x64xf32>
    %2 = vector.shape_cast %1 : vector<1x16x64xf32> to vector<16x64xf32>
    %cst = arith.constant dense<0.000000e+00> : vector<32x64xf32>
    %3 = tpu.matmul %0, %2, %cst {dimension_numbers = #tpu.dot_dimension_numbers<[1], [0], [0], [1], [0, 0, 1, 1], [], []>} : vector<32x16xf32>, vector<16x64xf32>, vector<32x64xf32> -> vector<32x64xf32>
    %c0_4 = arith.constant 0 : index
    %c0_5 = arith.constant 0 : index
    %4 = vector.load %arg3[%c0_4, %c0_5] : memref<32x1xf32, #tpu.memory_space<vmem>>, vector<32x1xf32>
    %5 = vector.broadcast %4 : vector<32x1xf32> to vector<32x64xf32>
    %6 = arith.addf %3, %5 : vector<32x64xf32>
    %c0_6 = arith.constant 0 : index
    %c0_7 = arith.constant 0 : index
    %c0_8 = arith.constant 0 : index
    %7 = vector.load %arg4[%c0_6, %c0_7, %c0_8] : memref<1x32x64xf32, #tpu.memory_space<vmem>>, vector<1x32x64xf32>
    %8 = vector.shape_cast %7 : vector<1x32x64xf32> to vector<32x64xf32>
    %9 = vector.shape_cast %6 : vector<32x64xf32> to vector<1x32x64xf32>
    tpu.vector_store %arg4[%c0_6, %c0_7, %c0_8], %9 {strides = array<i32>} : memref<1x32x64xf32, #tpu.memory_space<vmem>>, vector<1x32x64xf32>,
    return
  }
  func.func @transform_0(%arg0: i32) -> (i32, i32, i32) {
    %c0_i32 = arith.constant 0 : i32
    %c0_i32_0 = arith.constant 0 : i32
    %c0_i32_1 = arith.constant 0 : i32
    return %arg0, %c0_i32, %c0_i32_0 : i32, i32, i32
  }
  func.func @transform_1(%arg0: i32) -> (i32, i32) {
    %c0_i32 = arith.constant 0 : i32
    %c0_i32_0 = arith.constant 0 : i32
    %c0_i32_1 = arith.constant 0 : i32
    return %c0_i32, %c0_i32_0 : i32, i32
  }
  func.func @transform_2(%arg0: i32) -> (i32, i32) {
    %c0_i32 = arith.constant 0 : i32
    %c0_i32_0 = arith.constant 0 : i32
    %c0_i32_1 = arith.constant 0 : i32
    return %c0_i32, %c0_i32_0 : i32, i32
  }
  func.func @transform_3(%arg0: i32) -> (i32, i32, i32) {
    %c0_i32 = arith.constant 0 : i32
    %c0_i32_0 = arith.constant 0 : i32
    %c0_i32_1 = arith.constant 0 : i32
    return %arg0, %c0_i32, %c0_i32_0 : i32, i32, i32
  }
}

module attributes {stable_mosaic.version = 11 : i64} {
  func.func @_conv3x3_cat_kernel(%arg0: i32, %arg1: memref<1x8x256xf32, #tpu.memory_space<vmem>>, %arg2: memref<1x8x256xf32, #tpu.memory_space<vmem>>, %arg3: memref<9x8x8xf32, #tpu.memory_space<vmem>>, %arg4: memref<9x8x8xf32, #tpu.memory_space<vmem>>, %arg5: memref<8x1xf32, #tpu.memory_space<vmem>>, %arg6: memref<1x8x256xf32, #tpu.memory_space<vmem>>, %arg7: memref<8x256xf32, #tpu.memory_space<vmem>>) attributes {dimension_semantics = [#tpu.dimension_semantics<parallel>], iteration_bounds = array<i64: 2>, scalar_prefetch = 0 : i64, scratch_operands = 1 : i64, tpu.core_type = #tpu.core_type<tc>, window_params = [{transform_indices = @transform_0, window_bounds = array<i64: 1, 8, 256>}, {transform_indices = @transform_1, window_bounds = array<i64: 1, 8, 256>}, {pipeline_mode = #tpu.pipeline_mode<synchronous>, transform_indices = @transform_2, window_bounds = array<i64: 9, 8, 8>}, {pipeline_mode = #tpu.pipeline_mode<synchronous>, transform_indices = @transform_3, window_bounds = array<i64: 9, 8, 8>}, {pipeline_mode = #tpu.pipeline_mode<synchronous>, transform_indices = @transform_4, window_bounds = array<i64: 8, 1>}, {transform_indices = @transform_5, window_bounds = array<i64: 1, 8, 256>}]} {
    %cst = arith.constant 0.000000e+00 : f32
    %0 = vector.broadcast %cst : f32 to vector<8x256xf32>
    %c0 = arith.constant 0 : index
    %c0_0 = arith.constant 0 : index
    %1 = vector.load %arg7[%c0, %c0_0] : memref<8x256xf32, #tpu.memory_space<vmem>>, vector<8x256xf32>
    tpu.vector_store %arg7[%c0, %c0_0], %0 {strides = array<i32>} : memref<8x256xf32, #tpu.memory_space<vmem>>, vector<8x256xf32>,
    %2 = tpu.iota {dimensions = array<i32: 1>} : vector<1x256xi32>
    %c16_i32 = arith.constant 16 : i32
    %c0_i32 = arith.constant 0 : i32
    %3 = arith.cmpi eq, %c16_i32, %c0_i32 : i32
    %c1_i32 = arith.constant 1 : i32
    %4 = arith.select %3, %c1_i32, %c16_i32 : i32
    %5 = vector.broadcast %4 : i32 to vector<1x256xi32>
    %6 = arith.remsi %2, %5 : vector<1x256xi32>
    %c0_i32_1 = arith.constant 0 : i32
    %7 = vector.broadcast %c0_i32_1 : i32 to vector<1x256xi32>
    %8 = arith.cmpi ne, %6, %7 : vector<1x256xi32>
    %c0_i32_2 = arith.constant 0 : i32
    %9 = vector.broadcast %c0_i32_2 : i32 to vector<1x256xi32>
    %10 = arith.cmpi slt, %6, %9 : vector<1x256xi32>
    %c0_i32_3 = arith.constant 0 : i32
    %11 = arith.cmpi slt, %4, %c0_i32_3 : i32
    %12 = vector.broadcast %11 : i1 to vector<1x256xi1>
    %13 = vector.broadcast %12 : vector<1x256xi1> to vector<1x256xi1>
    %14 = arith.xori %10, %13 : vector<1x256xi1>
    %15 = arith.andi %14, %8 : vector<1x256xi1>
    %16 = vector.broadcast %4 : i32 to vector<1x256xi32>
    %17 = arith.addi %6, %16 : vector<1x256xi32>
    %18 = arith.select %15, %17, %6 : vector<1x256xi1>, vector<1x256xi32>
    %c1_i32_4 = arith.constant 1 : i32
    %19 = vector.broadcast %c1_i32_4 : i32 to vector<1x256xi32>
    %20 = arith.cmpi sge, %18, %19 : vector<1x256xi32>
    %21 = arith.extui %20 : vector<1x256xi1> to vector<1x256xi32>
    %22 = arith.sitofp %21 : vector<1x256xi32> to vector<1x256xf32>
    %c14_i32 = arith.constant 14 : i32
    %23 = vector.broadcast %c14_i32 : i32 to vector<1x256xi32>
    %24 = arith.cmpi sle, %18, %23 : vector<1x256xi32>
    %25 = arith.extui %24 : vector<1x256xi1> to vector<1x256xi32>
    %26 = arith.sitofp %25 : vector<1x256xi32> to vector<1x256xf32>
    %c0_5 = arith.constant 0 : index
    %c0_6 = arith.constant 0 : index
    %c0_7 = arith.constant 0 : index
    %27 = vector.load %arg3[%c0_5, %c0_6, %c0_7] : memref<9x8x8xf32, #tpu.memory_space<vmem>>, vector<1x8x8xf32>
    %28 = vector.shape_cast %27 : vector<1x8x8xf32> to vector<8x8xf32>
    %c0_8 = arith.constant 0 : index
    %c0_9 = arith.constant 0 : index
    %c0_10 = arith.constant 0 : index
    %29 = vector.load %arg1[%c0_8, %c0_9, %c0_10] : memref<1x8x256xf32, #tpu.memory_space<vmem>>, vector<1x8x239xf32>
    %30 = vector.shape_cast %29 : vector<1x8x239xf32> to vector<8x239xf32>
    %cst_11 = arith.constant dense<0.000000e+00> : vector<8x239xf32>
    %31 = tpu.matmul %28, %30, %cst_11 {dimension_numbers = #tpu.dot_dimension_numbers<[1], [0], [0], [1], [0, 0, 1, 1], [], []>} : vector<8x8xf32>, vector<8x239xf32>, vector<8x239xf32> -> vector<8x239xf32>
    %32 = vector.extract_strided_slice %22 {offsets = [0, 17], sizes = [1, 239], strides = [1, 1]} : vector<1x256xf32> to vector<1x239xf32>
    %33 = vector.broadcast %32 : vector<1x239xf32> to vector<8x239xf32>
    %34 = arith.mulf %31, %33 : vector<8x239xf32>
    %c0_12 = arith.constant 0 : index
    %c17 = arith.constant 17 : index
    %35 = vector.load %arg7[%c0_12, %c17] : memref<8x256xf32, #tpu.memory_space<vmem>>, vector<8x239xf32>
    %36 = arith.addf %35, %34 : vector<8x239xf32>
    %c0_13 = arith.constant 0 : index
    %c17_14 = arith.constant 17 : index
    %37 = vector.load %arg7[%c0_13, %c17_14] : memref<8x256xf32, #tpu.memory_space<vmem>>, vector<8x239xf32>
    tpu.vector_store %arg7[%c0_13, %c17_14], %36 {strides = array<i32>} : memref<8x256xf32, #tpu.memory_space<vmem>>, vector<8x239xf32>,
    %c1 = arith.constant 1 : index
    %c0_15 = arith.constant 0 : index
    %c0_16 = arith.constant 0 : index
    %38 = vector.load %arg3[%c1, %c0_15, %c0_16] : memref<9x8x8xf32, #tpu.memory_space<vmem>>, vector<1x8x8xf32>
    %39 = vector.shape_cast %38 : vector<1x8x8xf32> to vector<8x8xf32>
    %c0_17 = arith.constant 0 : index
    %c0_18 = arith.constant 0 : index
    %c0_19 = arith.constant 0 : index
    %40 = vector.load %arg1[%c0_17, %c0_18, %c0_19] : memref<1x8x256xf32, #tpu.memory_space<vmem>>, vector<1x8x240xf32>
    %41 = vector.shape_cast %40 : vector<1x8x240xf32> to vector<8x240xf32>
    %cst_20 = arith.constant dense<0.000000e+00> : vector<8x240xf32>
    %42 = tpu.matmul %39, %41, %cst_20 {dimension_numbers = #tpu.dot_dimension_numbers<[1], [0], [0], [1], [0, 0, 1, 1], [], []>} : vector<8x8xf32>, vector<8x240xf32>, vector<8x240xf32> -> vector<8x240xf32>
    %c0_21 = arith.constant 0 : index
    %c16 = arith.constant 16 : index
    %43 = vector.load %arg7[%c0_21, %c16] : memref<8x256xf32, #tpu.memory_space<vmem>>, vector<8x240xf32>
    %44 = arith.addf %43, %42 : vector<8x240xf32>
    %c0_22 = arith.constant 0 : index
    %c16_23 = arith.constant 16 : index
    %45 = vector.load %arg7[%c0_22, %c16_23] : memref<8x256xf32, #tpu.memory_space<vmem>>, vector<8x240xf32>
    tpu.vector_store %arg7[%c0_22, %c16_23], %44 {strides = array<i32>} : memref<8x256xf32, #tpu.memory_space<vmem>>, vector<8x240xf32>,
    %c2 = arith.constant 2 : index
    %c0_24 = arith.constant 0 : index
    %c0_25 = arith.constant 0 : index
    %46 = vector.load %arg3[%c2, %c0_24, %c0_25] : memref<9x8x8xf32, #tpu.memory_space<vmem>>, vector<1x8x8xf32>
    %47 = vector.shape_cast %46 : vector<1x8x8xf32> to vector<8x8xf32>
    %c0_26 = arith.constant 0 : index
    %c0_27 = arith.constant 0 : index
    %c0_28 = arith.constant 0 : index
    %48 = vector.load %arg1[%c0_26, %c0_27, %c0_28] : memref<1x8x256xf32, #tpu.memory_space<vmem>>, vector<1x8x241xf32>
    %49 = vector.shape_cast %48 : vector<1x8x241xf32> to vector<8x241xf32>
    %cst_29 = arith.constant dense<0.000000e+00> : vector<8x241xf32>
    %50 = tpu.matmul %47, %49, %cst_29 {dimension_numbers = #tpu.dot_dimension_numbers<[1], [0], [0], [1], [0, 0, 1, 1], [], []>} : vector<8x8xf32>, vector<8x241xf32>, vector<8x241xf32> -> vector<8x241xf32>
    %51 = vector.extract_strided_slice %26 {offsets = [0, 15], sizes = [1, 241], strides = [1, 1]} : vector<1x256xf32> to vector<1x241xf32>
    %52 = vector.broadcast %51 : vector<1x241xf32> to vector<8x241xf32>
    %53 = arith.mulf %50, %52 : vector<8x241xf32>
    %c0_30 = arith.constant 0 : index
    %c15 = arith.constant 15 : index
    %54 = vector.load %arg7[%c0_30, %c15] : memref<8x256xf32, #tpu.memory_space<vmem>>, vector<8x241xf32>
    %55 = arith.addf %54, %53 : vector<8x241xf32>
    %c0_31 = arith.constant 0 : index
    %c15_32 = arith.constant 15 : index
    %56 = vector.load %arg7[%c0_31, %c15_32] : memref<8x256xf32, #tpu.memory_space<vmem>>, vector<8x241xf32>
    tpu.vector_store %arg7[%c0_31, %c15_32], %55 {strides = array<i32>} : memref<8x256xf32, #tpu.memory_space<vmem>>, vector<8x241xf32>,
    %c3 = arith.constant 3 : index
    %c0_33 = arith.constant 0 : index
    %c0_34 = arith.constant 0 : index
    %57 = vector.load %arg3[%c3, %c0_33, %c0_34] : memref<9x8x8xf32, #tpu.memory_space<vmem>>, vector<1x8x8xf32>
    %58 = vector.shape_cast %57 : vector<1x8x8xf32> to vector<8x8xf32>
    %c0_35 = arith.constant 0 : index
    %c0_36 = arith.constant 0 : index
    %c0_37 = arith.constant 0 : index
    %59 = vector.load %arg1[%c0_35, %c0_36, %c0_37] : memref<1x8x256xf32, #tpu.memory_space<vmem>>, vector<1x8x255xf32>
    %60 = vector.shape_cast %59 : vector<1x8x255xf32> to vector<8x255xf32>
    %cst_38 = arith.constant dense<0.000000e+00> : vector<8x255xf32>
    %61 = tpu.matmul %58, %60, %cst_38 {dimension_numbers = #tpu.dot_dimension_numbers<[1], [0], [0], [1], [0, 0, 1, 1], [], []>} : vector<8x8xf32>, vector<8x255xf32>, vector<8x255xf32> -> vector<8x255xf32>
    %62 = vector.extract_strided_slice %22 {offsets = [0, 1], sizes = [1, 255], strides = [1, 1]} : vector<1x256xf32> to vector<1x255xf32>
    %63 = vector.broadcast %62 : vector<1x255xf32> to vector<8x255xf32>
    %64 = arith.mulf %61, %63 : vector<8x255xf32>
    %c0_39 = arith.constant 0 : index
    %c1_40 = arith.constant 1 : index
    %65 = vector.load %arg7[%c0_39, %c1_40] : memref<8x256xf32, #tpu.memory_space<vmem>>, vector<8x255xf32>
    %66 = arith.addf %65, %64 : vector<8x255xf32>
    %c0_41 = arith.constant 0 : index
    %c1_42 = arith.constant 1 : index
    %67 = vector.load %arg7[%c0_41, %c1_42] : memref<8x256xf32, #tpu.memory_space<vmem>>, vector<8x255xf32>
    tpu.vector_store %arg7[%c0_41, %c1_42], %66 {strides = array<i32>} : memref<8x256xf32, #tpu.memory_space<vmem>>, vector<8x255xf32>,
    %c4 = arith.constant 4 : index
    %c0_43 = arith.constant 0 : index
    %c0_44 = arith.constant 0 : index
    %68 = vector.load %arg3[%c4, %c0_43, %c0_44] : memref<9x8x8xf32, #tpu.memory_space<vmem>>, vector<1x8x8xf32>
    %69 = vector.shape_cast %68 : vector<1x8x8xf32> to vector<8x8xf32>
    %c0_45 = arith.constant 0 : index
    %c0_46 = arith.constant 0 : index
    %c0_47 = arith.constant 0 : index
    %70 = vector.load %arg1[%c0_45, %c0_46, %c0_47] : memref<1x8x256xf32, #tpu.memory_space<vmem>>, vector<1x8x256xf32>
    %71 = vector.shape_cast %70 : vector<1x8x256xf32> to vector<8x256xf32>
    %cst_48 = arith.constant dense<0.000000e+00> : vector<8x256xf32>
    %72 = tpu.matmul %69, %71, %cst_48 {dimension_numbers = #tpu.dot_dimension_numbers<[1], [0], [0], [1], [0, 0, 1, 1], [], []>} : vector<8x8xf32>, vector<8x256xf32>, vector<8x256xf32> -> vector<8x256xf32>
    %c0_49 = arith.constant 0 : index
    %c0_50 = arith.constant 0 : index
    %73 = vector.load %arg7[%c0_49, %c0_50] : memref<8x256xf32, #tpu.memory_space<vmem>>, vector<8x256xf32>
    %74 = arith.addf %73, %72 : vector<8x256xf32>
    %c0_51 = arith.constant 0 : index
    %c0_52 = arith.constant 0 : index
    %75 = vector.load %arg7[%c0_51, %c0_52] : memref<8x256xf32, #tpu.memory_space<vmem>>, vector<8x256xf32>
    tpu.vector_store %arg7[%c0_51, %c0_52], %74 {strides = array<i32>} : memref<8x256xf32, #tpu.memory_space<vmem>>, vector<8x256xf32>,
    %c5 = arith.constant 5 : index
    %c0_53 = arith.constant 0 : index
    %c0_54 = arith.constant 0 : index
    %76 = vector.load %arg3[%c5, %c0_53, %c0_54] : memref<9x8x8xf32, #tpu.memory_space<vmem>>, vector<1x8x8xf32>
    %77 = vector.shape_cast %76 : vector<1x8x8xf32> to vector<8x8xf32>
    %c0_55 = arith.constant 0 : index
    %c0_56 = arith.constant 0 : index
    %c1_57 = arith.constant 1 : index
    %78 = vector.load %arg1[%c0_55, %c0_56, %c1_57] : memref<1x8x256xf32, #tpu.memory_space<vmem>>, vector<1x8x255xf32>
    %79 = vector.shape_cast %78 : vector<1x8x255xf32> to vector<8x255xf32>
    %cst_58 = arith.constant dense<0.000000e+00> : vector<8x255xf32>
    %80 = tpu.matmul %77, %79, %cst_58 {dimension_numbers = #tpu.dot_dimension_numbers<[1], [0], [0], [1], [0, 0, 1, 1], [], []>} : vector<8x8xf32>, vector<8x255xf32>, vector<8x255xf32> -> vector<8x255xf32>
    %81 = vector.extract_strided_slice %26 {offsets = [0, 0], sizes = [1, 255], strides = [1, 1]} : vector<1x256xf32> to vector<1x255xf32>
    %82 = vector.broadcast %81 : vector<1x255xf32> to vector<8x255xf32>
    %83 = arith.mulf %80, %82 : vector<8x255xf32>
    %c0_59 = arith.constant 0 : index
    %c0_60 = arith.constant 0 : index
    %84 = vector.load %arg7[%c0_59, %c0_60] : memref<8x256xf32, #tpu.memory_space<vmem>>, vector<8x255xf32>
    %85 = arith.addf %84, %83 : vector<8x255xf32>
    %c0_61 = arith.constant 0 : index
    %c0_62 = arith.constant 0 : index
    %86 = vector.load %arg7[%c0_61, %c0_62] : memref<8x256xf32, #tpu.memory_space<vmem>>, vector<8x255xf32>
    tpu.vector_store %arg7[%c0_61, %c0_62], %85 {strides = array<i32>} : memref<8x256xf32, #tpu.memory_space<vmem>>, vector<8x255xf32>,
    %c6 = arith.constant 6 : index
    %c0_63 = arith.constant 0 : index
    %c0_64 = arith.constant 0 : index
    %87 = vector.load %arg3[%c6, %c0_63, %c0_64] : memref<9x8x8xf32, #tpu.memory_space<vmem>>, vector<1x8x8xf32>
    %88 = vector.shape_cast %87 : vector<1x8x8xf32> to vector<8x8xf32>
    %c0_65 = arith.constant 0 : index
    %c0_66 = arith.constant 0 : index
    %c15_67 = arith.constant 15 : index
    %89 = vector.load %arg1[%c0_65, %c0_66, %c15_67] : memref<1x8x256xf32, #tpu.memory_space<vmem>>, vector<1x8x241xf32>
    %90 = vector.shape_cast %89 : vector<1x8x241xf32> to vector<8x241xf32>
    %cst_68 = arith.constant dense<0.000000e+00> : vector<8x241xf32>
    %91 = tpu.matmul %88, %90, %cst_68 {dimension_numbers = #tpu.dot_dimension_numbers<[1], [0], [0], [1], [0, 0, 1, 1], [], []>} : vector<8x8xf32>, vector<8x241xf32>, vector<8x241xf32> -> vector<8x241xf32>
    %92 = vector.extract_strided_slice %22 {offsets = [0, 0], sizes = [1, 241], strides = [1, 1]} : vector<1x256xf32> to vector<1x241xf32>
    %93 = vector.broadcast %92 : vector<1x241xf32> to vector<8x241xf32>
    %94 = arith.mulf %91, %93 : vector<8x241xf32>
    %c0_69 = arith.constant 0 : index
    %c0_70 = arith.constant 0 : index
    %95 = vector.load %arg7[%c0_69, %c0_70] : memref<8x256xf32, #tpu.memory_space<vmem>>, vector<8x241xf32>
    %96 = arith.addf %95, %94 : vector<8x241xf32>
    %c0_71 = arith.constant 0 : index
    %c0_72 = arith.constant 0 : index
    %97 = vector.load %arg7[%c0_71, %c0_72] : memref<8x256xf32, #tpu.memory_space<vmem>>, vector<8x241xf32>
    tpu.vector_store %arg7[%c0_71, %c0_72], %96 {strides = array<i32>} : memref<8x256xf32, #tpu.memory_space<vmem>>, vector<8x241xf32>,
    %c7 = arith.constant 7 : index
    %c0_73 = arith.constant 0 : index
    %c0_74 = arith.constant 0 : index
    %98 = vector.load %arg3[%c7, %c0_73, %c0_74] : memref<9x8x8xf32, #tpu.memory_space<vmem>>, vector<1x8x8xf32>
    %99 = vector.shape_cast %98 : vector<1x8x8xf32> to vector<8x8xf32>
    %c0_75 = arith.constant 0 : index
    %c0_76 = arith.constant 0 : index
    %c16_77 = arith.constant 16 : index
    %100 = vector.load %arg1[%c0_75, %c0_76, %c16_77] : memref<1x8x256xf32, #tpu.memory_space<vmem>>, vector<1x8x240xf32>
    %101 = vector.shape_cast %100 : vector<1x8x240xf32> to vector<8x240xf32>
    %cst_78 = arith.constant dense<0.000000e+00> : vector<8x240xf32>
    %102 = tpu.matmul %99, %101, %cst_78 {dimension_numbers = #tpu.dot_dimension_numbers<[1], [0], [0], [1], [0, 0, 1, 1], [], []>} : vector<8x8xf32>, vector<8x240xf32>, vector<8x240xf32> -> vector<8x240xf32>
    %c0_79 = arith.constant 0 : index
    %c0_80 = arith.constant 0 : index
    %103 = vector.load %arg7[%c0_79, %c0_80] : memref<8x256xf32, #tpu.memory_space<vmem>>, vector<8x240xf32>
    %104 = arith.addf %103, %102 : vector<8x240xf32>
    %c0_81 = arith.constant 0 : index
    %c0_82 = arith.constant 0 : index
    %105 = vector.load %arg7[%c0_81, %c0_82] : memref<8x256xf32, #tpu.memory_space<vmem>>, vector<8x240xf32>
    tpu.vector_store %arg7[%c0_81, %c0_82], %104 {strides = array<i32>} : memref<8x256xf32, #tpu.memory_space<vmem>>, vector<8x240xf32>,
    %c8 = arith.constant 8 : index
    %c0_83 = arith.constant 0 : index
    %c0_84 = arith.constant 0 : index
    %106 = vector.load %arg3[%c8, %c0_83, %c0_84] : memref<9x8x8xf32, #tpu.memory_space<vmem>>, vector<1x8x8xf32>
    %107 = vector.shape_cast %106 : vector<1x8x8xf32> to vector<8x8xf32>
    %c0_85 = arith.constant 0 : index
    %c0_86 = arith.constant 0 : index
    %c17_87 = arith.constant 17 : index
    %108 = vector.load %arg1[%c0_85, %c0_86, %c17_87] : memref<1x8x256xf32, #tpu.memory_space<vmem>>, vector<1x8x239xf32>
    %109 = vector.shape_cast %108 : vector<1x8x239xf32> to vector<8x239xf32>
    %cst_88 = arith.constant dense<0.000000e+00> : vector<8x239xf32>
    %110 = tpu.matmul %107, %109, %cst_88 {dimension_numbers = #tpu.dot_dimension_numbers<[1], [0], [0], [1], [0, 0, 1, 1], [], []>} : vector<8x8xf32>, vector<8x239xf32>, vector<8x239xf32> -> vector<8x239xf32>
    %111 = vector.extract_strided_slice %26 {offsets = [0, 0], sizes = [1, 239], strides = [1, 1]} : vector<1x256xf32> to vector<1x239xf32>
    %112 = vector.broadcast %111 : vector<1x239xf32> to vector<8x239xf32>
    %113 = arith.mulf %110, %112 : vector<8x239xf32>
    %c0_89 = arith.constant 0 : index
    %c0_90 = arith.constant 0 : index
    %114 = vector.load %arg7[%c0_89, %c0_90] : memref<8x256xf32, #tpu.memory_space<vmem>>, vector<8x239xf32>
    %115 = arith.addf %114, %113 : vector<8x239xf32>
    %c0_91 = arith.constant 0 : index
    %c0_92 = arith.constant 0 : index
    %116 = vector.load %arg7[%c0_91, %c0_92] : memref<8x256xf32, #tpu.memory_space<vmem>>, vector<8x239xf32>
    tpu.vector_store %arg7[%c0_91, %c0_92], %115 {strides = array<i32>} : memref<8x256xf32, #tpu.memory_space<vmem>>, vector<8x239xf32>,
    %117 = tpu.iota {dimensions = array<i32: 1>} : vector<1x256xi32>
    %c16_i32_93 = arith.constant 16 : i32
    %c0_i32_94 = arith.constant 0 : i32
    %118 = arith.cmpi eq, %c16_i32_93, %c0_i32_94 : i32
    %c1_i32_95 = arith.constant 1 : i32
    %119 = arith.select %118, %c1_i32_95, %c16_i32_93 : i32
    %120 = vector.broadcast %119 : i32 to vector<1x256xi32>
    %121 = arith.remsi %117, %120 : vector<1x256xi32>
    %c0_i32_96 = arith.constant 0 : i32
    %122 = vector.broadcast %c0_i32_96 : i32 to vector<1x256xi32>
    %123 = arith.cmpi ne, %121, %122 : vector<1x256xi32>
    %c0_i32_97 = arith.constant 0 : i32
    %124 = vector.broadcast %c0_i32_97 : i32 to vector<1x256xi32>
    %125 = arith.cmpi slt, %121, %124 : vector<1x256xi32>
    %c0_i32_98 = arith.constant 0 : i32
    %126 = arith.cmpi slt, %119, %c0_i32_98 : i32
    %127 = vector.broadcast %126 : i1 to vector<1x256xi1>
    %128 = vector.broadcast %127 : vector<1x256xi1> to vector<1x256xi1>
    %129 = arith.xori %125, %128 : vector<1x256xi1>
    %130 = arith.andi %129, %123 : vector<1x256xi1>
    %131 = vector.broadcast %119 : i32 to vector<1x256xi32>
    %132 = arith.addi %121, %131 : vector<1x256xi32>
    %133 = arith.select %130, %132, %121 : vector<1x256xi1>, vector<1x256xi32>
    %c1_i32_99 = arith.constant 1 : i32
    %134 = vector.broadcast %c1_i32_99 : i32 to vector<1x256xi32>
    %135 = arith.cmpi sge, %133, %134 : vector<1x256xi32>
    %136 = arith.extui %135 : vector<1x256xi1> to vector<1x256xi32>
    %137 = arith.sitofp %136 : vector<1x256xi32> to vector<1x256xf32>
    %c14_i32_100 = arith.constant 14 : i32
    %138 = vector.broadcast %c14_i32_100 : i32 to vector<1x256xi32>
    %139 = arith.cmpi sle, %133, %138 : vector<1x256xi32>
    %140 = arith.extui %139 : vector<1x256xi1> to vector<1x256xi32>
    %141 = arith.sitofp %140 : vector<1x256xi32> to vector<1x256xf32>
    %c0_101 = arith.constant 0 : index
    %c0_102 = arith.constant 0 : index
    %c0_103 = arith.constant 0 : index
    %142 = vector.load %arg4[%c0_101, %c0_102, %c0_103] : memref<9x8x8xf32, #tpu.memory_space<vmem>>, vector<1x8x8xf32>
    %143 = vector.shape_cast %142 : vector<1x8x8xf32> to vector<8x8xf32>
    %c0_104 = arith.constant 0 : index
    %c0_105 = arith.constant 0 : index
    %c0_106 = arith.constant 0 : index
    %144 = vector.load %arg2[%c0_104, %c0_105, %c0_106] : memref<1x8x256xf32, #tpu.memory_space<vmem>>, vector<1x8x239xf32>
    %145 = vector.shape_cast %144 : vector<1x8x239xf32> to vector<8x239xf32>
    %cst_107 = arith.constant dense<0.000000e+00> : vector<8x239xf32>
    %146 = tpu.matmul %143, %145, %cst_107 {dimension_numbers = #tpu.dot_dimension_numbers<[1], [0], [0], [1], [0, 0, 1, 1], [], []>} : vector<8x8xf32>, vector<8x239xf32>, vector<8x239xf32> -> vector<8x239xf32>
    %147 = vector.extract_strided_slice %137 {offsets = [0, 17], sizes = [1, 239], strides = [1, 1]} : vector<1x256xf32> to vector<1x239xf32>
    %148 = vector.broadcast %147 : vector<1x239xf32> to vector<8x239xf32>
    %149 = arith.mulf %146, %148 : vector<8x239xf32>
    %c0_108 = arith.constant 0 : index
    %c17_109 = arith.constant 17 : index
    %150 = vector.load %arg7[%c0_108, %c17_109] : memref<8x256xf32, #tpu.memory_space<vmem>>, vector<8x239xf32>
    %151 = arith.addf %150, %149 : vector<8x239xf32>
    %c0_110 = arith.constant 0 : index
    %c17_111 = arith.constant 17 : index
    %152 = vector.load %arg7[%c0_110, %c17_111] : memref<8x256xf32, #tpu.memory_space<vmem>>, vector<8x239xf32>
    tpu.vector_store %arg7[%c0_110, %c17_111], %151 {strides = array<i32>} : memref<8x256xf32, #tpu.memory_space<vmem>>, vector<8x239xf32>,
    %c1_112 = arith.constant 1 : index
    %c0_113 = arith.constant 0 : index
    %c0_114 = arith.constant 0 : index
    %153 = vector.load %arg4[%c1_112, %c0_113, %c0_114] : memref<9x8x8xf32, #tpu.memory_space<vmem>>, vector<1x8x8xf32>
    %154 = vector.shape_cast %153 : vector<1x8x8xf32> to vector<8x8xf32>
    %c0_115 = arith.constant 0 : index
    %c0_116 = arith.constant 0 : index
    %c0_117 = arith.constant 0 : index
    %155 = vector.load %arg2[%c0_115, %c0_116, %c0_117] : memref<1x8x256xf32, #tpu.memory_space<vmem>>, vector<1x8x240xf32>
    %156 = vector.shape_cast %155 : vector<1x8x240xf32> to vector<8x240xf32>
    %cst_118 = arith.constant dense<0.000000e+00> : vector<8x240xf32>
    %157 = tpu.matmul %154, %156, %cst_118 {dimension_numbers = #tpu.dot_dimension_numbers<[1], [0], [0], [1], [0, 0, 1, 1], [], []>} : vector<8x8xf32>, vector<8x240xf32>, vector<8x240xf32> -> vector<8x240xf32>
    %c0_119 = arith.constant 0 : index
    %c16_120 = arith.constant 16 : index
    %158 = vector.load %arg7[%c0_119, %c16_120] : memref<8x256xf32, #tpu.memory_space<vmem>>, vector<8x240xf32>
    %159 = arith.addf %158, %157 : vector<8x240xf32>
    %c0_121 = arith.constant 0 : index
    %c16_122 = arith.constant 16 : index
    %160 = vector.load %arg7[%c0_121, %c16_122] : memref<8x256xf32, #tpu.memory_space<vmem>>, vector<8x240xf32>
    tpu.vector_store %arg7[%c0_121, %c16_122], %159 {strides = array<i32>} : memref<8x256xf32, #tpu.memory_space<vmem>>, vector<8x240xf32>,
    %c2_123 = arith.constant 2 : index
    %c0_124 = arith.constant 0 : index
    %c0_125 = arith.constant 0 : index
    %161 = vector.load %arg4[%c2_123, %c0_124, %c0_125] : memref<9x8x8xf32, #tpu.memory_space<vmem>>, vector<1x8x8xf32>
    %162 = vector.shape_cast %161 : vector<1x8x8xf32> to vector<8x8xf32>
    %c0_126 = arith.constant 0 : index
    %c0_127 = arith.constant 0 : index
    %c0_128 = arith.constant 0 : index
    %163 = vector.load %arg2[%c0_126, %c0_127, %c0_128] : memref<1x8x256xf32, #tpu.memory_space<vmem>>, vector<1x8x241xf32>
    %164 = vector.shape_cast %163 : vector<1x8x241xf32> to vector<8x241xf32>
    %cst_129 = arith.constant dense<0.000000e+00> : vector<8x241xf32>
    %165 = tpu.matmul %162, %164, %cst_129 {dimension_numbers = #tpu.dot_dimension_numbers<[1], [0], [0], [1], [0, 0, 1, 1], [], []>} : vector<8x8xf32>, vector<8x241xf32>, vector<8x241xf32> -> vector<8x241xf32>
    %166 = vector.extract_strided_slice %141 {offsets = [0, 15], sizes = [1, 241], strides = [1, 1]} : vector<1x256xf32> to vector<1x241xf32>
    %167 = vector.broadcast %166 : vector<1x241xf32> to vector<8x241xf32>
    %168 = arith.mulf %165, %167 : vector<8x241xf32>
    %c0_130 = arith.constant 0 : index
    %c15_131 = arith.constant 15 : index
    %169 = vector.load %arg7[%c0_130, %c15_131] : memref<8x256xf32, #tpu.memory_space<vmem>>, vector<8x241xf32>
    %170 = arith.addf %169, %168 : vector<8x241xf32>
    %c0_132 = arith.constant 0 : index
    %c15_133 = arith.constant 15 : index
    %171 = vector.load %arg7[%c0_132, %c15_133] : memref<8x256xf32, #tpu.memory_space<vmem>>, vector<8x241xf32>
    tpu.vector_store %arg7[%c0_132, %c15_133], %170 {strides = array<i32>} : memref<8x256xf32, #tpu.memory_space<vmem>>, vector<8x241xf32>,
    %c3_134 = arith.constant 3 : index
    %c0_135 = arith.constant 0 : index
    %c0_136 = arith.constant 0 : index
    %172 = vector.load %arg4[%c3_134, %c0_135, %c0_136] : memref<9x8x8xf32, #tpu.memory_space<vmem>>, vector<1x8x8xf32>
    %173 = vector.shape_cast %172 : vector<1x8x8xf32> to vector<8x8xf32>
    %c0_137 = arith.constant 0 : index
    %c0_138 = arith.constant 0 : index
    %c0_139 = arith.constant 0 : index
    %174 = vector.load %arg2[%c0_137, %c0_138, %c0_139] : memref<1x8x256xf32, #tpu.memory_space<vmem>>, vector<1x8x255xf32>
    %175 = vector.shape_cast %174 : vector<1x8x255xf32> to vector<8x255xf32>
    %cst_140 = arith.constant dense<0.000000e+00> : vector<8x255xf32>
    %176 = tpu.matmul %173, %175, %cst_140 {dimension_numbers = #tpu.dot_dimension_numbers<[1], [0], [0], [1], [0, 0, 1, 1], [], []>} : vector<8x8xf32>, vector<8x255xf32>, vector<8x255xf32> -> vector<8x255xf32>
    %177 = vector.extract_strided_slice %137 {offsets = [0, 1], sizes = [1, 255], strides = [1, 1]} : vector<1x256xf32> to vector<1x255xf32>
    %178 = vector.broadcast %177 : vector<1x255xf32> to vector<8x255xf32>
    %179 = arith.mulf %176, %178 : vector<8x255xf32>
    %c0_141 = arith.constant 0 : index
    %c1_142 = arith.constant 1 : index
    %180 = vector.load %arg7[%c0_141, %c1_142] : memref<8x256xf32, #tpu.memory_space<vmem>>, vector<8x255xf32>
    %181 = arith.addf %180, %179 : vector<8x255xf32>
    %c0_143 = arith.constant 0 : index
    %c1_144 = arith.constant 1 : index
    %182 = vector.load %arg7[%c0_143, %c1_144] : memref<8x256xf32, #tpu.memory_space<vmem>>, vector<8x255xf32>
    tpu.vector_store %arg7[%c0_143, %c1_144], %181 {strides = array<i32>} : memref<8x256xf32, #tpu.memory_space<vmem>>, vector<8x255xf32>,
    %c4_145 = arith.constant 4 : index
    %c0_146 = arith.constant 0 : index
    %c0_147 = arith.constant 0 : index
    %183 = vector.load %arg4[%c4_145, %c0_146, %c0_147] : memref<9x8x8xf32, #tpu.memory_space<vmem>>, vector<1x8x8xf32>
    %184 = vector.shape_cast %183 : vector<1x8x8xf32> to vector<8x8xf32>
    %c0_148 = arith.constant 0 : index
    %c0_149 = arith.constant 0 : index
    %c0_150 = arith.constant 0 : index
    %185 = vector.load %arg2[%c0_148, %c0_149, %c0_150] : memref<1x8x256xf32, #tpu.memory_space<vmem>>, vector<1x8x256xf32>
    %186 = vector.shape_cast %185 : vector<1x8x256xf32> to vector<8x256xf32>
    %cst_151 = arith.constant dense<0.000000e+00> : vector<8x256xf32>
    %187 = tpu.matmul %184, %186, %cst_151 {dimension_numbers = #tpu.dot_dimension_numbers<[1], [0], [0], [1], [0, 0, 1, 1], [], []>} : vector<8x8xf32>, vector<8x256xf32>, vector<8x256xf32> -> vector<8x256xf32>
    %c0_152 = arith.constant 0 : index
    %c0_153 = arith.constant 0 : index
    %188 = vector.load %arg7[%c0_152, %c0_153] : memref<8x256xf32, #tpu.memory_space<vmem>>, vector<8x256xf32>
    %189 = arith.addf %188, %187 : vector<8x256xf32>
    %c0_154 = arith.constant 0 : index
    %c0_155 = arith.constant 0 : index
    %190 = vector.load %arg7[%c0_154, %c0_155] : memref<8x256xf32, #tpu.memory_space<vmem>>, vector<8x256xf32>
    tpu.vector_store %arg7[%c0_154, %c0_155], %189 {strides = array<i32>} : memref<8x256xf32, #tpu.memory_space<vmem>>, vector<8x256xf32>,
    %c5_156 = arith.constant 5 : index
    %c0_157 = arith.constant 0 : index
    %c0_158 = arith.constant 0 : index
    %191 = vector.load %arg4[%c5_156, %c0_157, %c0_158] : memref<9x8x8xf32, #tpu.memory_space<vmem>>, vector<1x8x8xf32>
    %192 = vector.shape_cast %191 : vector<1x8x8xf32> to vector<8x8xf32>
    %c0_159 = arith.constant 0 : index
    %c0_160 = arith.constant 0 : index
    %c1_161 = arith.constant 1 : index
    %193 = vector.load %arg2[%c0_159, %c0_160, %c1_161] : memref<1x8x256xf32, #tpu.memory_space<vmem>>, vector<1x8x255xf32>
    %194 = vector.shape_cast %193 : vector<1x8x255xf32> to vector<8x255xf32>
    %cst_162 = arith.constant dense<0.000000e+00> : vector<8x255xf32>
    %195 = tpu.matmul %192, %194, %cst_162 {dimension_numbers = #tpu.dot_dimension_numbers<[1], [0], [0], [1], [0, 0, 1, 1], [], []>} : vector<8x8xf32>, vector<8x255xf32>, vector<8x255xf32> -> vector<8x255xf32>
    %196 = vector.extract_strided_slice %141 {offsets = [0, 0], sizes = [1, 255], strides = [1, 1]} : vector<1x256xf32> to vector<1x255xf32>
    %197 = vector.broadcast %196 : vector<1x255xf32> to vector<8x255xf32>
    %198 = arith.mulf %195, %197 : vector<8x255xf32>
    %c0_163 = arith.constant 0 : index
    %c0_164 = arith.constant 0 : index
    %199 = vector.load %arg7[%c0_163, %c0_164] : memref<8x256xf32, #tpu.memory_space<vmem>>, vector<8x255xf32>
    %200 = arith.addf %199, %198 : vector<8x255xf32>
    %c0_165 = arith.constant 0 : index
    %c0_166 = arith.constant 0 : index
    %201 = vector.load %arg7[%c0_165, %c0_166] : memref<8x256xf32, #tpu.memory_space<vmem>>, vector<8x255xf32>
    tpu.vector_store %arg7[%c0_165, %c0_166], %200 {strides = array<i32>} : memref<8x256xf32, #tpu.memory_space<vmem>>, vector<8x255xf32>,
    %c6_167 = arith.constant 6 : index
    %c0_168 = arith.constant 0 : index
    %c0_169 = arith.constant 0 : index
    %202 = vector.load %arg4[%c6_167, %c0_168, %c0_169] : memref<9x8x8xf32, #tpu.memory_space<vmem>>, vector<1x8x8xf32>
    %203 = vector.shape_cast %202 : vector<1x8x8xf32> to vector<8x8xf32>
    %c0_170 = arith.constant 0 : index
    %c0_171 = arith.constant 0 : index
    %c15_172 = arith.constant 15 : index
    %204 = vector.load %arg2[%c0_170, %c0_171, %c15_172] : memref<1x8x256xf32, #tpu.memory_space<vmem>>, vector<1x8x241xf32>
    %205 = vector.shape_cast %204 : vector<1x8x241xf32> to vector<8x241xf32>
    %cst_173 = arith.constant dense<0.000000e+00> : vector<8x241xf32>
    %206 = tpu.matmul %203, %205, %cst_173 {dimension_numbers = #tpu.dot_dimension_numbers<[1], [0], [0], [1], [0, 0, 1, 1], [], []>} : vector<8x8xf32>, vector<8x241xf32>, vector<8x241xf32> -> vector<8x241xf32>
    %207 = vector.extract_strided_slice %137 {offsets = [0, 0], sizes = [1, 241], strides = [1, 1]} : vector<1x256xf32> to vector<1x241xf32>
    %208 = vector.broadcast %207 : vector<1x241xf32> to vector<8x241xf32>
    %209 = arith.mulf %206, %208 : vector<8x241xf32>
    %c0_174 = arith.constant 0 : index
    %c0_175 = arith.constant 0 : index
    %210 = vector.load %arg7[%c0_174, %c0_175] : memref<8x256xf32, #tpu.memory_space<vmem>>, vector<8x241xf32>
    %211 = arith.addf %210, %209 : vector<8x241xf32>
    %c0_176 = arith.constant 0 : index
    %c0_177 = arith.constant 0 : index
    %212 = vector.load %arg7[%c0_176, %c0_177] : memref<8x256xf32, #tpu.memory_space<vmem>>, vector<8x241xf32>
    tpu.vector_store %arg7[%c0_176, %c0_177], %211 {strides = array<i32>} : memref<8x256xf32, #tpu.memory_space<vmem>>, vector<8x241xf32>,
    %c7_178 = arith.constant 7 : index
    %c0_179 = arith.constant 0 : index
    %c0_180 = arith.constant 0 : index
    %213 = vector.load %arg4[%c7_178, %c0_179, %c0_180] : memref<9x8x8xf32, #tpu.memory_space<vmem>>, vector<1x8x8xf32>
    %214 = vector.shape_cast %213 : vector<1x8x8xf32> to vector<8x8xf32>
    %c0_181 = arith.constant 0 : index
    %c0_182 = arith.constant 0 : index
    %c16_183 = arith.constant 16 : index
    %215 = vector.load %arg2[%c0_181, %c0_182, %c16_183] : memref<1x8x256xf32, #tpu.memory_space<vmem>>, vector<1x8x240xf32>
    %216 = vector.shape_cast %215 : vector<1x8x240xf32> to vector<8x240xf32>
    %cst_184 = arith.constant dense<0.000000e+00> : vector<8x240xf32>
    %217 = tpu.matmul %214, %216, %cst_184 {dimension_numbers = #tpu.dot_dimension_numbers<[1], [0], [0], [1], [0, 0, 1, 1], [], []>} : vector<8x8xf32>, vector<8x240xf32>, vector<8x240xf32> -> vector<8x240xf32>
    %c0_185 = arith.constant 0 : index
    %c0_186 = arith.constant 0 : index
    %218 = vector.load %arg7[%c0_185, %c0_186] : memref<8x256xf32, #tpu.memory_space<vmem>>, vector<8x240xf32>
    %219 = arith.addf %218, %217 : vector<8x240xf32>
    %c0_187 = arith.constant 0 : index
    %c0_188 = arith.constant 0 : index
    %220 = vector.load %arg7[%c0_187, %c0_188] : memref<8x256xf32, #tpu.memory_space<vmem>>, vector<8x240xf32>
    tpu.vector_store %arg7[%c0_187, %c0_188], %219 {strides = array<i32>} : memref<8x256xf32, #tpu.memory_space<vmem>>, vector<8x240xf32>,
    %c8_189 = arith.constant 8 : index
    %c0_190 = arith.constant 0 : index
    %c0_191 = arith.constant 0 : index
    %221 = vector.load %arg4[%c8_189, %c0_190, %c0_191] : memref<9x8x8xf32, #tpu.memory_space<vmem>>, vector<1x8x8xf32>
    %222 = vector.shape_cast %221 : vector<1x8x8xf32> to vector<8x8xf32>
    %c0_192 = arith.constant 0 : index
    %c0_193 = arith.constant 0 : index
    %c17_194 = arith.constant 17 : index
    %223 = vector.load %arg2[%c0_192, %c0_193, %c17_194] : memref<1x8x256xf32, #tpu.memory_space<vmem>>, vector<1x8x239xf32>
    %224 = vector.shape_cast %223 : vector<1x8x239xf32> to vector<8x239xf32>
    %cst_195 = arith.constant dense<0.000000e+00> : vector<8x239xf32>
    %225 = tpu.matmul %222, %224, %cst_195 {dimension_numbers = #tpu.dot_dimension_numbers<[1], [0], [0], [1], [0, 0, 1, 1], [], []>} : vector<8x8xf32>, vector<8x239xf32>, vector<8x239xf32> -> vector<8x239xf32>
    %226 = vector.extract_strided_slice %141 {offsets = [0, 0], sizes = [1, 239], strides = [1, 1]} : vector<1x256xf32> to vector<1x239xf32>
    %227 = vector.broadcast %226 : vector<1x239xf32> to vector<8x239xf32>
    %228 = arith.mulf %225, %227 : vector<8x239xf32>
    %c0_196 = arith.constant 0 : index
    %c0_197 = arith.constant 0 : index
    %229 = vector.load %arg7[%c0_196, %c0_197] : memref<8x256xf32, #tpu.memory_space<vmem>>, vector<8x239xf32>
    %230 = arith.addf %229, %228 : vector<8x239xf32>
    %c0_198 = arith.constant 0 : index
    %c0_199 = arith.constant 0 : index
    %231 = vector.load %arg7[%c0_198, %c0_199] : memref<8x256xf32, #tpu.memory_space<vmem>>, vector<8x239xf32>
    tpu.vector_store %arg7[%c0_198, %c0_199], %230 {strides = array<i32>} : memref<8x256xf32, #tpu.memory_space<vmem>>, vector<8x239xf32>,
    %c0_200 = arith.constant 0 : index
    %c0_201 = arith.constant 0 : index
    %232 = vector.load %arg7[%c0_200, %c0_201] : memref<8x256xf32, #tpu.memory_space<vmem>>, vector<8x256xf32>
    %c0_202 = arith.constant 0 : index
    %c0_203 = arith.constant 0 : index
    %233 = vector.load %arg5[%c0_202, %c0_203] : memref<8x1xf32, #tpu.memory_space<vmem>>, vector<8x1xf32>
    %234 = vector.broadcast %233 : vector<8x1xf32> to vector<8x256xf32>
    %235 = arith.addf %232, %234 : vector<8x256xf32>
    %cst_204 = arith.constant 5.000000e-01 : f32
    %236 = vector.broadcast %cst_204 : f32 to vector<8x256xf32>
    %237 = arith.mulf %236, %235 : vector<8x256xf32>
    %cst_205 = arith.constant 0.707106769 : f32
    %238 = vector.broadcast %cst_205 : f32 to vector<8x256xf32>
    %239 = arith.mulf %235, %238 : vector<8x256xf32>
    %240 = math.erf %239 : vector<8x256xf32>
    %cst_206 = arith.constant 1.000000e+00 : f32
    %241 = vector.broadcast %cst_206 : f32 to vector<8x256xf32>
    %242 = arith.addf %241, %240 : vector<8x256xf32>
    %243 = arith.mulf %237, %242 : vector<8x256xf32>
    %c0_207 = arith.constant 0 : index
    %c0_208 = arith.constant 0 : index
    %c0_209 = arith.constant 0 : index
    %244 = vector.load %arg6[%c0_207, %c0_208, %c0_209] : memref<1x8x256xf32, #tpu.memory_space<vmem>>, vector<1x8x256xf32>
    %245 = vector.shape_cast %244 : vector<1x8x256xf32> to vector<8x256xf32>
    %246 = vector.shape_cast %243 : vector<8x256xf32> to vector<1x8x256xf32>
    tpu.vector_store %arg6[%c0_207, %c0_208, %c0_209], %246 {strides = array<i32>} : memref<1x8x256xf32, #tpu.memory_space<vmem>>, vector<1x8x256xf32>,
    return
  }
  func.func @transform_0(%arg0: i32) -> (i32, i32, i32) {
    %c0_i32 = arith.constant 0 : i32
    %c0_i32_0 = arith.constant 0 : i32
    %c0_i32_1 = arith.constant 0 : i32
    return %arg0, %c0_i32, %c0_i32_0 : i32, i32, i32
  }
  func.func @transform_1(%arg0: i32) -> (i32, i32, i32) {
    %c0_i32 = arith.constant 0 : i32
    %c0_i32_0 = arith.constant 0 : i32
    %c0_i32_1 = arith.constant 0 : i32
    return %arg0, %c0_i32, %c0_i32_0 : i32, i32, i32
  }
  func.func @transform_2(%arg0: i32) -> (i32, i32, i32) {
    %c0_i32 = arith.constant 0 : i32
    %c0_i32_0 = arith.constant 0 : i32
    %c0_i32_1 = arith.constant 0 : i32
    %c0_i32_2 = arith.constant 0 : i32
    return %c0_i32, %c0_i32_0, %c0_i32_1 : i32, i32, i32
  }
  func.func @transform_3(%arg0: i32) -> (i32, i32, i32) {
    %c0_i32 = arith.constant 0 : i32
    %c0_i32_0 = arith.constant 0 : i32
    %c0_i32_1 = arith.constant 0 : i32
    %c0_i32_2 = arith.constant 0 : i32
    return %c0_i32, %c0_i32_0, %c0_i32_1 : i32, i32, i32
  }
  func.func @transform_4(%arg0: i32) -> (i32, i32) {
    %c0_i32 = arith.constant 0 : i32
    %c0_i32_0 = arith.constant 0 : i32
    %c0_i32_1 = arith.constant 0 : i32
    return %c0_i32, %c0_i32_0 : i32, i32
  }
  func.func @transform_5(%arg0: i32) -> (i32, i32, i32) {
    %c0_i32 = arith.constant 0 : i32
    %c0_i32_0 = arith.constant 0 : i32
    %c0_i32_1 = arith.constant 0 : i32
    return %arg0, %c0_i32, %c0_i32_0 : i32, i32, i32
  }
}

module attributes {stable_mosaic.version = 11 : i64} {
  func.func @_pointwise_kernel(%arg0: i32, %arg1: memref<1x8x256xf32, #tpu.memory_space<vmem>>, %arg2: memref<4x8xf32, #tpu.memory_space<vmem>>, %arg3: memref<4x1xf32, #tpu.memory_space<vmem>>, %arg4: memref<1x4x256xf32, #tpu.memory_space<vmem>>) attributes {dimension_semantics = [#tpu.dimension_semantics<parallel>], iteration_bounds = array<i64: 2>, scalar_prefetch = 0 : i64, scratch_operands = 0 : i64, tpu.core_type = #tpu.core_type<tc>, window_params = [{transform_indices = @transform_0, window_bounds = array<i64: 1, 8, 256>}, {pipeline_mode = #tpu.pipeline_mode<synchronous>, transform_indices = @transform_1, window_bounds = array<i64: 4, 8>}, {pipeline_mode = #tpu.pipeline_mode<synchronous>, transform_indices = @transform_2, window_bounds = array<i64: 4, 1>}, {transform_indices = @transform_3, window_bounds = array<i64: 1, 4, 256>}]} {
    %c0 = arith.constant 0 : index
    %c0_0 = arith.constant 0 : index
    %0 = vector.load %arg2[%c0, %c0_0] : memref<4x8xf32, #tpu.memory_space<vmem>>, vector<4x8xf32>
    %c0_1 = arith.constant 0 : index
    %c0_2 = arith.constant 0 : index
    %c0_3 = arith.constant 0 : index
    %1 = vector.load %arg1[%c0_1, %c0_2, %c0_3] : memref<1x8x256xf32, #tpu.memory_space<vmem>>, vector<1x8x256xf32>
    %2 = vector.shape_cast %1 : vector<1x8x256xf32> to vector<8x256xf32>
    %cst = arith.constant dense<0.000000e+00> : vector<4x256xf32>
    %3 = tpu.matmul %0, %2, %cst {dimension_numbers = #tpu.dot_dimension_numbers<[1], [0], [0], [1], [0, 0, 1, 1], [], []>} : vector<4x8xf32>, vector<8x256xf32>, vector<4x256xf32> -> vector<4x256xf32>
    %c0_4 = arith.constant 0 : index
    %c0_5 = arith.constant 0 : index
    %4 = vector.load %arg3[%c0_4, %c0_5] : memref<4x1xf32, #tpu.memory_space<vmem>>, vector<4x1xf32>
    %5 = vector.broadcast %4 : vector<4x1xf32> to vector<4x256xf32>
    %6 = arith.addf %3, %5 : vector<4x256xf32>
    %c0_6 = arith.constant 0 : index
    %c0_7 = arith.constant 0 : index
    %c0_8 = arith.constant 0 : index
    %7 = vector.load %arg4[%c0_6, %c0_7, %c0_8] : memref<1x4x256xf32, #tpu.memory_space<vmem>>, vector<1x4x256xf32>
    %8 = vector.shape_cast %7 : vector<1x4x256xf32> to vector<4x256xf32>
    %9 = vector.shape_cast %6 : vector<4x256xf32> to vector<1x4x256xf32>
    tpu.vector_store %arg4[%c0_6, %c0_7, %c0_8], %9 {strides = array<i32>} : memref<1x4x256xf32, #tpu.memory_space<vmem>>, vector<1x4x256xf32>,
    return
  }
  func.func @transform_0(%arg0: i32) -> (i32, i32, i32) {
    %c0_i32 = arith.constant 0 : i32
    %c0_i32_0 = arith.constant 0 : i32
    %c0_i32_1 = arith.constant 0 : i32
    return %arg0, %c0_i32, %c0_i32_0 : i32, i32, i32
  }
  func.func @transform_1(%arg0: i32) -> (i32, i32) {
    %c0_i32 = arith.constant 0 : i32
    %c0_i32_0 = arith.constant 0 : i32
    %c0_i32_1 = arith.constant 0 : i32
    return %c0_i32, %c0_i32_0 : i32, i32
  }
  func.func @transform_2(%arg0: i32) -> (i32, i32) {
    %c0_i32 = arith.constant 0 : i32
    %c0_i32_0 = arith.constant 0 : i32
    %c0_i32_1 = arith.constant 0 : i32
    return %c0_i32, %c0_i32_0 : i32, i32
  }
  func.func @transform_3(%arg0: i32) -> (i32, i32, i32) {
    %c0_i32 = arith.constant 0 : i32
    %c0_i32_0 = arith.constant 0 : i32
    %c0_i32_1 = arith.constant 0 : i32
    return %arg0, %c0_i32, %c0_i32_0 : i32, i32, i32
  }
}

module attributes {stable_mosaic.version = 11 : i64} {
  func.func @_conv3x3_kernel(%arg0: i32, %arg1: memref<1x8x256xf32, #tpu.memory_space<vmem>>, %arg2: memref<9x8x8xf32, #tpu.memory_space<vmem>>, %arg3: memref<8x1xf32, #tpu.memory_space<vmem>>, %arg4: memref<1x8x256xf32, #tpu.memory_space<vmem>>, %arg5: memref<8x256xf32, #tpu.memory_space<vmem>>) attributes {dimension_semantics = [#tpu.dimension_semantics<parallel>], iteration_bounds = array<i64: 2>, scalar_prefetch = 0 : i64, scratch_operands = 1 : i64, tpu.core_type = #tpu.core_type<tc>, window_params = [{transform_indices = @transform_0, window_bounds = array<i64: 1, 8, 256>}, {pipeline_mode = #tpu.pipeline_mode<synchronous>, transform_indices = @transform_1, window_bounds = array<i64: 9, 8, 8>}, {pipeline_mode = #tpu.pipeline_mode<synchronous>, transform_indices = @transform_2, window_bounds = array<i64: 8, 1>}, {transform_indices = @transform_3, window_bounds = array<i64: 1, 8, 256>}]} {
    %cst = arith.constant 0.000000e+00 : f32
    %0 = vector.broadcast %cst : f32 to vector<8x256xf32>
    %c0 = arith.constant 0 : index
    %c0_0 = arith.constant 0 : index
    %1 = vector.load %arg5[%c0, %c0_0] : memref<8x256xf32, #tpu.memory_space<vmem>>, vector<8x256xf32>
    tpu.vector_store %arg5[%c0, %c0_0], %0 {strides = array<i32>} : memref<8x256xf32, #tpu.memory_space<vmem>>, vector<8x256xf32>,
    %2 = tpu.iota {dimensions = array<i32: 1>} : vector<1x256xi32>
    %c16_i32 = arith.constant 16 : i32
    %c0_i32 = arith.constant 0 : i32
    %3 = arith.cmpi eq, %c16_i32, %c0_i32 : i32
    %c1_i32 = arith.constant 1 : i32
    %4 = arith.select %3, %c1_i32, %c16_i32 : i32
    %5 = vector.broadcast %4 : i32 to vector<1x256xi32>
    %6 = arith.remsi %2, %5 : vector<1x256xi32>
    %c0_i32_1 = arith.constant 0 : i32
    %7 = vector.broadcast %c0_i32_1 : i32 to vector<1x256xi32>
    %8 = arith.cmpi ne, %6, %7 : vector<1x256xi32>
    %c0_i32_2 = arith.constant 0 : i32
    %9 = vector.broadcast %c0_i32_2 : i32 to vector<1x256xi32>
    %10 = arith.cmpi slt, %6, %9 : vector<1x256xi32>
    %c0_i32_3 = arith.constant 0 : i32
    %11 = arith.cmpi slt, %4, %c0_i32_3 : i32
    %12 = vector.broadcast %11 : i1 to vector<1x256xi1>
    %13 = vector.broadcast %12 : vector<1x256xi1> to vector<1x256xi1>
    %14 = arith.xori %10, %13 : vector<1x256xi1>
    %15 = arith.andi %14, %8 : vector<1x256xi1>
    %16 = vector.broadcast %4 : i32 to vector<1x256xi32>
    %17 = arith.addi %6, %16 : vector<1x256xi32>
    %18 = arith.select %15, %17, %6 : vector<1x256xi1>, vector<1x256xi32>
    %c1_i32_4 = arith.constant 1 : i32
    %19 = vector.broadcast %c1_i32_4 : i32 to vector<1x256xi32>
    %20 = arith.cmpi sge, %18, %19 : vector<1x256xi32>
    %21 = arith.extui %20 : vector<1x256xi1> to vector<1x256xi32>
    %22 = arith.sitofp %21 : vector<1x256xi32> to vector<1x256xf32>
    %c14_i32 = arith.constant 14 : i32
    %23 = vector.broadcast %c14_i32 : i32 to vector<1x256xi32>
    %24 = arith.cmpi sle, %18, %23 : vector<1x256xi32>
    %25 = arith.extui %24 : vector<1x256xi1> to vector<1x256xi32>
    %26 = arith.sitofp %25 : vector<1x256xi32> to vector<1x256xf32>
    %c0_5 = arith.constant 0 : index
    %c0_6 = arith.constant 0 : index
    %c0_7 = arith.constant 0 : index
    %27 = vector.load %arg2[%c0_5, %c0_6, %c0_7] : memref<9x8x8xf32, #tpu.memory_space<vmem>>, vector<1x8x8xf32>
    %28 = vector.shape_cast %27 : vector<1x8x8xf32> to vector<8x8xf32>
    %c0_8 = arith.constant 0 : index
    %c0_9 = arith.constant 0 : index
    %c0_10 = arith.constant 0 : index
    %29 = vector.load %arg1[%c0_8, %c0_9, %c0_10] : memref<1x8x256xf32, #tpu.memory_space<vmem>>, vector<1x8x239xf32>
    %30 = vector.shape_cast %29 : vector<1x8x239xf32> to vector<8x239xf32>
    %cst_11 = arith.constant dense<0.000000e+00> : vector<8x239xf32>
    %31 = tpu.matmul %28, %30, %cst_11 {dimension_numbers = #tpu.dot_dimension_numbers<[1], [0], [0], [1], [0, 0, 1, 1], [], []>} : vector<8x8xf32>, vector<8x239xf32>, vector<8x239xf32> -> vector<8x239xf32>
    %32 = vector.extract_strided_slice %22 {offsets = [0, 17], sizes = [1, 239], strides = [1, 1]} : vector<1x256xf32> to vector<1x239xf32>
    %33 = vector.broadcast %32 : vector<1x239xf32> to vector<8x239xf32>
    %34 = arith.mulf %31, %33 : vector<8x239xf32>
    %c0_12 = arith.constant 0 : index
    %c17 = arith.constant 17 : index
    %35 = vector.load %arg5[%c0_12, %c17] : memref<8x256xf32, #tpu.memory_space<vmem>>, vector<8x239xf32>
    %36 = arith.addf %35, %34 : vector<8x239xf32>
    %c0_13 = arith.constant 0 : index
    %c17_14 = arith.constant 17 : index
    %37 = vector.load %arg5[%c0_13, %c17_14] : memref<8x256xf32, #tpu.memory_space<vmem>>, vector<8x239xf32>
    tpu.vector_store %arg5[%c0_13, %c17_14], %36 {strides = array<i32>} : memref<8x256xf32, #tpu.memory_space<vmem>>, vector<8x239xf32>,
    %c1 = arith.constant 1 : index
    %c0_15 = arith.constant 0 : index
    %c0_16 = arith.constant 0 : index
    %38 = vector.load %arg2[%c1, %c0_15, %c0_16] : memref<9x8x8xf32, #tpu.memory_space<vmem>>, vector<1x8x8xf32>
    %39 = vector.shape_cast %38 : vector<1x8x8xf32> to vector<8x8xf32>
    %c0_17 = arith.constant 0 : index
    %c0_18 = arith.constant 0 : index
    %c0_19 = arith.constant 0 : index
    %40 = vector.load %arg1[%c0_17, %c0_18, %c0_19] : memref<1x8x256xf32, #tpu.memory_space<vmem>>, vector<1x8x240xf32>
    %41 = vector.shape_cast %40 : vector<1x8x240xf32> to vector<8x240xf32>
    %cst_20 = arith.constant dense<0.000000e+00> : vector<8x240xf32>
    %42 = tpu.matmul %39, %41, %cst_20 {dimension_numbers = #tpu.dot_dimension_numbers<[1], [0], [0], [1], [0, 0, 1, 1], [], []>} : vector<8x8xf32>, vector<8x240xf32>, vector<8x240xf32> -> vector<8x240xf32>
    %c0_21 = arith.constant 0 : index
    %c16 = arith.constant 16 : index
    %43 = vector.load %arg5[%c0_21, %c16] : memref<8x256xf32, #tpu.memory_space<vmem>>, vector<8x240xf32>
    %44 = arith.addf %43, %42 : vector<8x240xf32>
    %c0_22 = arith.constant 0 : index
    %c16_23 = arith.constant 16 : index
    %45 = vector.load %arg5[%c0_22, %c16_23] : memref<8x256xf32, #tpu.memory_space<vmem>>, vector<8x240xf32>
    tpu.vector_store %arg5[%c0_22, %c16_23], %44 {strides = array<i32>} : memref<8x256xf32, #tpu.memory_space<vmem>>, vector<8x240xf32>,
    %c2 = arith.constant 2 : index
    %c0_24 = arith.constant 0 : index
    %c0_25 = arith.constant 0 : index
    %46 = vector.load %arg2[%c2, %c0_24, %c0_25] : memref<9x8x8xf32, #tpu.memory_space<vmem>>, vector<1x8x8xf32>
    %47 = vector.shape_cast %46 : vector<1x8x8xf32> to vector<8x8xf32>
    %c0_26 = arith.constant 0 : index
    %c0_27 = arith.constant 0 : index
    %c0_28 = arith.constant 0 : index
    %48 = vector.load %arg1[%c0_26, %c0_27, %c0_28] : memref<1x8x256xf32, #tpu.memory_space<vmem>>, vector<1x8x241xf32>
    %49 = vector.shape_cast %48 : vector<1x8x241xf32> to vector<8x241xf32>
    %cst_29 = arith.constant dense<0.000000e+00> : vector<8x241xf32>
    %50 = tpu.matmul %47, %49, %cst_29 {dimension_numbers = #tpu.dot_dimension_numbers<[1], [0], [0], [1], [0, 0, 1, 1], [], []>} : vector<8x8xf32>, vector<8x241xf32>, vector<8x241xf32> -> vector<8x241xf32>
    %51 = vector.extract_strided_slice %26 {offsets = [0, 15], sizes = [1, 241], strides = [1, 1]} : vector<1x256xf32> to vector<1x241xf32>
    %52 = vector.broadcast %51 : vector<1x241xf32> to vector<8x241xf32>
    %53 = arith.mulf %50, %52 : vector<8x241xf32>
    %c0_30 = arith.constant 0 : index
    %c15 = arith.constant 15 : index
    %54 = vector.load %arg5[%c0_30, %c15] : memref<8x256xf32, #tpu.memory_space<vmem>>, vector<8x241xf32>
    %55 = arith.addf %54, %53 : vector<8x241xf32>
    %c0_31 = arith.constant 0 : index
    %c15_32 = arith.constant 15 : index
    %56 = vector.load %arg5[%c0_31, %c15_32] : memref<8x256xf32, #tpu.memory_space<vmem>>, vector<8x241xf32>
    tpu.vector_store %arg5[%c0_31, %c15_32], %55 {strides = array<i32>} : memref<8x256xf32, #tpu.memory_space<vmem>>, vector<8x241xf32>,
    %c3 = arith.constant 3 : index
    %c0_33 = arith.constant 0 : index
    %c0_34 = arith.constant 0 : index
    %57 = vector.load %arg2[%c3, %c0_33, %c0_34] : memref<9x8x8xf32, #tpu.memory_space<vmem>>, vector<1x8x8xf32>
    %58 = vector.shape_cast %57 : vector<1x8x8xf32> to vector<8x8xf32>
    %c0_35 = arith.constant 0 : index
    %c0_36 = arith.constant 0 : index
    %c0_37 = arith.constant 0 : index
    %59 = vector.load %arg1[%c0_35, %c0_36, %c0_37] : memref<1x8x256xf32, #tpu.memory_space<vmem>>, vector<1x8x255xf32>
    %60 = vector.shape_cast %59 : vector<1x8x255xf32> to vector<8x255xf32>
    %cst_38 = arith.constant dense<0.000000e+00> : vector<8x255xf32>
    %61 = tpu.matmul %58, %60, %cst_38 {dimension_numbers = #tpu.dot_dimension_numbers<[1], [0], [0], [1], [0, 0, 1, 1], [], []>} : vector<8x8xf32>, vector<8x255xf32>, vector<8x255xf32> -> vector<8x255xf32>
    %62 = vector.extract_strided_slice %22 {offsets = [0, 1], sizes = [1, 255], strides = [1, 1]} : vector<1x256xf32> to vector<1x255xf32>
    %63 = vector.broadcast %62 : vector<1x255xf32> to vector<8x255xf32>
    %64 = arith.mulf %61, %63 : vector<8x255xf32>
    %c0_39 = arith.constant 0 : index
    %c1_40 = arith.constant 1 : index
    %65 = vector.load %arg5[%c0_39, %c1_40] : memref<8x256xf32, #tpu.memory_space<vmem>>, vector<8x255xf32>
    %66 = arith.addf %65, %64 : vector<8x255xf32>
    %c0_41 = arith.constant 0 : index
    %c1_42 = arith.constant 1 : index
    %67 = vector.load %arg5[%c0_41, %c1_42] : memref<8x256xf32, #tpu.memory_space<vmem>>, vector<8x255xf32>
    tpu.vector_store %arg5[%c0_41, %c1_42], %66 {strides = array<i32>} : memref<8x256xf32, #tpu.memory_space<vmem>>, vector<8x255xf32>,
    %c4 = arith.constant 4 : index
    %c0_43 = arith.constant 0 : index
    %c0_44 = arith.constant 0 : index
    %68 = vector.load %arg2[%c4, %c0_43, %c0_44] : memref<9x8x8xf32, #tpu.memory_space<vmem>>, vector<1x8x8xf32>
    %69 = vector.shape_cast %68 : vector<1x8x8xf32> to vector<8x8xf32>
    %c0_45 = arith.constant 0 : index
    %c0_46 = arith.constant 0 : index
    %c0_47 = arith.constant 0 : index
    %70 = vector.load %arg1[%c0_45, %c0_46, %c0_47] : memref<1x8x256xf32, #tpu.memory_space<vmem>>, vector<1x8x256xf32>
    %71 = vector.shape_cast %70 : vector<1x8x256xf32> to vector<8x256xf32>
    %cst_48 = arith.constant dense<0.000000e+00> : vector<8x256xf32>
    %72 = tpu.matmul %69, %71, %cst_48 {dimension_numbers = #tpu.dot_dimension_numbers<[1], [0], [0], [1], [0, 0, 1, 1], [], []>} : vector<8x8xf32>, vector<8x256xf32>, vector<8x256xf32> -> vector<8x256xf32>
    %c0_49 = arith.constant 0 : index
    %c0_50 = arith.constant 0 : index
    %73 = vector.load %arg5[%c0_49, %c0_50] : memref<8x256xf32, #tpu.memory_space<vmem>>, vector<8x256xf32>
    %74 = arith.addf %73, %72 : vector<8x256xf32>
    %c0_51 = arith.constant 0 : index
    %c0_52 = arith.constant 0 : index
    %75 = vector.load %arg5[%c0_51, %c0_52] : memref<8x256xf32, #tpu.memory_space<vmem>>, vector<8x256xf32>
    tpu.vector_store %arg5[%c0_51, %c0_52], %74 {strides = array<i32>} : memref<8x256xf32, #tpu.memory_space<vmem>>, vector<8x256xf32>,
    %c5 = arith.constant 5 : index
    %c0_53 = arith.constant 0 : index
    %c0_54 = arith.constant 0 : index
    %76 = vector.load %arg2[%c5, %c0_53, %c0_54] : memref<9x8x8xf32, #tpu.memory_space<vmem>>, vector<1x8x8xf32>
    %77 = vector.shape_cast %76 : vector<1x8x8xf32> to vector<8x8xf32>
    %c0_55 = arith.constant 0 : index
    %c0_56 = arith.constant 0 : index
    %c1_57 = arith.constant 1 : index
    %78 = vector.load %arg1[%c0_55, %c0_56, %c1_57] : memref<1x8x256xf32, #tpu.memory_space<vmem>>, vector<1x8x255xf32>
    %79 = vector.shape_cast %78 : vector<1x8x255xf32> to vector<8x255xf32>
    %cst_58 = arith.constant dense<0.000000e+00> : vector<8x255xf32>
    %80 = tpu.matmul %77, %79, %cst_58 {dimension_numbers = #tpu.dot_dimension_numbers<[1], [0], [0], [1], [0, 0, 1, 1], [], []>} : vector<8x8xf32>, vector<8x255xf32>, vector<8x255xf32> -> vector<8x255xf32>
    %81 = vector.extract_strided_slice %26 {offsets = [0, 0], sizes = [1, 255], strides = [1, 1]} : vector<1x256xf32> to vector<1x255xf32>
    %82 = vector.broadcast %81 : vector<1x255xf32> to vector<8x255xf32>
    %83 = arith.mulf %80, %82 : vector<8x255xf32>
    %c0_59 = arith.constant 0 : index
    %c0_60 = arith.constant 0 : index
    %84 = vector.load %arg5[%c0_59, %c0_60] : memref<8x256xf32, #tpu.memory_space<vmem>>, vector<8x255xf32>
    %85 = arith.addf %84, %83 : vector<8x255xf32>
    %c0_61 = arith.constant 0 : index
    %c0_62 = arith.constant 0 : index
    %86 = vector.load %arg5[%c0_61, %c0_62] : memref<8x256xf32, #tpu.memory_space<vmem>>, vector<8x255xf32>
    tpu.vector_store %arg5[%c0_61, %c0_62], %85 {strides = array<i32>} : memref<8x256xf32, #tpu.memory_space<vmem>>, vector<8x255xf32>,
    %c6 = arith.constant 6 : index
    %c0_63 = arith.constant 0 : index
    %c0_64 = arith.constant 0 : index
    %87 = vector.load %arg2[%c6, %c0_63, %c0_64] : memref<9x8x8xf32, #tpu.memory_space<vmem>>, vector<1x8x8xf32>
    %88 = vector.shape_cast %87 : vector<1x8x8xf32> to vector<8x8xf32>
    %c0_65 = arith.constant 0 : index
    %c0_66 = arith.constant 0 : index
    %c15_67 = arith.constant 15 : index
    %89 = vector.load %arg1[%c0_65, %c0_66, %c15_67] : memref<1x8x256xf32, #tpu.memory_space<vmem>>, vector<1x8x241xf32>
    %90 = vector.shape_cast %89 : vector<1x8x241xf32> to vector<8x241xf32>
    %cst_68 = arith.constant dense<0.000000e+00> : vector<8x241xf32>
    %91 = tpu.matmul %88, %90, %cst_68 {dimension_numbers = #tpu.dot_dimension_numbers<[1], [0], [0], [1], [0, 0, 1, 1], [], []>} : vector<8x8xf32>, vector<8x241xf32>, vector<8x241xf32> -> vector<8x241xf32>
    %92 = vector.extract_strided_slice %22 {offsets = [0, 0], sizes = [1, 241], strides = [1, 1]} : vector<1x256xf32> to vector<1x241xf32>
    %93 = vector.broadcast %92 : vector<1x241xf32> to vector<8x241xf32>
    %94 = arith.mulf %91, %93 : vector<8x241xf32>
    %c0_69 = arith.constant 0 : index
    %c0_70 = arith.constant 0 : index
    %95 = vector.load %arg5[%c0_69, %c0_70] : memref<8x256xf32, #tpu.memory_space<vmem>>, vector<8x241xf32>
    %96 = arith.addf %95, %94 : vector<8x241xf32>
    %c0_71 = arith.constant 0 : index
    %c0_72 = arith.constant 0 : index
    %97 = vector.load %arg5[%c0_71, %c0_72] : memref<8x256xf32, #tpu.memory_space<vmem>>, vector<8x241xf32>
    tpu.vector_store %arg5[%c0_71, %c0_72], %96 {strides = array<i32>} : memref<8x256xf32, #tpu.memory_space<vmem>>, vector<8x241xf32>,
    %c7 = arith.constant 7 : index
    %c0_73 = arith.constant 0 : index
    %c0_74 = arith.constant 0 : index
    %98 = vector.load %arg2[%c7, %c0_73, %c0_74] : memref<9x8x8xf32, #tpu.memory_space<vmem>>, vector<1x8x8xf32>
    %99 = vector.shape_cast %98 : vector<1x8x8xf32> to vector<8x8xf32>
    %c0_75 = arith.constant 0 : index
    %c0_76 = arith.constant 0 : index
    %c16_77 = arith.constant 16 : index
    %100 = vector.load %arg1[%c0_75, %c0_76, %c16_77] : memref<1x8x256xf32, #tpu.memory_space<vmem>>, vector<1x8x240xf32>
    %101 = vector.shape_cast %100 : vector<1x8x240xf32> to vector<8x240xf32>
    %cst_78 = arith.constant dense<0.000000e+00> : vector<8x240xf32>
    %102 = tpu.matmul %99, %101, %cst_78 {dimension_numbers = #tpu.dot_dimension_numbers<[1], [0], [0], [1], [0, 0, 1, 1], [], []>} : vector<8x8xf32>, vector<8x240xf32>, vector<8x240xf32> -> vector<8x240xf32>
    %c0_79 = arith.constant 0 : index
    %c0_80 = arith.constant 0 : index
    %103 = vector.load %arg5[%c0_79, %c0_80] : memref<8x256xf32, #tpu.memory_space<vmem>>, vector<8x240xf32>
    %104 = arith.addf %103, %102 : vector<8x240xf32>
    %c0_81 = arith.constant 0 : index
    %c0_82 = arith.constant 0 : index
    %105 = vector.load %arg5[%c0_81, %c0_82] : memref<8x256xf32, #tpu.memory_space<vmem>>, vector<8x240xf32>
    tpu.vector_store %arg5[%c0_81, %c0_82], %104 {strides = array<i32>} : memref<8x256xf32, #tpu.memory_space<vmem>>, vector<8x240xf32>,
    %c8 = arith.constant 8 : index
    %c0_83 = arith.constant 0 : index
    %c0_84 = arith.constant 0 : index
    %106 = vector.load %arg2[%c8, %c0_83, %c0_84] : memref<9x8x8xf32, #tpu.memory_space<vmem>>, vector<1x8x8xf32>
    %107 = vector.shape_cast %106 : vector<1x8x8xf32> to vector<8x8xf32>
    %c0_85 = arith.constant 0 : index
    %c0_86 = arith.constant 0 : index
    %c17_87 = arith.constant 17 : index
    %108 = vector.load %arg1[%c0_85, %c0_86, %c17_87] : memref<1x8x256xf32, #tpu.memory_space<vmem>>, vector<1x8x239xf32>
    %109 = vector.shape_cast %108 : vector<1x8x239xf32> to vector<8x239xf32>
    %cst_88 = arith.constant dense<0.000000e+00> : vector<8x239xf32>
    %110 = tpu.matmul %107, %109, %cst_88 {dimension_numbers = #tpu.dot_dimension_numbers<[1], [0], [0], [1], [0, 0, 1, 1], [], []>} : vector<8x8xf32>, vector<8x239xf32>, vector<8x239xf32> -> vector<8x239xf32>
    %111 = vector.extract_strided_slice %26 {offsets = [0, 0], sizes = [1, 239], strides = [1, 1]} : vector<1x256xf32> to vector<1x239xf32>
    %112 = vector.broadcast %111 : vector<1x239xf32> to vector<8x239xf32>
    %113 = arith.mulf %110, %112 : vector<8x239xf32>
    %c0_89 = arith.constant 0 : index
    %c0_90 = arith.constant 0 : index
    %114 = vector.load %arg5[%c0_89, %c0_90] : memref<8x256xf32, #tpu.memory_space<vmem>>, vector<8x239xf32>
    %115 = arith.addf %114, %113 : vector<8x239xf32>
    %c0_91 = arith.constant 0 : index
    %c0_92 = arith.constant 0 : index
    %116 = vector.load %arg5[%c0_91, %c0_92] : memref<8x256xf32, #tpu.memory_space<vmem>>, vector<8x239xf32>
    tpu.vector_store %arg5[%c0_91, %c0_92], %115 {strides = array<i32>} : memref<8x256xf32, #tpu.memory_space<vmem>>, vector<8x239xf32>,
    %c0_93 = arith.constant 0 : index
    %c0_94 = arith.constant 0 : index
    %117 = vector.load %arg5[%c0_93, %c0_94] : memref<8x256xf32, #tpu.memory_space<vmem>>, vector<8x256xf32>
    %c0_95 = arith.constant 0 : index
    %c0_96 = arith.constant 0 : index
    %118 = vector.load %arg3[%c0_95, %c0_96] : memref<8x1xf32, #tpu.memory_space<vmem>>, vector<8x1xf32>
    %119 = vector.broadcast %118 : vector<8x1xf32> to vector<8x256xf32>
    %120 = arith.addf %117, %119 : vector<8x256xf32>
    %cst_97 = arith.constant 5.000000e-01 : f32
    %121 = vector.broadcast %cst_97 : f32 to vector<8x256xf32>
    %122 = arith.mulf %121, %120 : vector<8x256xf32>
    %cst_98 = arith.constant 0.707106769 : f32
    %123 = vector.broadcast %cst_98 : f32 to vector<8x256xf32>
    %124 = arith.mulf %120, %123 : vector<8x256xf32>
    %125 = math.erf %124 : vector<8x256xf32>
    %cst_99 = arith.constant 1.000000e+00 : f32
    %126 = vector.broadcast %cst_99 : f32 to vector<8x256xf32>
    %127 = arith.addf %126, %125 : vector<8x256xf32>
    %128 = arith.mulf %122, %127 : vector<8x256xf32>
    %c0_100 = arith.constant 0 : index
    %c0_101 = arith.constant 0 : index
    %c0_102 = arith.constant 0 : index
    %129 = vector.load %arg4[%c0_100, %c0_101, %c0_102] : memref<1x8x256xf32, #tpu.memory_space<vmem>>, vector<1x8x256xf32>
    %130 = vector.shape_cast %129 : vector<1x8x256xf32> to vector<8x256xf32>
    %131 = vector.shape_cast %128 : vector<8x256xf32> to vector<1x8x256xf32>
    tpu.vector_store %arg4[%c0_100, %c0_101, %c0_102], %131 {strides = array<i32>} : memref<1x8x256xf32, #tpu.memory_space<vmem>>, vector<1x8x256xf32>,
    return
  }
  func.func @transform_0(%arg0: i32) -> (i32, i32, i32) {
    %c0_i32 = arith.constant 0 : i32
    %c0_i32_0 = arith.constant 0 : i32
    %c0_i32_1 = arith.constant 0 : i32
    return %arg0, %c0_i32, %c0_i32_0 : i32, i32, i32
  }
  func.func @transform_1(%arg0: i32) -> (i32, i32, i32) {
    %c0_i32 = arith.constant 0 : i32
    %c0_i32_0 = arith.constant 0 : i32
    %c0_i32_1 = arith.constant 0 : i32
    %c0_i32_2 = arith.constant 0 : i32
    return %c0_i32, %c0_i32_0, %c0_i32_1 : i32, i32, i32
  }
  func.func @transform_2(%arg0: i32) -> (i32, i32) {
    %c0_i32 = arith.constant 0 : i32
    %c0_i32_0 = arith.constant 0 : i32
    %c0_i32_1 = arith.constant 0 : i32
    return %c0_i32, %c0_i32_0 : i32, i32
  }
  func.func @transform_3(%arg0: i32) -> (i32, i32, i32) {
    %c0_i32 = arith.constant 0 : i32
    %c0_i32_0 = arith.constant 0 : i32
    %c0_i32_1 = arith.constant 0 : i32
    return %arg0, %c0_i32, %c0_i32_0 : i32, i32, i32
  }
}

</mosaic_0001>

<bundles_post_ra>
// kernel: tile.0
= control target key start
LH: loop header
LB: loop body
LE: loop exit
PB: predicated region body
PF: predicated region fallthrough
CT: control target
= control target key end

     0   :  { %s176_s8 = smov 127   ;;  %s177_s9 = smov 123   ;;  %vm7_vm0 = vcmask 7168   ;;  %s331_s0 = inlined_call_operand.vmem [shape: f32[4,16], index: 0, kind: input, shape index: {}]   ;;  %s332_s1 = inlined_call_operand.vmem [shape: f32[64,1], index: 1, kind: output, shape index: {}]  }
   0x1   :  { %v4_v0 = vld [vmem:[%s331_s0] sm:$0xf]  ;;  %s175_s0 = smov 125   ;;  %s178_s10 = smov 124  }
   0x2   :  { %5 = vst [vmem:[#allocation0] sm:$0xf] %v4_v0  ;;  %s179_s11 = smov 126   ;;  %s180_s12 = smov 122  }
   0x3   :  { %s181_s13 = smov 120   ;;  %s182_s14 = smov 121  }
   0x4   :  { %s183_s15 = smov 119   ;;  %s184_s16 = smov 117  }
   0x5   :  { %s185_s17 = smov 118   ;;  %s186_s18 = smov 116  }
   0x6   :  { %s187_s19 = smov 114   ;;  %s188_s20 = smov 115  }
   0x7   :  { %s189_s21 = smov 113  }
   0x9   :  { %v26_v1 = vld [vmem:[#allocation0] sm:$0xf]  }
   0xa   :  { %v10_v2 = vld [vmem:[#allocation0] sm:$0xf]   ;;  %27 = vrot.lane.b32.xlu1 %v26_v1, %s175_s0 }
   0xb   :  { %11 = vrot.lane.b32.xlu0 %v10_v2, %s176_s8  ;;  %v42_v3 = vld [vmem:[#allocation0] sm:$0xf]  }
   0xc   :  { %43 = vrot.lane.b32.xlu2 %v42_v3, %s177_s9  ;;  %v34_v4 = vld [vmem:[#allocation0] sm:$0xf]  }
   0xd   :  { %v18_v5 = vld [vmem:[#allocation0] sm:$0xf]  }
   0xe   :  { %v50_v6 = vld [vmem:[#allocation0] sm:$0xf]  }
   0xf   :  { %v66_v7 = vld [vmem:[#allocation0] sm:$0xf]  }
  0x10   :  { %v58_v8 = vld [vmem:[#allocation0] sm:$0xf]  }
  0x11   :  { %v74_v9 = vld [vmem:[#allocation0] sm:$0xf]  }
  0x12   :  { %35 = vrot.lane.b32.xlu1 %v34_v4, %s178_s10  ;;  %v90_v10 = vld [vmem:[#allocation0] sm:$0xf]  }
  0x13   :  { %19 = vrot.lane.b32.xlu0 %v18_v5, %s179_s11  ;;  %v82_v11 = vld [vmem:[#allocation0] sm:$0xf]  }
  0x14   :  { %51 = vrot.lane.b32.xlu2 %v50_v6, %s180_s12  ;;  %v98_v12 = vld [vmem:[#allocation0] sm:$0xf]  }
  0x15   :  { %v114_v13 = vld [vmem:[#allocation0] sm:$0xf]  }
  0x16   :  { %v106_v14 = vld [vmem:[#allocation0] sm:$0xf]  }
  0x17   :  { %v122_v15 = vld [vmem:[#allocation0] sm:$0xf]  }
  0x18   :  { %v6_v22 = vld [vmem:[#allocation0] sm:$0xf]  }
  0x19   :  { %8 = vst.msk [vmem:[%s332_s1] ss:$16 sm:$0x3] %vm7_vm0, %v6_v22  }
  0x1a   :  { %67 = vrot.lane.b32.xlu1 %v66_v7, %s181_s13  ;;  %9 = vst.msk [vmem:[%s332_s1] ss:$16 sm:$0xc] %vm7_vm0, %v6_v22  }
  0x1b   :  { %59 = vrot.lane.b32.xlu0 %v58_v8, %s182_s14 }
  0x1c   :  { %75 = vrot.lane.b32.xlu2 %v74_v9, %s183_s15 }
  0x22   :  { %91 = vrot.lane.b32.xlu1 %v90_v10, %s184_s16 }
  0x23   :  { %83 = vrot.lane.b32.xlu0 %v82_v11, %s185_s17 }
  0x24   :  { %99 = vrot.lane.b32.xlu2 %v98_v12, %s186_s18 }
  0x2a   :  { %115 = vrot.lane.b32.xlu1 %v114_v13, %s187_s19 }
  0x2b   :  { %107 = vrot.lane.b32.xlu0 %v106_v14, %s188_s20 }
  0x2c   :  { %123 = vrot.lane.b32.xlu2 %v122_v15, %s189_s21 }
  0x66   :  { %v44_v16 = vpop.permute.xlu2 %43  }
  0x67   :  { %138 = vst.msk [vmem:[%s332_s1 + $0x5] ss:$16 sm:$0x3] %vm7_vm0, %v44_v16  }
  0x68   :  { %139 = vst.msk [vmem:[%s332_s1 + $0x5] ss:$16 sm:$0xc] %vm7_vm0, %v44_v16  }
  0x6e   :  { %v52_v17 = vpop.permute.xlu2 %51  }
  0x6f   :  { %140 = vst.msk [vmem:[%s332_s1 + $0x6] ss:$16 sm:$0x3] %vm7_vm0, %v52_v17  }
  0x70   :  { %141 = vst.msk [vmem:[%s332_s1 + $0x6] ss:$16 sm:$0xc] %vm7_vm0, %v52_v17  }
  0x76   :  { %v76_v18 = vpop.permute.xlu2 %75  }
  0x77   :  { %146 = vst.msk [vmem:[%s332_s1 + $0x9] ss:$16 sm:$0x3] %vm7_vm0, %v76_v18  }
  0x78   :  { %147 = vst.msk [vmem:[%s332_s1 + $0x9] ss:$16 sm:$0xc] %vm7_vm0, %v76_v18  }
  0x7c   :  { %v28_v19 = vpop.permute.xlu1 %27  }
  0x7d   :  { %v12_v20 = vpop.permute.xlu0 %11   ;;  %134 = vst.msk [vmem:[%s332_s1 + $0x3] ss:$16 sm:$0x3] %vm7_vm0, %v28_v19  }
  0x7e   :  { %135 = vst.msk [vmem:[%s332_s1 + $0x3] ss:$16 sm:$0xc] %vm7_vm0, %v28_v19   ;;  %v100_v21 = vpop.permute.xlu2 %99  }
  0x7f   :  { %130 = vst.msk [vmem:[%s332_s1 + $0x1] ss:$16 sm:$0x3] %vm7_vm0, %v12_v20  }
  0x80   :  { %131 = vst.msk [vmem:[%s332_s1 + $0x1] ss:$16 sm:$0xc] %vm7_vm0, %v12_v20  }
  0x81   :  { %152 = vst.msk [vmem:[%s332_s1 + $0xc] ss:$16 sm:$0x3] %vm7_vm0, %v100_v21  }
  0x82   :  { %153 = vst.msk [vmem:[%s332_s1 + $0xc] ss:$16 sm:$0xc] %vm7_vm0, %v100_v21  }
  0x84   :  { %v36_v23 = vpop.permute.xlu1 %35  }
  0x85   :  { %v20_v24 = vpop.permute.xlu0 %19   ;;  %136 = vst.msk [vmem:[%s332_s1 + $0x4] ss:$16 sm:$0x3] %vm7_vm0, %v36_v23  }
  0x86   :  { %137 = vst.msk [vmem:[%s332_s1 + $0x4] ss:$16 sm:$0xc] %vm7_vm0, %v36_v23   ;;  %v124_v25 = vpop.permute.xlu2 %123  }
  0x87   :  { %132 = vst.msk [vmem:[%s332_s1 + $0x2] ss:$16 sm:$0x3] %vm7_vm0, %v20_v24  }
  0x88   :  { %133 = vst.msk [vmem:[%s332_s1 + $0x2] ss:$16 sm:$0xc] %vm7_vm0, %v20_v24  }
  0x89   :  { %158 = vst.msk [vmem:[%s332_s1 + $0xf] ss:$16 sm:$0x3] %vm7_vm0, %v124_v25  }
  0x8a   :  { %159 = vst.msk [vmem:[%s332_s1 + $0xf] ss:$16 sm:$0xc] %vm7_vm0, %v124_v25  }
  0x8c   :  { %v68_v26 = vpop.permute.xlu1 %67  }
  0x8d   :  { %v60_v27 = vpop.permute.xlu0 %59   ;;  %144 = vst.msk [vmem:[%s332_s1 + $0x8] ss:$16 sm:$0x3] %vm7_vm0, %v68_v26  }
  0x8e   :  { %145 = vst.msk [vmem:[%s332_s1 + $0x8] ss:$16 sm:$0xc] %vm7_vm0, %v68_v26  }
  0x8f   :  { %142 = vst.msk [vmem:[%s332_s1 + $0x7] ss:$16 sm:$0x3] %vm7_vm0, %v60_v27  }
  0x90   :  { %143 = vst.msk [vmem:[%s332_s1 + $0x7] ss:$16 sm:$0xc] %vm7_vm0, %v60_v27  }
  0x94   :  { %v92_v28 = vpop.permute.xlu1 %91  }
  0x95   :  { %v84_v29 = vpop.permute.xlu0 %83   ;;  %150 = vst.msk [vmem:[%s332_s1 + $0xb] ss:$16 sm:$0x3] %vm7_vm0, %v92_v28  }
  0x96   :  { %151 = vst.msk [vmem:[%s332_s1 + $0xb] ss:$16 sm:$0xc] %vm7_vm0, %v92_v28  }
  0x97   :  { %148 = vst.msk [vmem:[%s332_s1 + $0xa] ss:$16 sm:$0x3] %vm7_vm0, %v84_v29  }
  0x98   :  { %149 = vst.msk [vmem:[%s332_s1 + $0xa] ss:$16 sm:$0xc] %vm7_vm0, %v84_v29  }
  0x9c   :  { %v116_v30 = vpop.permute.xlu1 %115  }
  0x9d   :  { %v108_v31 = vpop.permute.xlu0 %107   ;;  %156 = vst.msk [vmem:[%s332_s1 + $0xe] ss:$16 sm:$0x3] %vm7_vm0, %v116_v30  }
  0x9e   :  { %157 = vst.msk [vmem:[%s332_s1 + $0xe] ss:$16 sm:$0xc] %vm7_vm0, %v116_v30  }
  0x9f   :  { %154 = vst.msk [vmem:[%s332_s1 + $0xd] ss:$16 sm:$0x3] %vm7_vm0, %v108_v31  }
  0xa0   :  { %155 = vst.msk [vmem:[%s332_s1 + $0xd] ss:$16 sm:$0xc] %vm7_vm0, %v108_v31  }

// kernel: tile.13
= control target key start
LH: loop header
LB: loop body
LE: loop exit
PB: predicated region body
PF: predicated region fallthrough
CT: control target
= control target key end

     0   :  { %s22_s0 = inlined_call_operand.vmem [shape: f32[16], index: 0, kind: input, shape index: {}]   ;;  %s23_s1 = inlined_call_operand.vmem [shape: f32[4,16], index: 1, kind: output, shape index: {}]  }
   0x1   :  { %v4_v0 = vld [vmem:[%s22_s0] ss:$0 sm:$0xff] }
   0x2   :  { %5 = vst [vmem:[%s23_s1] sm:$0xf] %v4_v0 }

// kernel: tile.18
= control target key start
LH: loop header
LB: loop body
LE: loop exit
PB: predicated region body
PF: predicated region fallthrough
CT: control target
= control target key end

     0   :  { %s22_s0 = inlined_call_operand.vmem [shape: f32[8], index: 0, kind: input, shape index: {}]   ;;  %s23_s1 = inlined_call_operand.vmem [shape: f32[4,8], index: 1, kind: output, shape index: {}]  }
   0x1   :  { %v4_v0 = vld [vmem:[%s22_s0] ss:$0 sm:$0xff] }
   0x2   :  { %5 = vst [vmem:[%s23_s1] sm:$0xf] %v4_v0 }

// kernel: tile.1
= control target key start
LH: loop header
LB: loop body
LE: loop exit
PB: predicated region body
PF: predicated region fallthrough
CT: control target
= control target key end

     0   :  { %s66_s8 = smov 125   ;;  %s67_s9 = smov 123   ;;  %vm7_vm0 = vcmask 7168   ;;  %s117_s0 = inlined_call_operand.vmem [shape: f32[4,8], index: 0, kind: input, shape index: {}]   ;;  %s118_s1 = inlined_call_operand.vmem [shape: f32[32,1], index: 1, kind: output, shape index: {}]  }
   0x1   :  { %v4_v0 = vld [vmem:[%s117_s0] sm:$0xf]  ;;  %s65_s0 = smov 127   ;;  %s68_s10 = smov 126  }
   0x2   :  { %5 = vst [vmem:[#allocation0] sm:$0xf] %v4_v0  ;;  %s69_s11 = smov 124   ;;  %s70_s12 = smov 122  }
   0x3   :  { %s71_s13 = smov 121  }
   0x9   :  { %v9_v1 = vld [vmem:[#allocation0] sm:$0xf]  }
   0xa   :  { %v21_v2 = vld [vmem:[#allocation0] sm:$0xf]   ;;  %10 = vrot.lane.b32.xlu0 %v9_v1, %s65_s0 }
   0xb   :  { %22 = vrot.lane.b32.xlu1 %v21_v2, %s66_s8  ;;  %v33_v3 = vld [vmem:[#allocation0] sm:$0xf]  }
   0xc   :  { %34 = vrot.lane.b32.xlu2 %v33_v3, %s67_s9  ;;  %v15_v4 = vld [vmem:[#allocation0] sm:$0xf]  }
   0xd   :  { %v27_v5 = vld [vmem:[#allocation0] sm:$0xf]  }
   0xe   :  { %v39_v6 = vld [vmem:[#allocation0] sm:$0xf]  }
   0xf   :  { %v45_v7 = vld [vmem:[#allocation0] sm:$0xf]  }
  0x10   :  { %v6_v8 = vld [vmem:[#allocation0] sm:$0xf]  }
  0x11   :  { %8 = vst.msk [vmem:[%s118_s1] ss:$8 sm:$0xf] %vm7_vm0, %v6_v8  }
  0x12   :  { %16 = vrot.lane.b32.xlu0 %v15_v4, %s68_s10 }
  0x13   :  { %28 = vrot.lane.b32.xlu1 %v27_v5, %s69_s11 }
  0x14   :  { %40 = vrot.lane.b32.xlu2 %v39_v6, %s70_s12 }
  0x1a   :  { %46 = vrot.lane.b32.xlu0 %v45_v7, %s71_s13 }
  0x66   :  { %v35_v9 = vpop.permute.xlu2 %34  }
  0x67   :  { %55 = vst.msk [vmem:[%s118_s1 + $0x5] ss:$8 sm:$0xf] %vm7_vm0, %v35_v9  }
  0x6e   :  { %v41_v10 = vpop.permute.xlu2 %40  }
  0x6f   :  { %56 = vst.msk [vmem:[%s118_s1 + $0x6] ss:$8 sm:$0xf] %vm7_vm0, %v41_v10  }
  0x7c   :  { %v11_v11 = vpop.permute.xlu0 %10  }
  0x7d   :  { %v23_v12 = vpop.permute.xlu1 %22   ;;  %51 = vst.msk [vmem:[%s118_s1 + $0x1] ss:$8 sm:$0xf] %vm7_vm0, %v11_v11  }
  0x7e   :  { %53 = vst.msk [vmem:[%s118_s1 + $0x3] ss:$8 sm:$0xf] %vm7_vm0, %v23_v12  }
  0x84   :  { %v17_v13 = vpop.permute.xlu0 %16  }
  0x85   :  { %v29_v14 = vpop.permute.xlu1 %28   ;;  %52 = vst.msk [vmem:[%s118_s1 + $0x2] ss:$8 sm:$0xf] %vm7_vm0, %v17_v13  }
  0x86   :  { %54 = vst.msk [vmem:[%s118_s1 + $0x4] ss:$8 sm:$0xf] %vm7_vm0, %v29_v14  }
  0x8c   :  { %v47_v15 = vpop.permute.xlu0 %46  }
  0x8d   :  { %57 = vst.msk [vmem:[%s118_s1 + $0x7] ss:$8 sm:$0xf] %vm7_vm0, %v47_v15  }

// kernel: decoder_forward_pallas.7
= control target key start
LH: loop header
LB: loop body
LE: loop exit
PB: predicated region body
PF: predicated region fallthrough
CT: control target
= control target key end

     0   :  { %s435_s12 = smov 0   ;;  %s520_s0 = inlined_call_operand.vmem [shape: f32[2,32,16], index: 0, kind: input, shape index: {}]   ;;  %s521_s1 = inlined_call_operand.vmem [shape: f32[64,32], index: 1, kind: input, shape index: {}]   ;;  %s522_s2 = inlined_call_operand.vmem [shape: f32[64,1], index: 2, kind: input, shape index: {}]   ;;  %s523_s3 = inlined_call_operand.vmem [shape: f32[2,64,16], index: 3, kind: output, shape index: {}]  }
   0x1 LB: > { %s361_s13 = sadd.s32 4294967295, %s412_s12   ;;  %p365_p0 = scmp.ge.s32.totalorder %s412_s12, 1  ;;  %s412_s12 = sphi %s435_s12, %s13_s12  }
   0x2   : > { %p137_p1 = scmp.lt.s32.totalorder %s412_s12, 3 }
   0x4   : > { %p138_p2 = pnand %p365_p0, %p137_p1 }
   0x5   : > { %p161_p3 = scmp.lt.s32.totalorder (!%p138_p2), %s361_s13, 1 }
   0x6   : > { %141 = sbr.rel (%p138_p2) target bundleno = 168 (0xa8), region = 32 }
   0xb   : > { %v185_v0 = vld [vmem:[%s522_s2 + $0x10] sm:$0xff]  ;;  %v183_v1 = vld [vmem:[%s522_s2] sm:$0xff]  ;;  %v414_v2 = vmov 0   ;;  %s525_s13 = smov (!%p161_p3, %s361_s13), 1  ;;  %vm231_vm0 = vcmask 261120   ;;  %v186_v12 = vld [vmem:[%s522_s2 + $0x18] sm:$0xff] }
   0xc   : > { %404 = vset.pattern.permute.xlu1 %v414_v2  ;;  %403 = vset.pattern.permute.xlu0 %v414_v2  ;;  %s380_s18 = sshll.u32 %s525_s13, 5  ;;  %v187_v3 = vld [vmem:[%s522_s2 + $0x20] sm:$0xff]  ;;  %v173_v9 = vld [vmem:[%s521_s1 + $0x10] sm:$0xff]  ;;  %v184_v13 = vld [vmem:[%s522_s2 + $0x8] sm:$0xff]  ;;  %s381_s25 = sshll.u32 %s525_s13, 6  ;;  %vm297_vm1 = vcmask 130048  }
   0xd   : > { %203 = vperm.xlu1 %404, %v185_v0   ;;  %193 = vperm.xlu0 %403, %v183_v1   ;;  %s165_s23 = scalar_lea.vmem %s520_s0, %s380_s18  ;;  %v171_v8 = vld [vmem:[%s521_s1] sm:$0xff]  ;;  %v177_v11 = vld [vmem:[%s521_s1 + $0x30] sm:$0xff]  ;;  %v188_v14 = vld [vmem:[%s522_s2 + $0x28] sm:$0xff]  ;;  %s170_s28 = scalar_lea.vmem %s523_s3, %s381_s25 }
   0xe   : > { %405 = vset.pattern.permute.xlu2 %v414_v2  ;;  %v182_v4 = vld [vmem:[%s165_s23 + $0x18] sm:$0xff]  ;;  %v181_v5 = vld [vmem:[%s165_s23 + $0x10] sm:$0xff]  ;;  %v180_v6 = vld [vmem:[%s165_s23 + $0x8] sm:$0xff] }
   0xf   : > { %213 = vperm.xlu2 %405, %v187_v3   ;;  %268 = vmatpush.msra.mxu0 %v182_v4  ;;  %v179_v7 = vld [vmem:[%s165_s23] sm:$0xff]  ;;  %v172_v15 = vld [vmem:[%s521_s1 + $0x8] sm:$0xff]  ;;  %v174_v16 = vld [vmem:[%s521_s1 + $0x18] sm:$0xff] }
  0x10   : > { %382 = vmatpush.msra.mxu1 %v182_v4  ;;  %383 = vmatpush.msra.mxu2 %v182_v4  ;;  %v175_v10 = vld [vmem:[%s521_s1 + $0x20] sm:$0xff]  ;;  %v176_v17 = vld [vmem:[%s521_s1 + $0x28] sm:$0xff]  ;;  %v178_v18 = vld [vmem:[%s521_s1 + $0x38] sm:$0xff] }
  0x11   : > { %384 = vmatpush.msra.mxu3 %v182_v4  ;;  %269 = vmatpush.msra.mxu0 %v181_v5  ;;  %v190_v19 = vld [vmem:[%s522_s2 + $0x38] sm:$0xff]  ;;  %v189_v20 = vld [vmem:[%s522_s2 + $0x30] sm:$0xff] }
  0x12   : > { %385 = vmatpush.msra.mxu1 %v181_v5  ;;  %386 = vmatpush.msra.mxu2 %v181_v5 }
  0x13   : > { %387 = vmatpush.msra.mxu3 %v181_v5  ;;  %270 = vmatpush.msra.mxu0 %v180_v6 }
  0x14   : > { %388 = vmatpush.msra.mxu1 %v180_v6  ;;  %389 = vmatpush.msra.mxu2 %v180_v6 }
  0x15   : > { %390 = vmatpush.msra.mxu3 %v180_v6  ;;  %271 = vmatpush.msra.mxu0 %v179_v7 }
  0x16   : > { %391 = vmatpush.msra.mxu1 %v179_v7  ;;  %392 = vmatpush.msra.mxu2 %v179_v7 }
  0x17   : > { %393 = vmatpush.msra.mxu3 %v179_v7  ;;  %370 = vmatmul.msk.f32.vlgmr.msra.gmra.mxu0 %vm231_vm0, %v171_v8 }
  0x18   : > { %372 = vmatmul.msk.f32.vlgmr.msra.gmra.mxu1 %vm231_vm0, %v173_v9  ;;  %374 = vmatmul.msk.f32.vlgmr.msra.gmra.mxu2 %vm231_vm0, %v175_v10 }
  0x19   : > { %376 = vmatmul.msk.f32.vlgmr.msra.gmra.mxu3 %vm231_vm0, %v177_v11  ;;  %208 = vperm.xlu1 %404, %v186_v12  }
  0x1a   : > { %198 = vperm.xlu0 %403, %v184_v13   ;;  %218 = vperm.xlu2 %405, %v188_v14  }
  0x1f   : > { %371 = vmatmul.msk.f32.gmra.mxu0 %vm231_vm0, %v172_v15 }
  0x20   : > { %373 = vmatmul.msk.f32.gmra.mxu1 %vm231_vm0, %v174_v16  ;;  %375 = vmatmul.msk.f32.gmra.mxu2 %vm231_vm0, %v176_v17 }
  0x21   : > { %377 = vmatmul.msk.f32.gmra.mxu3 %vm231_vm0, %v178_v18  ;;  %228 = vperm.xlu1 %404, %v190_v19  }
  0x22   : > { %223 = vperm.xlu0 %403, %v189_v20  }
  0x69   : > { %v214_v29 = vpop.permute.xlu2 %213 }
  0x74   : > { %v219_v40 = vpop.permute.xlu2 %218 }
  0x7f   : > { %v194_v21 = vpop.permute.xlu0 %193  ;;  %v204_v22 = vpop.permute.xlu1 %203 }
  0x8b   : > { %v209_v28 = vpop.permute.xlu1 %208 }
  0x8c   : > { %v199_v23 = vpop.permute.xlu0 %198 }
  0x93   : > { %v229_v39 = vpop.permute.xlu1 %228 }
  0x94   : > { %v273_v24 = vpop.f32.mrf.mxu0  ;;  %v224_v30 = vpop.permute.xlu0 %223 }
  0x95   : > { %v279_v25 = vpop.f32.mrf.mxu1  ;;  %v274_v26 = vadd.f32 %v273_v24, %v194_v21 }
  0x96   : > { %v280_v27 = vadd.f32 %v279_v25, %v204_v22 }
  0x97   : > { %298 = vst.msk [vmem:[%s170_s28] sm:$0xff] %vm297_vm1, %v274_v26 }
  0x98   : > { %300 = vst.msk [vmem:[%s170_s28 + $0x10] sm:$0xff] %vm297_vm1, %v280_v27 }
  0x9b   : > { %v285_v31 = vpop.f32.mrf.mxu2 }
  0x9c   : > { %v291_v32 = vpop.f32.mrf.mxu3  ;;  %v286_v33 = vadd.f32 %v285_v31, %v214_v29  ;;  %v276_v35 = vpop.f32.mrf.mxu0 }
  0x9d   : > { %v292_v34 = vadd.f32 %v291_v32, %v224_v30  ;;  %v282_v36 = vpop.f32.mrf.mxu1  ;;  %v277_v37 = vadd.f32 %v276_v35, %v199_v23 }
  0x9e   : > { %v283_v38 = vadd.f32 %v282_v36, %v209_v28  ;;  %302 = vst.msk [vmem:[%s170_s28 + $0x20] sm:$0xff] %vm297_vm1, %v286_v33 }
  0x9f   : > { %304 = vst.msk [vmem:[%s170_s28 + $0x30] sm:$0xff] %vm297_vm1, %v292_v34 }
  0xa0   : > { %299 = vst.msk [vmem:[%s170_s28 + $0x8] sm:$0xff] %vm297_vm1, %v277_v37 }
  0xa1   : > { %301 = vst.msk [vmem:[%s170_s28 + $0x18] sm:$0xff] %vm297_vm1, %v283_v38 }
  0xa3   : > { %v288_v41 = vpop.f32.mrf.mxu2 }
  0xa4   : > { %v294_v42 = vpop.f32.mrf.mxu3  ;;  %v289_v43 = vadd.f32 %v288_v41, %v219_v40 }
  0xa5   : > { %v295_v44 = vadd.f32 %v294_v42, %v229_v39 }
  0xa6   : > { %303 = vst.msk [vmem:[%s170_s28 + $0x28] sm:$0xff] %vm297_vm1, %v289_v43 }
  0xa7   : > { %305 = vst.msk [vmem:[%s170_s28 + $0x38] sm:$0xff] %vm297_vm1, %v295_v44 }
  0xa8 PF: > { %s13_s12 = sadd.s32 1, %s412_s12  }
  0xa9   : > { %p10_p4 = scmp.ge.s32.totalorder %s13_s12, 4  }
  0xab   :  { %12 = sbr.rel (!%p10_p4) target bundleno = 1 (0x1), region = 62 }

// kernel: decoder_forward_pallas.10
= control target key start
LH: loop header
LB: loop body
LE: loop exit
PB: predicated region body
PF: predicated region fallthrough
CT: control target
= control target key end

     0   :  { %s366_s12 = smov 0   ;;  %s411_s0 = inlined_call_operand.vmem [shape: f32[2,16,64], index: 0, kind: input, shape index: {}]   ;;  %s412_s1 = inlined_call_operand.vmem [shape: f32[32,16], index: 1, kind: input, shape index: {}]   ;;  %s413_s2 = inlined_call_operand.vmem [shape: f32[32,1], index: 2, kind: input, shape index: {}]   ;;  %s414_s3 = inlined_call_operand.vmem [shape: f32[2,32,64], index: 3, kind: output, shape index: {}]  }
   0x1 LB: > { %s303_s13 = sadd.s32 4294967295, %s343_s12   ;;  %p307_p0 = scmp.ge.s32.totalorder %s343_s12, 1  ;;  %s343_s12 = sphi %s366_s12, %s13_s12  }
   0x2   : > { %p137_p1 = scmp.lt.s32.totalorder %s343_s12, 3 }
   0x4   : > { %p138_p2 = pnand %p307_p0, %p137_p1 }
   0x5   : > { %p161_p3 = scmp.lt.s32.totalorder (!%p138_p2), %s303_s13, 1 }
   0x6   : > { %141 = sbr.rel (%p138_p2) target bundleno = 156 (0x9c), region = 32 }
   0xb   : > { %v345_v0 = vmov 0   ;;  %v179_v1 = vld [vmem:[%s413_s2 + $0x10] sm:$0xff]  ;;  %v177_v2 = vld [vmem:[%s413_s2] sm:$0xff]  ;;  %s416_s13 = smov (!%p161_p3, %s303_s13), 1  ;;  %vm201_vm0 = vcmask 130048   ;;  %v172_v6 = vld [vmem:[%s412_s1 + $0x8] sm:$0xff] }
   0xc   : > { %336 = vset.pattern.permute.xlu1 %v345_v0  ;;  %335 = vset.pattern.permute.xlu0 %v345_v0  ;;  %s318_s18 = sshll.u32 %s416_s13, 4  ;;  %v171_v5 = vld [vmem:[%s412_s1] sm:$0xff]  ;;  %v173_v7 = vld [vmem:[%s412_s1 + $0x10] sm:$0xff]  ;;  %v174_v8 = vld [vmem:[%s412_s1 + $0x18] sm:$0xff]  ;;  %s319_s7 = sshll.u32 %s416_s13, 5  ;;  %vm243_vm1 = vcmask 523264  }
   0xd   : > { %193 = vperm.xlu1 %336, %v179_v1   ;;  %183 = vperm.xlu0 %335, %v177_v2   ;;  %s165_s21 = scalar_lea.vmem %s411_s0, %s318_s18  ;;  %v180_v9 = vld [vmem:[%s413_s2 + $0x18] sm:$0xff]  ;;  %v178_v10 = vld [vmem:[%s413_s2 + $0x8] sm:$0xff]  ;;  %s170_s10 = scalar_lea.vmem %s414_s3, %s319_s7 }
   0xe   : > { %v176_v3 = vld [vmem:[%s165_s21 + $0x8] sm:$0xff]  ;;  %v175_v4 = vld [vmem:[%s165_s21] sm:$0xff] }
   0xf   : > { %228 = vmatpush.msra.mxu0 %v176_v3  ;;  %320 = vmatpush.msra.mxu1 %v176_v3 }
  0x10   : > { %321 = vmatpush.msra.mxu2 %v176_v3  ;;  %322 = vmatpush.msra.mxu3 %v176_v3 }
  0x11   : > { %229 = vmatpush.msra.mxu0 %v175_v4  ;;  %323 = vmatpush.msra.mxu1 %v175_v4 }
  0x12   : > { %324 = vmatpush.msra.mxu2 %v175_v4  ;;  %325 = vmatpush.msra.mxu3 %v175_v4 }
  0x13   : > { %312 = vmatmul.msk.f32.vlgmr.msra.gmra.mxu0 %vm201_vm0, %v171_v5  ;;  %313 = vmatmul.msk.f32.vlgmr.msra.gmra.mxu1 %vm201_vm0, %v172_v6 }
  0x14   : > { %314 = vmatmul.msk.f32.vlgmr.msra.gmra.mxu2 %vm201_vm0, %v173_v7  ;;  %315 = vmatmul.msk.f32.vlgmr.msra.gmra.mxu3 %vm201_vm0, %v174_v8 }
  0x15   : > { %198 = vperm.xlu1 %336, %v180_v9   ;;  %188 = vperm.xlu0 %335, %v178_v10  }
  0x7f   : > { %v184_v11 = vpop.permute.xlu0 %183  ;;  %v194_v12 = vpop.permute.xlu1 %193 }
  0x87   : > { %v189_v13 = vpop.permute.xlu0 %188  ;;  %v199_v18 = vpop.permute.xlu1 %198 }
  0x90   : > { %v231_v14 = vpop.f32.mrf.mxu0  ;;  %v234_v15 = vpop.f32.mrf.mxu1 }
  0x91   : > { %v232_v16 = vadd.f32 %v231_v14, %v184_v11  ;;  %v235_v17 = vadd.f32 %v234_v15, %v189_v13 }
  0x93   : > { %244 = vst.msk [vmem:[%s170_s10] sm:$0xff] %vm243_vm1, %v232_v16 }
  0x94   : > { %245 = vst.msk [vmem:[%s170_s10 + $0x8] sm:$0xff] %vm243_vm1, %v235_v17 }
  0x97   : > { %v237_v19 = vpop.f32.mrf.mxu2  ;;  %v240_v20 = vpop.f32.mrf.mxu3 }
  0x98   : > { %v238_v21 = vadd.f32 %v237_v19, %v194_v12  ;;  %v241_v22 = vadd.f32 %v240_v20, %v199_v18 }
  0x9a   : > { %246 = vst.msk [vmem:[%s170_s10 + $0x10] sm:$0xff] %vm243_vm1, %v238_v21 }
  0x9b   : > { %247 = vst.msk [vmem:[%s170_s10 + $0x18] sm:$0xff] %vm243_vm1, %v241_v22 }
  0x9c PF: > { %s13_s12 = sadd.s32 1, %s343_s12  }
  0x9d   : > { %p10_p4 = scmp.ge.s32.totalorder %s13_s12, 4  }
  0x9f   :  { %12 = sbr.rel (!%p10_p4) target bundleno = 1 (0x1), region = 62 }

// kernel: decoder_forward_pallas.9
= control target key start
LH: loop header
LB: loop body
LE: loop exit
PB: predicated region body
PF: predicated region fallthrough
CT: control target
= control target key end

     0   :  { %s945_s12 = smov 0   ;;  %s1079_s0 = inlined_call_operand.vmem [shape: f32[2,16,64], index: 0, kind: input, shape index: {}]   ;;  %s1080_s1 = inlined_call_operand.vmem [shape: f32[9,16,16], index: 1, kind: input, shape index: {}]   ;;  %s1081_s2 = inlined_call_operand.vmem [shape: f32[16,1], index: 2, kind: input, shape index: {}]   ;;  %s1082_s3 = inlined_call_operand.vmem [shape: f32[2,16,64], index: 3, kind: output, shape index: {}]  }
   0x1 LB: > { %s810_s13 = sadd.s32 4294967295, %s913_s12   ;;  %p814_p0 = scmp.ge.s32.totalorder %s913_s12, 1  ;;  %s913_s12 = sphi %s945_s12, %s13_s12  }
   0x2   : > { %p137_p1 = scmp.lt.s32.totalorder %s913_s12, 3 }
   0x4   : > { %p138_p2 = pnand %p814_p0, %p137_p1 }
   0x5   : > { %p161_p3 = scmp.lt.s32.totalorder (!%p138_p2), %s810_s13, 1  ;;  %s916_s26 = smov (!%p138_p2), 127  }
   0x6   : > { %141 = sbr.rel (%p138_p2) target bundleno = 410 (0x19a), region = 32  ;;  %s917_s27 = smov (!%p138_p2), 119  }
   0x7   : > { %s918_s30 = smov (!%p138_p2), 120   ;;  %s919_s8 = smov (!%p138_p2), 121  }
   0x8   : > { %s921_s22 = smov (!%p138_p2), 9   ;;  %s922_s4 = smov (!%p138_p2), 8  }
   0x9   : > { %s923_s5 = smov (!%p138_p2), 7   ;;  %s924_s10 = smov (!%p138_p2), 1  }
   0xb   : > { %v174_v0 = vlaneseq  ;;  %s1084_s13 = smov (!%p161_p3, %s810_s13), 1  ;;  %v194_v5 = vld [vmem:[%s1080_s1] sm:$0xff]  ;;  %vm198_vm0 = vcmask 130048   ;;  %v195_v6 = vld [vmem:[%s1080_s1 + $0x8] sm:$0xff]  ;;  %v831_v8 = vld [vmem:[%s1080_s1 + $0x30] sm:$0xff]  ;;  %v915_v10 = vmov 0.0  }
   0xc   : > { %s859_s14 = sshll.u32 %s1084_s13, 4  ;;  %v827_v7 = vld [vmem:[%s1080_s1 + $0x20] sm:$0xff]  ;;  %v823_v12 = vld [vmem:[%s1080_s1 + $0x10] sm:$0xff]  ;;  %v828_v13 = vld [vmem:[%s1080_s1 + $0x28] sm:$0xff]  ;;  %v920_v23 = vmov 0   ;;  %vm171_vm3 = vcmask 523264  }
   0xd   : > { %v175_v1 = vand.u32 127, %v174_v0  ;;  %s165_s17 = scalar_lea.vmem %s1079_s0, %s859_s14  ;;  %v832_v14 = vld [vmem:[%s1080_s1 + $0x38] sm:$0xff]  ;;  %v835_v17 = vld [vmem:[%s1080_s1 + $0x40] sm:$0xff]  ;;  %v836_v19 = vld [vmem:[%s1080_s1 + $0x48] sm:$0xff]  ;;  %901 = vset.pattern.permute.xlu0 %v920_v23  ;;  %902 = vset.pattern.permute.xlu1 %v920_v23  ;;  %173 = vst.msk [vmem:[#allocation2 + $0x8] sm:$0xff] %vm171_vm3, %v915_v10  ;;  %vm246_vm4 = vcmask 523336   ;;  %s170_s20 = scalar_lea.vmem %s1082_s3, %s859_s14 }
   0xe   : > { %v197_v3 = vld [vmem:[%s165_s17 + $0x8] sm:$0xff]  ;;  %v196_v4 = vld [vmem:[%s165_s17] sm:$0xff]  ;;  %v824_v16 = vld [vmem:[%s1080_s1 + $0x18] sm:$0xff]  ;;  %172 = vst.msk [vmem:[#allocation2] sm:$0xff] %vm171_vm3, %v915_v10  ;;  %vm295_vm5 = vcmask 523328   ;;  %vm350_vm6 = vcmask 523320  }
   0xf   : > { %v180_v2 = vand.u32 7, %v175_v1  ;;  %219 = vmatpush.msra.mxu0 %v197_v3  ;;  %861 = vmatpush.msra.mxu1 %v197_v3  ;;  %v881_v9 = vpack.i.bf16 %v196_v4, %v197_v3  ;;  %v839_v26 = vld [vmem:[%s1080_s1 + $0x50] sm:$0xff]  ;;  %v843_v38 = vld [vmem:[%s1080_s1 + $0x60] sm:$0xff]  ;;  %v840_v39 = vld [vmem:[%s1080_s1 + $0x58] sm:$0xff]  ;;  %vm404_vm7 = vcmask 523272   ;;  %vm495_vm8 = vcmask 515072  }
  0x10   : > { %323 = vmatpush.msra.mxu2 %v197_v3  ;;  %378 = vmatpush.msra.mxu3 %v197_v3  ;;  %v847_v27 = vld [vmem:[%s1080_s1 + $0x70] sm:$0xff]  ;;  %v848_v41 = vld [vmem:[%s1080_s1 + $0x78] sm:$0xff]  ;;  %v851_v43 = vld [vmem:[%s1080_s1 + $0x80] sm:$0xff]  ;;  %vm546_vm9 = vcmask 465920   ;;  %vm595_vm10 = vcmask 457728   ;;  %vm646_vm11 = vcmask 449536  }
  0x11   : > { %vm188_vm1 = vcmp.ge.s32.totalorder %v180_v2, 1  ;;  %220 = vmatpush.msra.mxu0 %v196_v4  ;;  %862 = vmatpush.msra.mxu1 %v196_v4  ;;  %vm191_vm2 = vcmp.le.s32.totalorder %v180_v2, 6  ;;  %v844_v48 = vld [vmem:[%s1080_s1 + $0x68] sm:$0xff]  ;;  %v651_v57 = vld [vmem:[%s1081_s2] sm:$0xff] }
  0x12   : > { %821 = vmatmul.msk.f32.vlgmr.msra.gmra.mxu0 %vm198_vm0, %v194_v5  ;;  %822 = vmatmul.msk.f32.vlgmr.msra.gmra.mxu1 %vm198_vm0, %v195_v6  ;;  %v975_v11 = vsel %vm188_vm1, 1.0, %v915_v10  ;;  %v990_v15 = vsel %vm191_vm2, 1.0, %v915_v10  ;;  %v852_v49 = vld [vmem:[%s1080_s1 + $0x88] sm:$0xff] }
  0x13   : > { %274 = vmatpush.msrb.mxu1 %v197_v3  ;;  %324 = vmatpush.msra.mxu2 %v196_v4  ;;  %v652_v58 = vld [vmem:[%s1081_s2 + $0x8] sm:$0xff] }
  0x14   : > { %829 = vmatmul.msk.f32.vlgmr.msra.gmra.mxu2 %vm198_vm0, %v827_v7  ;;  %379 = vmatpush.msra.mxu3 %v196_v4  ;;  %v235_v59 = vld [vmem:[#allocation2 + $0x8] sm:$0xff] }
  0x15   : > { %275 = vmatpush.msrb.mxu1 %v196_v4  ;;  %833 = vmatmul.msk.f32.vlgmr.msra.gmra.mxu3 %vm198_vm0, %v831_v8  ;;  %v234_v62 = vld [vmem:[#allocation2] sm:$0xff] }
  0x16   : > { %882 = vrot.lane.b32.xlu0 %v881_v9, %s916_s26  ;;  %229 = vrot.lane.b32.xlu2 %v975_v11, %s917_s27 }
  0x17   : > { %892 = vrot.lane.b32.xlu1 %v881_v9, %s918_s30  ;;  %432 = vmatpush.msrb.mxu0 %v197_v3 }
  0x19   : > { %433 = vmatpush.msrb.mxu0 %v196_v4 }
  0x1a   : > { %825 = vmatmul.msk.f32.vlgmr.msrb.gmra.mxu1 %vm198_vm0, %v823_v12  ;;  %837 = vmatmul.msk.f32.vlgmr.msrb.gmra.mxu0 %vm198_vm0, %v835_v17 }
  0x1c   : > { %830 = vmatmul.msk.f32.gmra.mxu2 %vm198_vm0, %v828_v13 }
  0x1d   : > { %834 = vmatmul.msk.f32.gmra.mxu3 %vm198_vm0, %v832_v14 }
  0x1e   : > { %887 = vrot.lane.b32.xlu0 %v881_v9, %s919_s8  ;;  %333 = vrot.lane.b32.xlu2 %v990_v15, %s919_s8 }
  0x1f   : > { %897 = vrot.lane.b32.xlu1 %v881_v9, %s917_s27 }
  0x22   : > { %826 = vmatmul.msk.f32.gmra.mxu1 %vm198_vm0, %v824_v16  ;;  %838 = vmatmul.msk.f32.gmra.mxu0 %vm198_vm0, %v836_v19 }
  0x26   : > { %387 = vrot.lane.b32.xlu0 %v975_v11, %s916_s26 }
  0x70   : > { %v230_v28 = vpop.permute.xlu2 %229 }
  0x78   : > { %v334_v42 = vpop.permute.xlu2 %333 }
  0x88   : > { %v883_v18 = vpop.permute.xlu0 %882 }
  0x89   : > { %v885_v20 = vunpack.i.h.bf16 %v883_v18  ;;  %v884_v21 = vunpack.i.l.bf16 %v883_v18  ;;  %v893_v22 = vpop.permute.xlu1 %892 }
  0x8a   : > { %v894_v24 = vunpack.i.l.bf16 %v893_v22  ;;  %v895_v25 = vunpack.i.h.bf16 %v893_v22 }
  0x8b   : > { %480 = vmatpush.msra.mxu1 %v884_v21 }
  0x8c   : > { %582 = vmatpush.msrb.mxu3 %v894_v24 }
  0x8d   : > { %481 = vmatpush.msra.mxu1 %v885_v20 }
  0x8e   : > { %841 = vmatmul.msk.f32.vlgmr.msra.gmra.mxu1 %vm198_vm0, %v839_v26  ;;  %583 = vmatpush.msrb.mxu3 %v895_v25 }
  0x8f   : > { %v222_v29 = vpop.f32.mrf.mxu0  ;;  %v225_v30 = vpop.f32.mrf.mxu1  ;;  %849 = vmatmul.msk.f32.vlgmr.msrb.gmra.mxu3 %vm198_vm0, %v847_v27 }
  0x90   : > { %v232_v31 = vmul.f32 %v230_v28, %v222_v29  ;;  %v233_v32 = vmul.f32 %v230_v28, %v225_v30  ;;  %v888_v33 = vpop.permute.xlu0 %887 }
  0x91   : > { %v889_v34 = vunpack.i.l.bf16 %v888_v33  ;;  %v890_v35 = vunpack.i.h.bf16 %v888_v33  ;;  %v898_v36 = vpop.permute.xlu1 %897 }
  0x92   : > { %240 = vrot.lane.b32.xlu2 %v233_v32, %s921_s22  ;;  %238 = vrot.lane.b32.xlu1 %v232_v31, %s921_s22  ;;  %v899_v37 = vunpack.i.l.bf16 %v898_v36  ;;  %v900_v40 = vunpack.i.h.bf16 %v898_v36 }
  0x93   : > { %531 = vmatpush.msrb.mxu2 %v889_v34 }
  0x94   : > { %631 = vmatpush.msra.mxu0 %v899_v37 }
  0x95   : > { %532 = vmatpush.msrb.mxu2 %v890_v35 }
  0x96   : > { %845 = vmatmul.msk.f32.vlgmr.msrb.gmra.mxu2 %vm198_vm0, %v843_v38  ;;  %842 = vmatmul.msk.f32.gmra.mxu1 %vm198_vm0, %v840_v39 }
  0x97   : > { %v277_v44 = vpop.f32.mrf.mxu1  ;;  %v326_v45 = vpop.f32.mrf.mxu2  ;;  %632 = vmatpush.msra.mxu0 %v900_v40  ;;  %850 = vmatmul.msk.f32.gmra.mxu3 %vm198_vm0, %v848_v41 }
  0x98   : > { %287 = vrot.lane.b32.xlu0 %v277_v44, %s922_s4  ;;  %v336_v46 = vmul.f32 %v334_v42, %v326_v45  ;;  %v381_v47 = vpop.f32.mrf.mxu3  ;;  %853 = vmatmul.msk.f32.vlgmr.msra.gmra.mxu0 %vm198_vm0, %v851_v43  ;;  %v388_v53 = vpop.permute.xlu0 %387 }
  0x99   : > { %v390_v56 = vmul.f32 %v388_v53, %v381_v47  ;;  %v435_v18 = vpop.f32.mrf.mxu0 }
  0x9a   : > { %342 = vrot.lane.b32.xlu2 %v336_v46, %s923_s5 }
  0x9e   : > { %846 = vmatmul.msk.f32.gmra.mxu2 %vm198_vm0, %v844_v48 }
  0x9f   : > { %v280_v50 = vpop.f32.mrf.mxu1  ;;  %v329_v51 = vpop.f32.mrf.mxu2 }
  0xa0   : > { %289 = vrot.lane.b32.xlu1 %v280_v50, %s922_s4  ;;  %v337_v52 = vmul.f32 %v334_v42, %v329_v51  ;;  %v384_v54 = vpop.f32.mrf.mxu3  ;;  %854 = vmatmul.msk.f32.gmra.mxu0 %vm198_vm0, %v852_v49 }
  0xa1   : > { %v391_v55 = vmul.f32 %v388_v53, %v384_v54  ;;  %v438_v25 = vpop.f32.mrf.mxu0 }
  0xa2   : > { %344 = vrot.lane.b32.xlu0 %v337_v52, %s923_s5 }
  0xa3   : > { %398 = vrot.lane.b32.xlu2 %v391_v55, %s924_s10 }
  0xa8   : > { %396 = vrot.lane.b32.xlu1 %v390_v56, %s924_s10 }
  0xaa   : > { %655 = vperm.xlu0 %901, %v651_v57  }
  0xb0   : > { %660 = vperm.xlu1 %902, %v652_v58  }
  0xec   : > { %v241_v60 = vpop.permute.xlu2 %240 }
  0xed   : > { %v245_v61 = vadd.f32 %v241_v60, %v235_v59 }
  0xef   : > { %248 = vst.msk [vmem:[#allocation2 + $0x8] sm:$0xff] %vm246_vm4, %v245_v61 }
  0xf4   : > { %v343_v7 = vpop.permute.xlu2 %342 }
  0xf6   : > { %v284_v4 = vld [vmem:[#allocation2 + $0x8] sm:$0xff] }
  0xfd   : > { %v399_v19 = vpop.permute.xlu2 %398 }
 0x104   : > { %v239_v63 = vpop.permute.xlu1 %238 }
 0x105   : > { %v244_v0 = vadd.f32 %v239_v63, %v234_v62 }
 0x107   : > { %247 = vst.msk [vmem:[#allocation2] sm:$0xff] %vm246_vm4, %v244_v0 }
 0x10a   : > { %v288_v1 = vpop.permute.xlu0 %287 }
 0x10b   : > { %v483_v22 = vpop.f32.mrf.mxu1 }
 0x10c   : > { %v489_v30 = vmul.f32 %v990_v15, %v483_v22 }
 0x10e   : > { %v283_v2 = vld [vmem:[#allocation2] sm:$0xff] }
 0x10f   : > { %v293_v3 = vadd.f32 %v288_v1, %v283_v2 }
 0x111   : > { %296 = vst.msk [vmem:[#allocation2] sm:$0xff] %vm295_vm5, %v293_v3 }
 0x112   : > { %v290_v5 = vpop.permute.xlu1 %289  ;;  %v585_v41 = vpop.f32.mrf.mxu3 }
 0x113   : > { %v294_v6 = vadd.f32 %v290_v5, %v284_v4  ;;  %v486_v28 = vpop.f32.mrf.mxu1 }
 0x114   : > { %v345_v10 = vpop.permute.xlu0 %344  ;;  %v490_v33 = vmul.f32 %v990_v15, %v486_v28 }
 0x115   : > { %297 = vst.msk [vmem:[#allocation2 + $0x8] sm:$0xff] %vm295_vm5, %v294_v6  ;;  %v634_v44 = vpop.f32.mrf.mxu0 }
 0x116   : > { %v640_v51 = vmul.f32 %v990_v15, %v634_v44 }
 0x118   : > { %v338_v8 = vld [vmem:[#allocation2] sm:$0xff] }
 0x119   : > { %v348_v9 = vadd.f32 %v343_v7, %v338_v8  ;;  %v534_v29 = vpop.f32.mrf.mxu2 }
 0x11a   : > { %v397_v14 = vpop.permute.xlu1 %396  ;;  %v540_v37 = vmul.f32 %v975_v11, %v534_v29  ;;  %v588_v47 = vpop.f32.mrf.mxu3 }
 0x11b   : > { %351 = vst.msk [vmem:[#allocation2] sm:$0xff] %vm350_vm6, %v348_v9 }
 0x11c   : > { %v339_v12 = vld [vmem:[#allocation2 + $0x8] sm:$0xff]  ;;  %v656_v56 = vpop.permute.xlu0 %655 }
 0x11d   : > { %v349_v13 = vadd.f32 %v345_v10, %v339_v12  ;;  %v637_v50 = vpop.f32.mrf.mxu0 }
 0x11e   : > { %v641_v53 = vmul.f32 %v990_v15, %v637_v50 }
 0x11f   : > { %352 = vst.msk [vmem:[#allocation2 + $0x8] sm:$0xff] %vm350_vm6, %v349_v13 }
 0x121   : > { %v537_v36 = vpop.f32.mrf.mxu2 }
 0x122   : > { %v392_v16 = vld [vmem:[#allocation2] sm:$0xff]  ;;  %v541_v40 = vmul.f32 %v975_v11, %v537_v36  ;;  %v661_v59 = vpop.permute.xlu1 %660 }
 0x123   : > { %v402_v17 = vadd.f32 %v397_v14, %v392_v16 }
 0x125   : > { %405 = vst.msk [vmem:[#allocation2] sm:$0xff] %vm404_vm7, %v402_v17 }
 0x126   : > { %v393_v20 = vld [vmem:[#allocation2 + $0x8] sm:$0xff] }
 0x127   : > { %v403_v21 = vadd.f32 %v399_v19, %v393_v20 }
 0x129   : > { %406 = vst.msk [vmem:[#allocation2 + $0x8] sm:$0xff] %vm404_vm7, %v403_v21 }
 0x12c   : > { %v441_v23 = vld [vmem:[#allocation2] sm:$0xff] }
 0x12d   : > { %v443_v24 = vadd.f32 %v441_v23, %v435_v18 }
 0x12f   : > { %445 = vst.msk [vmem:[#allocation2] sm:$0xff] %vm171_vm3, %v443_v24 }
 0x130   : > { %v442_v26 = vld [vmem:[#allocation2 + $0x8] sm:$0xff] }
 0x131   : > { %v444_v27 = vadd.f32 %v442_v26, %v438_v25 }
 0x133   : > { %446 = vst.msk [vmem:[#allocation2 + $0x8] sm:$0xff] %vm171_vm3, %v444_v27 }
 0x136   : > { %v491_v31 = vld [vmem:[#allocation2] sm:$0xff] }
 0x137   : > { %v493_v32 = vadd.f32 %v491_v31, %v489_v30 }
 0x139   : > { %496 = vst.msk [vmem:[#allocation2] sm:$0xff] %vm495_vm8, %v493_v32 }
 0x13a   : > { %v492_v34 = vld [vmem:[#allocation2 + $0x8] sm:$0xff] }
 0x13b   : > { %v494_v35 = vadd.f32 %v492_v34, %v490_v33 }
 0x13d   : > { %497 = vst.msk [vmem:[#allocation2 + $0x8] sm:$0xff] %vm495_vm8, %v494_v35 }
 0x140   : > { %v542_v38 = vld [vmem:[#allocation2] sm:$0xff] }
 0x141   : > { %v544_v39 = vadd.f32 %v542_v38, %v540_v37 }
 0x143   : > { %547 = vst.msk [vmem:[#allocation2] sm:$0xff] %vm546_vm9, %v544_v39 }
 0x144   : > { %v543_v42 = vld [vmem:[#allocation2 + $0x8] sm:$0xff] }
 0x145   : > { %v545_v43 = vadd.f32 %v543_v42, %v541_v40 }
 0x147   : > { %548 = vst.msk [vmem:[#allocation2 + $0x8] sm:$0xff] %vm546_vm9, %v545_v43 }
 0x14a   : > { %v591_v45 = vld [vmem:[#allocation2] sm:$0xff] }
 0x14b   : > { %v593_v46 = vadd.f32 %v591_v45, %v585_v41 }
 0x14d   : > { %596 = vst.msk [vmem:[#allocation2] sm:$0xff] %vm595_vm10, %v593_v46 }
 0x14e   : > { %v592_v48 = vld [vmem:[#allocation2 + $0x8] sm:$0xff] }
 0x14f   : > { %v594_v49 = vadd.f32 %v592_v48, %v588_v47 }
 0x151   : > { %597 = vst.msk [vmem:[#allocation2 + $0x8] sm:$0xff] %vm595_vm10, %v594_v49 }
 0x154   : > { %v642_v52 = vld [vmem:[#allocation2] sm:$0xff] }
 0x155   : > { %v644_v11 = vadd.f32 %v642_v52, %v640_v51 }
 0x157   : > { %647 = vst.msk [vmem:[#allocation2] sm:$0xff] %vm646_vm11, %v644_v11 }
 0x158   : > { %v643_v54 = vld [vmem:[#allocation2 + $0x8] sm:$0xff] }
 0x159   : > { %v645_v55 = vadd.f32 %v643_v54, %v641_v53 }
 0x15b   : > { %648 = vst.msk [vmem:[#allocation2 + $0x8] sm:$0xff] %vm646_vm11, %v645_v55 }
 0x15e   : > { %v649_v57 = vld [vmem:[#allocation2] sm:$0xff] }
 0x15f   : > { %v1056_v58 = vadd.f32 %v656_v56, %v649_v57 }
 0x161   : > { %v667_v60 = vmul.f32 0.70710677, %v1056_v58 }
 0x162   : > { %v650_v61 = vld [vmem:[#allocation2 + $0x8] sm:$0xff] }
 0x163   : > { %v669_v62 = vmul.f32 %v667_v60, %v667_v60  ;;  %v1059_v63 = vadd.f32 %v661_v59, %v650_v61 }
 0x165   : > { %v670_v0 = vmin.f32 %v669_v62, 16.0  ;;  %v1062_v1 = vmul.f32 0.70710677, %v1059_v63 }
 0x167   : > { %v671_v15 = vmul.f32 2.1237322e-06, %v670_v0  ;;  %v682_v2 = vmul.f32 3.8918573e-05, %v670_v0  ;;  %v709_v3 = vmul.f32 %v1062_v1, %v1062_v1 }
 0x169   : > { %v672_v4 = vadd.f32 0.00028619796, %v671_v15  ;;  %v683_v5 = vadd.f32 0.001143296, %v682_v2  ;;  %v710_v6 = vmin.f32 %v709_v3, 16.0 }
 0x16b   : > { %v673_v7 = vmul.f32 %v672_v4, %v670_v0  ;;  %v684_v8 = vmul.f32 %v683_v5, %v670_v0  ;;  %v711_v9 = vmul.f32 2.1237322e-06, %v710_v6  ;;  %v722_v10 = vmul.f32 3.8918573e-05, %v710_v6 }
 0x16c   : > { %v665_v5 = vmul.f32 0.5, %v1056_v58 }
 0x16d   : > { %v674_v12 = vadd.f32 0.0036580483, %v673_v7  ;;  %v685_v13 = vadd.f32 0.014752088, %v684_v8  ;;  %v712_v14 = vadd.f32 0.00028619796, %v711_v9 }
 0x16e   : > { %v723_v16 = vadd.f32 0.001143296, %v722_v10 }
 0x16f   : > { %v686_v17 = vmul.f32 %v685_v13, %v670_v0  ;;  %v713_v18 = vmul.f32 %v712_v14, %v710_v6  ;;  %v675_v20 = vmul.f32 %v674_v12, %v670_v0  ;;  %v666_v12 = vmul.f32 0.5, %v1059_v63 }
 0x170   : > { %v724_v19 = vmul.f32 %v723_v16, %v710_v6 }
 0x171   : > { %v687_v21 = vadd.f32 0.112945676, %v686_v17  ;;  %v714_v22 = vadd.f32 0.0036580483, %v713_v18  ;;  %v676_v26 = vadd.f32 0.05243302, %v675_v20 }
 0x172   : > { %v725_v23 = vadd.f32 0.014752088, %v724_v19 }
 0x173   : > { %v688_v24 = vmul.f32 %v687_v21, %v670_v0  ;;  %v715_v28 = vmul.f32 %v714_v22, %v710_v6  ;;  %v677_v32 = vmul.f32 %v676_v26, %v670_v0 }
 0x174   : > { %v726_v25 = vmul.f32 %v725_v23, %v710_v6 }
 0x175   : > { %v689_v27 = vadd.f32 0.4994258, %v688_v24  ;;  %v716_v34 = vadd.f32 0.05243302, %v715_v28  ;;  %v678_v37 = vadd.f32 0.18741608, %v677_v32 }
 0x176   : > { %v727_v29 = vadd.f32 0.112945676, %v726_v25 }
 0x177   : > { %v690_v30 = vmul.f32 %v689_v27, %v670_v0  ;;  %v717_v38 = vmul.f32 %v716_v34, %v710_v6  ;;  %v679_v41 = vmul.f32 %v678_v37, %v670_v0 }
 0x178   : > { %v728_v31 = vmul.f32 %v727_v29, %v710_v6 }
 0x179   : > { %v691_v33 = vadd.f32 1.0, %v690_v30  ;;  %v718_v43 = vadd.f32 0.18741608, %v717_v38  ;;  %v680_v45 = vadd.f32 1.1283791, %v679_v41 }
 0x17a   : > { %v729_v35 = vadd.f32 0.4994258, %v728_v31 }
 0x17b   : > { %903 = vrcp.f32 %v691_v33  ;;  %v703_v46 = vand.u32 2147483648, %v691_v33  ;;  %v701_v49 = vand.u32 2147483647, %v691_v33  ;;  %v719_v50 = vmul.f32 %v718_v43, %v710_v6 }
 0x17c   : > { %v730_v36 = vmul.f32 %v729_v35, %v710_v6  ;;  %vm697_vm13 = vweird.f32 %v691_v33  ;;  %v681_v11 = vmul.f32 %v680_v45, %v667_v60 }
 0x17d   : > { %v704_v53 = vor.u32 1.1754944e-38, %v703_v46  ;;  %vm702_vm15 = vcmp.eq.f32.partialorder %v701_v49, 8.507059e+37  ;;  %v720_v56 = vadd.f32 1.1283791, %v719_v50 }
 0x17e   : > { %v731_v39 = vadd.f32 1.0, %v730_v36 }
 0x17f   : > { %v721_v60 = vmul.f32 %v720_v56, %v1062_v1 }
 0x180   : > { %905 = vrcp.f32 %v731_v39  ;;  %v743_v57 = vand.u32 2147483648, %v731_v39  ;;  %v741_v62 = vand.u32 2147483647, %v731_v39  ;;  %vm737_vm1 = vweird.f32 %v731_v39 }
 0x181   : > { %v904_v40 = vpop.eup %903 }
 0x182   : > { %v693_v42 = vmul.f32 %v904_v40, %v691_v33  ;;  %vm698_vm12 = vweird.f32 %v904_v40  ;;  %v744_v3 = vor.u32 1.1754944e-38, %v743_v57  ;;  %vm742_vm4 = vcmp.eq.f32.partialorder %v741_v62, 8.507059e+37 }
 0x183   : > { %vm699_vm14 = vmor %vm697_vm13, %vm698_vm12 }
 0x184   : > { %v694_v44 = vsub.f32 1.0, %v693_v42 }
 0x186   : > { %v906_v47 = vpop.eup %905  ;;  %v695_v48 = vmul.f32 %v904_v40, %v694_v44 }
 0x187   : > { %v733_v51 = vmul.f32 %v906_v47, %v731_v39  ;;  %vm738_vm0 = vweird.f32 %v906_v47 }
 0x188   : > { %v696_v52 = vadd.f32 %v904_v40, %v695_v48  ;;  %vm739_vm2 = vmor %vm737_vm1, %vm738_vm0 }
 0x189   : > { %v734_v54 = vsub.f32 1.0, %v733_v51 }
 0x18a   : > { %v700_v55 = vsel %vm699_vm14, %v904_v40, %v696_v52 }
 0x18b   : > { %v705_v59 = vsel %vm702_vm15, %v704_v53, %v700_v55  ;;  %v735_v61 = vmul.f32 %v906_v47, %v734_v54 }
 0x18c   : > { %v706_v0 = vmul.f32 %v705_v59, %v681_v11 }
 0x18d   : > { %v736_v15 = vadd.f32 %v906_v47, %v735_v61 }
 0x18e   : > { %v855_v2 = vclamps-f32 %v706_v0, 1.0 }
 0x18f   : > { %v740_v4 = vsel %vm739_vm2, %v906_v47, %v736_v15 }
 0x190   : > { %v749_v6 = vadd.f32 1.0, %v855_v2  ;;  %v745_v7 = vsel %vm742_vm4, %v744_v3, %v740_v4 }
 0x191   : > { %v746_v8 = vmul.f32 %v745_v7, %v721_v60 }
 0x192   : > { %v751_v9 = vmul.f32 %v749_v6, %v665_v5 }
 0x193   : > { %v856_v10 = vclamps-f32 %v746_v8, 1.0 }
 0x194   : > { %753 = vst.msk [vmem:[%s170_s20] sm:$0xff] %vm171_vm3, %v751_v9 }
 0x195   : > { %v750_v13 = vadd.f32 1.0, %v856_v10 }
 0x197   : > { %v752_v1 = vmul.f32 %v750_v13, %v666_v12 }
 0x199   : > { %754 = vst.msk [vmem:[%s170_s20 + $0x8] sm:$0xff] %vm171_vm3, %v752_v1 }
 0x19a PF: > { %s13_s12 = sadd.s32 1, %s913_s12  }
 0x19b   : > { %p10_p4 = scmp.ge.s32.totalorder %s13_s12, 4  }
 0x19d   :  { %12 = sbr.rel (!%p10_p4) target bundleno = 1 (0x1), region = 70 }

// kernel: decoder_forward_pallas.8
= control target key start
LH: loop header
LB: loop body
LE: loop exit
PB: predicated region body
PF: predicated region fallthrough
CT: control target
= control target key end

     0   :  { %s1535_s18 = smov 0   ;;  %s1863_s0 = inlined_call_operand.vmem [shape: f32[2,16,64], index: 0, kind: input, shape index: {}]   ;;  %s1864_s1 = inlined_call_operand.vmem [shape: f32[2,16,64], index: 1, kind: input, shape index: {}]   ;;  %s1865_s2 = inlined_call_operand.vmem [shape: f32[9,16,16], index: 2, kind: input, shape index: {}]   ;;  %s1866_s3 = inlined_call_operand.vmem [shape: f32[9,16,16], index: 3, kind: input, shape index: {}]   ;;  %s1867_s4 = inlined_call_operand.vmem [shape: f32[16,1], index: 4, kind: input, shape index: {}]   ;;  %s1868_s5 = inlined_call_operand.vmem [shape: f32[2,16,64], index: 5, kind: output, shape index: {}]  }
   0x1 LB: > { %s1331_s19 = sadd.s32 4294967295, %s1493_s18   ;;  %p1335_p0 = scmp.ge.s32.totalorder %s1493_s18, 1  ;;  %s1493_s18 = sphi %s1535_s18, %s15_s18  }
   0x2   : > { %p197_p1 = scmp.lt.s32.totalorder %s1493_s18, 3 }
   0x4   : > { %p198_p2 = pnand %p1335_p0, %p197_p1 }
   0x5   : > { %p230_p3 = scmp.lt.s32.totalorder (!%p198_p2), %s1331_s19, 1  ;;  %s1495_s28 = smov (!%p198_p2), 120  }
   0x6   : > { %201 = sbr.rel (%p198_p2) target bundleno = 551 (0x227), region = 40  ;;  %s1496_s29 = smov (!%p198_p2), 127  }
   0x7   : > { %s1498_s16 = smov (!%p198_p2), 119   ;;  %s1499_s17 = smov (!%p198_p2), 121  }
   0x8   : > { %s1500_s25 = smov (!%p198_p2), 9   ;;  %s1501_s10 = smov (!%p198_p2), 8  }
   0x9   : > { %s1502_s13 = smov (!%p198_p2), 7   ;;  %s1503_s21 = smov (!%p198_p2), 1  }
   0xb   : > { %v248_v0 = vlaneseq  ;;  %s1870_s19 = smov (!%p230_p3, %s1331_s19), 1  ;;  %v269_v5 = vld [vmem:[%s1865_s2 + $0x8] sm:$0xff]  ;;  %vm272_vm0 = vcmask 130048   ;;  %v1347_v6 = vld [vmem:[%s1865_s2 + $0x18] sm:$0xff]  ;;  %v268_v8 = vld [vmem:[%s1865_s2] sm:$0xff]  ;;  %v1497_v10 = vmov 0.0  }
   0xc   : > { %s1543_s20 = sshll.u32 %s1870_s19, 4  ;;  %v1346_v9 = vld [vmem:[%s1865_s2 + $0x10] sm:$0xff]  ;;  %v1350_v12 = vld [vmem:[%s1865_s2 + $0x20] sm:$0xff]  ;;  %v1351_v18 = vld [vmem:[%s1865_s2 + $0x28] sm:$0xff]  ;;  %vm245_vm3 = vcmask 523264   ;;  %vm320_vm4 = vcmask 523336  }
   0xd   : > { %v249_v1 = vand.u32 127, %v248_v0  ;;  %s234_s23 = scalar_lea.vmem %s1863_s0, %s1543_s20  ;;  %s239_s11 = scalar_lea.vmem %s1864_s1, %s1543_s20  ;;  %v1354_v13 = vld [vmem:[%s1865_s2 + $0x30] sm:$0xff]  ;;  %v1358_v15 = vld [vmem:[%s1865_s2 + $0x40] sm:$0xff]  ;;  %v1355_v19 = vld [vmem:[%s1865_s2 + $0x38] sm:$0xff]  ;;  %246 = vst.msk [vmem:[#allocation2] sm:$0xff] %vm245_vm3, %v1497_v10  ;;  %vm369_vm5 = vcmask 523328  }
   0xe   : > { %v271_v2 = vld [vmem:[%s234_s23 + $0x8] sm:$0xff]  ;;  %v626_v3 = vld [vmem:[%s234_s23] sm:$0xff]  ;;  %v1362_v29 = vld [vmem:[%s1865_s2 + $0x50] sm:$0xff]  ;;  %247 = vst.msk [vmem:[#allocation2 + $0x8] sm:$0xff] %vm245_vm3, %v1497_v10  ;;  %vm424_vm6 = vcmask 523320   ;;  %vm478_vm7 = vcmask 523272   ;;  %s244_s23 = scalar_lea.vmem %s1868_s5, %s1543_s20 }
   0xf   : > { %1419 = vmatpush.msra.mxu2 %v271_v2  ;;  %v1451_v4 = vpack.i.bf16 %v626_v3, %v271_v2  ;;  %1421 = vmatpush.msra.mxu3 %v271_v2  ;;  %v254_v7 = vand.u32 7, %v249_v1  ;;  %v964_v14 = vld [vmem:[%s239_s11 + $0x8] sm:$0xff]  ;;  %v963_v21 = vld [vmem:[%s239_s11] sm:$0xff]  ;;  %v1370_v30 = vld [vmem:[%s1865_s2 + $0x70] sm:$0xff]  ;;  %vm569_vm8 = vcmask 515072   ;;  %vm620_vm9 = vcmask 465920  }
  0x10   : > { %293 = vmatpush.msra.mxu0 %v271_v2  ;;  %348 = vmatpush.msra.mxu1 %v271_v2  ;;  %v1359_v20 = vld [vmem:[%s1865_s2 + $0x48] sm:$0xff]  ;;  %v1608_v22 = vpack.i.bf16 %v963_v21, %v964_v14  ;;  %v1363_v37 = vld [vmem:[%s1865_s2 + $0x58] sm:$0xff]  ;;  %v1366_v38 = vld [vmem:[%s1865_s2 + $0x60] sm:$0xff]  ;;  %vm669_vm10 = vcmask 457728   ;;  %vm720_vm11 = vcmask 449536  }
  0x11   : > { %1452 = vrot.lane.b32.xlu1 %v1451_v4, %s1495_s28  ;;  %1442 = vrot.lane.b32.xlu0 %v1451_v4, %s1496_s29  ;;  %vm262_vm1 = vcmp.ge.s32.totalorder %v254_v7, 1  ;;  %vm265_vm2 = vcmp.le.s32.totalorder %v254_v7, 6  ;;  %v1371_v39 = vld [vmem:[%s1865_s2 + $0x78] sm:$0xff]  ;;  %v1374_v40 = vld [vmem:[%s1865_s2 + $0x80] sm:$0xff] }
  0x12   : > { %1420 = vmatpush.msra.mxu2 %v626_v3  ;;  %1422 = vmatpush.msra.mxu3 %v626_v3  ;;  %v1572_v11 = vsel %vm262_vm1, 1.0, %v1497_v10  ;;  %v1589_v16 = vsel %vm265_vm2, 1.0, %v1497_v10  ;;  %v1367_v47 = vld [vmem:[%s1865_s2 + $0x68] sm:$0xff]  ;;  %v723_v50 = vld [vmem:[%s1866_s3] sm:$0xff]  ;;  %v1380_v56 = vld [vmem:[%s1866_s3 + $0x10] sm:$0xff] }
  0x13   : > { %1345 = vmatmul.msk.f32.vlgmr.msra.gmra.mxu2 %vm272_vm0, %v269_v5  ;;  %1349 = vmatmul.msk.f32.vlgmr.msra.gmra.mxu3 %vm272_vm0, %v1347_v6  ;;  %v1461_v17 = vpack.i.bf16 %v964_v14, %v1572_v11  ;;  %v1375_v49 = vld [vmem:[%s1865_s2 + $0x88] sm:$0xff]  ;;  %v1384_v51 = vld [vmem:[%s1866_s3 + $0x20] sm:$0xff]  ;;  %v1388_v59 = vld [vmem:[%s1866_s3 + $0x30] sm:$0xff] }
  0x14   : > { %397 = vmatpush.msrb.mxu2 %v271_v2  ;;  %452 = vmatpush.msrb.mxu3 %v271_v2  ;;  %v724_v58 = vld [vmem:[%s1866_s3 + $0x8] sm:$0xff]  ;;  %v1381_v0 = vld [vmem:[%s1866_s3 + $0x18] sm:$0xff]  ;;  %v308_v10 = vld [vmem:[#allocation2] sm:$0xff] }
  0x15   : > { %294 = vmatpush.msra.mxu0 %v626_v3  ;;  %349 = vmatpush.msra.mxu1 %v626_v3  ;;  %v1385_v60 = vld [vmem:[%s1866_s3 + $0x28] sm:$0xff] }
  0x16   : > { %398 = vmatpush.msrb.mxu2 %v626_v3  ;;  %453 = vmatpush.msrb.mxu3 %v626_v3 }
  0x17   : > { %1344 = vmatmul.msk.f32.vlgmr.msra.gmra.mxu0 %vm272_vm0, %v268_v8  ;;  %1348 = vmatmul.msk.f32.vlgmr.msra.gmra.mxu1 %vm272_vm0, %v1346_v9 }
  0x18   : > { %303 = vrot.lane.b32.xlu2 %v1572_v11, %s1498_s16  ;;  %506 = vmatpush.msrb.mxu0 %v271_v2  ;;  %v1389_v2 = vld [vmem:[%s1866_s3 + $0x38] sm:$0xff] }
  0x19   : > { %1457 = vrot.lane.b32.xlu1 %v1451_v4, %s1498_s16  ;;  %1447 = vrot.lane.b32.xlu0 %v1451_v4, %s1499_s17 }
  0x1a   : > { %507 = vmatpush.msrb.mxu0 %v626_v3 }
  0x1b   : > { %1352 = vmatmul.msk.f32.vlgmr.msrb.gmra.mxu2 %vm272_vm0, %v1350_v12  ;;  %1356 = vmatmul.msk.f32.vlgmr.msrb.gmra.mxu3 %vm272_vm0, %v1354_v13 }
  0x1f   : > { %1360 = vmatmul.msk.f32.vlgmr.msrb.gmra.mxu0 %vm272_vm0, %v1358_v15 }
  0x20   : > { %407 = vrot.lane.b32.xlu2 %v1589_v16, %s1499_s17 }
  0x21   : > { %1462 = vrot.lane.b32.xlu0 %v1461_v17, %s1496_s29  ;;  %967 = vrot.lane.b32.xlu1 %v963_v21, %s1496_s29 }
  0x23   : > { %1353 = vmatmul.msk.f32.gmra.mxu2 %vm272_vm0, %v1351_v18  ;;  %1357 = vmatmul.msk.f32.gmra.mxu3 %vm272_vm0, %v1355_v19 }
  0x27   : > { %1361 = vmatmul.msk.f32.gmra.mxu0 %vm272_vm0, %v1359_v20 }
  0x29   : > { %1467 = vrot.lane.b32.xlu1 %v1608_v22, %s1499_s17 }
  0x72   : > { %v1635_v41 = vpop.permute.xlu2 %303 }
  0x7a   : > { %v1661_v53 = vpop.permute.xlu2 %407 }
  0x83   : > { %v1453_v23 = vpop.permute.xlu1 %1452  ;;  %v1443_v24 = vpop.permute.xlu0 %1442 }
  0x84   : > { %v1455_v25 = vunpack.i.h.bf16 %v1453_v23  ;;  %v1454_v26 = vunpack.i.l.bf16 %v1453_v23  ;;  %v1444_v27 = vunpack.i.l.bf16 %v1443_v24  ;;  %v1445_v28 = vunpack.i.h.bf16 %v1443_v24 }
  0x86   : > { %554 = vmatpush.msrb.mxu1 %v1444_v27  ;;  %656 = vmatpush.msra.mxu3 %v1454_v26 }
  0x88   : > { %555 = vmatpush.msrb.mxu1 %v1445_v28  ;;  %657 = vmatpush.msra.mxu3 %v1455_v25 }
  0x89   : > { %1364 = vmatmul.msk.f32.vlgmr.msrb.gmra.mxu1 %vm272_vm0, %v1362_v29  ;;  %1372 = vmatmul.msk.f32.vlgmr.msra.gmra.mxu3 %vm272_vm0, %v1370_v30 }
  0x8a   : > { %747 = vmatpush.msra.mxu1 %v964_v14  ;;  %845 = vmatpush.msrb.mxu3 %v964_v14 }
  0x8b   : > { %v1458_v31 = vpop.permute.xlu1 %1457  ;;  %v1448_v32 = vpop.permute.xlu0 %1447 }
  0x8c   : > { %v1460_v33 = vunpack.i.h.bf16 %v1458_v31  ;;  %v1459_v34 = vunpack.i.l.bf16 %v1458_v31  ;;  %v1449_v35 = vunpack.i.l.bf16 %v1448_v32  ;;  %748 = vmatpush.msra.mxu1 %v963_v21  ;;  %846 = vmatpush.msrb.mxu3 %v963_v21  ;;  %v1450_v36 = vunpack.i.h.bf16 %v1448_v32 }
  0x8e   : > { %945 = vmatpush.msrb.mxu1 %v964_v14  ;;  %605 = vmatpush.msra.mxu2 %v1449_v35 }
  0x8f   : > { %705 = vmatpush.msra.mxu0 %v1459_v34 }
  0x90   : > { %946 = vmatpush.msrb.mxu1 %v963_v21  ;;  %606 = vmatpush.msra.mxu2 %v1450_v36 }
  0x91   : > { %706 = vmatpush.msra.mxu0 %v1460_v33  ;;  %1365 = vmatmul.msk.f32.gmra.mxu1 %vm272_vm0, %v1363_v37 }
  0x92   : > { %1368 = vmatmul.msk.f32.vlgmr.msra.gmra.mxu2 %vm272_vm0, %v1366_v38  ;;  %1373 = vmatmul.msk.f32.gmra.mxu3 %vm272_vm0, %v1371_v39  ;;  %v1392_v38 = vld [vmem:[%s1866_s3 + $0x40] sm:$0xff] }
  0x93   : > { %1376 = vmatmul.msk.f32.vlgmr.msra.gmra.mxu0 %vm272_vm0, %v1374_v40  ;;  %797 = vmatpush.msrb.mxu2 %v964_v14  ;;  %v1463_v42 = vpop.permute.xlu0 %1462  ;;  %v968_v6 = vpop.permute.xlu1 %967  ;;  %v1396_v40 = vld [vmem:[%s1866_s3 + $0x50] sm:$0xff] }
  0x94   : > { %895 = vmatpush.msrb.mxu0 %v964_v14  ;;  %v296_v43 = vpop.f32.mrf.mxu0  ;;  %v1465_v44 = vunpack.i.h.bf16 %v1463_v42  ;;  %v351_v54 = vpop.f32.mrf.mxu1  ;;  %v1679_v61 = vunpack.i.l.bf16 %v1463_v42 }
  0x95   : > { %798 = vmatpush.msrb.mxu2 %v963_v21  ;;  %v306_v45 = vmul.f32 %v1635_v41, %v296_v43 }
  0x96   : > { %896 = vmatpush.msrb.mxu0 %v963_v21  ;;  %v299_v46 = vpop.f32.mrf.mxu2  ;;  %v354_v52 = vpop.f32.mrf.mxu3  ;;  %v309_v21 = vld [vmem:[#allocation2 + $0x8] sm:$0xff] }
  0x97   : > { %993 = vmatpush.msra.mxu2 %v1465_v44  ;;  %v307_v48 = vmul.f32 %v1635_v41, %v299_v46  ;;  %312 = vrot.lane.b32.xlu2 %v306_v45, %s1500_s25 }
  0x99   : > { %314 = vrot.lane.b32.xlu0 %v307_v48, %s1500_s25  ;;  %1378 = vmatmul.msk.f32.vlgmr.msra.gmra.mxu1 %vm272_vm0, %v723_v50 }
  0x9a   : > { %1369 = vmatmul.msk.f32.gmra.mxu2 %vm272_vm0, %v1367_v47  ;;  %1386 = vmatmul.msk.f32.vlgmr.msrb.gmra.mxu3 %vm272_vm0, %v1384_v51  ;;  %v1393_v51 = vld [vmem:[%s1866_s3 + $0x48] sm:$0xff] }
  0x9b   : > { %1377 = vmatmul.msk.f32.gmra.mxu0 %vm272_vm0, %v1375_v49  ;;  %994 = vmatpush.msra.mxu2 %v968_v6  ;;  %v1468_v7 = vpop.permute.xlu1 %1467 }
  0x9c   : > { %v1470_v8 = vunpack.i.h.bf16 %v1468_v7  ;;  %v1469_v9 = vunpack.i.l.bf16 %v1468_v7  ;;  %v1704_v15 = vpop.f32.mrf.mxu0 }
  0x9e   : > { %v400_v55 = vpop.f32.mrf.mxu2  ;;  %v455_v62 = vpop.f32.mrf.mxu3  ;;  %1043 = vmatpush.msra.mxu3 %v1469_v9 }
  0x9f   : > { %v410_v57 = vmul.f32 %v1661_v53, %v400_v55  ;;  %361 = vrot.lane.b32.xlu2 %v351_v54, %s1501_s10  ;;  %v464_v63 = vmul.f32 %v1679_v61, %v455_v62  ;;  %v1397_v55 = vld [vmem:[%s1866_s3 + $0x58] sm:$0xff]  ;;  %v1401_v62 = vld [vmem:[%s1866_s3 + $0x68] sm:$0xff] }
  0xa0   : > { %1044 = vmatpush.msra.mxu3 %v1470_v8 }
  0xa1   : > { %416 = vrot.lane.b32.xlu1 %v410_v57, %s1502_s13  ;;  %1379 = vmatmul.msk.f32.gmra.mxu1 %vm272_vm0, %v724_v58  ;;  %v1504_v58 = vmov 0  }
  0xa2   : > { %1382 = vmatmul.msk.f32.vlgmr.msrb.gmra.mxu2 %vm272_vm0, %v1380_v56  ;;  %1387 = vmatmul.msk.f32.gmra.mxu3 %vm272_vm0, %v1385_v60 }
  0xa3   : > { %1390 = vmatmul.msk.f32.vlgmr.msrb.gmra.mxu0 %vm272_vm0, %v1388_v59  ;;  %363 = vrot.lane.b32.xlu0 %v354_v52, %s1501_s10  ;;  %v1400_v52 = vld [vmem:[%s1866_s3 + $0x60] sm:$0xff]  ;;  %v1404_v59 = vld [vmem:[%s1866_s3 + $0x70] sm:$0xff] }
  0xa4   : > { %v1707_v19 = vpop.f32.mrf.mxu0  ;;  %1481 = vset.pattern.permute.xlu0 %v1504_v58  ;;  %1482 = vset.pattern.permute.xlu1 %v1504_v58 }
  0xa6   : > { %v403_v1 = vpop.f32.mrf.mxu2  ;;  %v458_v4 = vpop.f32.mrf.mxu3 }
  0xa7   : > { %v411_v3 = vmul.f32 %v1661_v53, %v403_v1  ;;  %v465_v5 = vmul.f32 %v1679_v61, %v458_v4 }
  0xa9   : > { %470 = vrot.lane.b32.xlu1 %v464_v63, %s1503_s21  ;;  %418 = vrot.lane.b32.xlu2 %v411_v3, %s1502_s13 }
  0xaa   : > { %1383 = vmatmul.msk.f32.gmra.mxu2 %vm272_vm0, %v1381_v0  ;;  %1394 = vmatmul.msk.f32.vlgmr.msrb.gmra.mxu1 %vm272_vm0, %v1392_v38 }
  0xab   : > { %1391 = vmatmul.msk.f32.gmra.mxu0 %vm272_vm0, %v1389_v2  ;;  %1472 = vrot.lane.b32.xlu0 %v1608_v22, %s1495_s28 }
  0xac   : > { %1402 = vmatmul.msk.f32.vlgmr.msra.gmra.mxu3 %vm272_vm0, %v1400_v52 }
  0xb1   : > { %472 = vrot.lane.b32.xlu2 %v465_v5, %s1503_s21 }
  0xb2   : > { %1398 = vmatmul.msk.f32.vlgmr.msra.gmra.mxu2 %vm272_vm0, %v1396_v40  ;;  %1395 = vmatmul.msk.f32.gmra.mxu1 %vm272_vm0, %v1393_v51 }
  0xb3   : > { %1477 = vrot.lane.b32.xlu0 %v1608_v22, %s1498_s16 }
  0xb4   : > { %1403 = vmatmul.msk.f32.gmra.mxu3 %vm272_vm0, %v1401_v62 }
  0xba   : > { %1399 = vmatmul.msk.f32.gmra.mxu2 %vm272_vm0, %v1397_v55 }
  0xf1   : > { %v313_v12 = vpop.permute.xlu2 %312 }
  0xf2   : > { %v318_v13 = vadd.f32 %v313_v12, %v308_v10  ;;  %v1405_v10 = vld [vmem:[%s1866_s3 + $0x78] sm:$0xff] }
  0xf4   : > { %321 = vst.msk [vmem:[#allocation2] sm:$0xff] %vm320_vm4, %v318_v13  ;;  %v1408_v13 = vld [vmem:[%s1866_s3 + $0x80] sm:$0xff] }
  0xf9   : > { %v362_v14 = vpop.permute.xlu2 %361 }
  0xfb   : > { %v357_v17 = vld [vmem:[#allocation2] sm:$0xff] }
  0xfc   : > { %v367_v18 = vadd.f32 %v362_v14, %v357_v17 }
  0xfe   : > { %370 = vst.msk [vmem:[#allocation2] sm:$0xff] %vm369_vm5, %v367_v18 }
 0x103   : > { %v419_v44 = vpop.permute.xlu2 %418 }
 0x105   : > { %v412_v27 = vld [vmem:[#allocation2] sm:$0xff] }
 0x106   : > { %v1709_v20 = vpop.f32.mrf.mxu1 }
 0x10b   : > { %v315_v22 = vpop.permute.xlu0 %314  ;;  %v473_v0 = vpop.permute.xlu2 %472 }
 0x10c   : > { %v319_v23 = vadd.f32 %v315_v22, %v309_v21  ;;  %v1711_v24 = vpop.f32.mrf.mxu3  ;;  %v1160_v21 = vld [vmem:[%s1867_s4] sm:$0xff] }
 0x10e   : > { %322 = vst.msk [vmem:[#allocation2 + $0x8] sm:$0xff] %vm320_vm4, %v319_v23  ;;  %v1714_v25 = vpop.f32.mrf.mxu1 }
 0x110   : > { %v1716_v26 = vpop.f32.mrf.mxu0 }
 0x113   : > { %v417_v28 = vpop.permute.xlu1 %416 }
 0x114   : > { %v422_v29 = vadd.f32 %v417_v28, %v412_v27 }
 0x115   : > { %v1718_v30 = vpop.f32.mrf.mxu2  ;;  %v1720_v31 = vpop.f32.mrf.mxu3  ;;  %v358_v32 = vld [vmem:[#allocation2 + $0x8] sm:$0xff] }
 0x116   : > { %v364_v33 = vpop.permute.xlu0 %363  ;;  %425 = vst.msk [vmem:[#allocation2] sm:$0xff] %vm424_vm6, %v422_v29  ;;  %v750_v35 = vpop.f32.mrf.mxu1  ;;  %v614_v28 = vmul.f32 %v1572_v11, %v1718_v30  ;;  %v564_v29 = vmul.f32 %v1589_v16, %v1714_v25  ;;  %v714_v25 = vmul.f32 %v1589_v16, %v1716_v26  ;;  %v1161_v26 = vld [vmem:[%s1867_s4 + $0x8] sm:$0xff] }
 0x117   : > { %v368_v34 = vadd.f32 %v364_v33, %v358_v32  ;;  %v756_v36 = vmul.f32 %v750_v35, %v1635_v41 }
 0x118   : > { %v1725_v37 = vpop.f32.mrf.mxu0 }
 0x119   : > { %371 = vst.msk [vmem:[#allocation2 + $0x8] sm:$0xff] %vm369_vm5, %v368_v34  ;;  %762 = vrot.lane.b32.xlu1 %v756_v36, %s1500_s25 }
 0x11b   : > { %v471_v39 = vpop.permute.xlu1 %470 }
 0x11d   : > { %v1735_v42 = vpop.f32.mrf.mxu2  ;;  %v466_v43 = vld [vmem:[#allocation2] sm:$0xff]  ;;  %v848_v45 = vpop.f32.mrf.mxu3 }
 0x11e   : > { %v476_v46 = vadd.f32 %v471_v39, %v466_v43  ;;  %v753_v47 = vpop.f32.mrf.mxu1  ;;  %v1473_v54 = vpop.permute.xlu0 %1472  ;;  %v854_v1 = vmul.f32 %v848_v45, %v1661_v53  ;;  %v615_v35 = vmul.f32 %v1572_v11, %v1735_v42 }
 0x11f   : > { %v757_v49 = vmul.f32 %v753_v47, %v1635_v41  ;;  %v1475_v56 = vunpack.i.h.bf16 %v1473_v54  ;;  %v1474_v57 = vunpack.i.l.bf16 %v1473_v54 }
 0x120   : > { %v413_v48 = vld [vmem:[#allocation2 + $0x8] sm:$0xff]  ;;  %479 = vst.msk [vmem:[#allocation2] sm:$0xff] %vm478_vm7, %v476_v46  ;;  %v898_v41 = vpop.f32.mrf.mxu0 }
 0x121   : > { %v423_v50 = vadd.f32 %v419_v44, %v413_v48  ;;  %764 = vrot.lane.b32.xlu2 %v757_v49, %s1500_s25  ;;  %1093 = vmatpush.msra.mxu0 %v1474_v57  ;;  %v904_v22 = vmul.f32 %v1679_v61, %v898_v41 }
 0x123   : > { %426 = vst.msk [vmem:[#allocation2 + $0x8] sm:$0xff] %vm424_vm6, %v423_v50  ;;  %1094 = vmatpush.msra.mxu0 %v1475_v56 }
 0x124   : > { %1406 = vmatmul.msk.f32.vlgmr.msra.gmra.mxu0 %vm272_vm0, %v1404_v59 }
 0x125   : > { %v800_v60 = vpop.f32.mrf.mxu2  ;;  %v851_v3 = vpop.f32.mrf.mxu3 }
 0x126   : > { %810 = vrot.lane.b32.xlu0 %v800_v60, %s1501_s10  ;;  %v1478_v4 = vpop.permute.xlu0 %1477  ;;  %v855_v9 = vmul.f32 %v851_v3, %v1661_v53  ;;  %v563_v53 = vmul.f32 %v1589_v16, %v1709_v20  ;;  %v1409_v20 = vld [vmem:[%s1866_s3 + $0x88] sm:$0xff] }
 0x127   : > { %v515_v63 = vld [vmem:[#allocation2] sm:$0xff]  ;;  %v1479_v6 = vunpack.i.l.bf16 %v1478_v4  ;;  %v1480_v8 = vunpack.i.h.bf16 %v1478_v4 }
 0x128   : > { %v517_v2 = vadd.f32 %v515_v63, %v1704_v15  ;;  %v901_v14 = vpop.f32.mrf.mxu0 }
 0x129   : > { %860 = vrot.lane.b32.xlu2 %v854_v1, %s1502_s13  ;;  %1141 = vmatpush.msra.mxu1 %v1479_v6  ;;  %v905_v15 = vmul.f32 %v1679_v61, %v901_v14 }
 0x12a   : > { %v467_v5 = vld [vmem:[#allocation2 + $0x8] sm:$0xff]  ;;  %519 = vst.msk [vmem:[#allocation2] sm:$0xff] %vm245_vm3, %v517_v2  ;;  %v948_v2 = vpop.f32.mrf.mxu1 }
 0x12b   : > { %v477_v7 = vadd.f32 %v473_v0, %v467_v5  ;;  %1142 = vmatpush.msra.mxu1 %v1480_v8 }
 0x12c   : > { %1407 = vmatmul.msk.f32.gmra.mxu0 %vm272_vm0, %v1405_v10  ;;  %1410 = vmatmul.msk.f32.vlgmr.msra.gmra.mxu1 %vm272_vm0, %v1408_v13 }
 0x12d   : > { %480 = vst.msk [vmem:[#allocation2 + $0x8] sm:$0xff] %vm478_vm7, %v477_v7  ;;  %v803_v12 = vpop.f32.mrf.mxu2 }
 0x12e   : > { %812 = vrot.lane.b32.xlu1 %v803_v12, %s1501_s10  ;;  %862 = vrot.lane.b32.xlu0 %v855_v9, %s1502_s13 }
 0x131   : > { %v565_v17 = vld [vmem:[#allocation2] sm:$0xff]  ;;  %912 = vrot.lane.b32.xlu2 %v905_v15, %s1503_s21 }
 0x132   : > { %v567_v18 = vadd.f32 %v565_v17, %v563_v53  ;;  %v951_v9 = vpop.f32.mrf.mxu1  ;;  %v1046_v17 = vpop.f32.mrf.mxu3 }
 0x134   : > { %v516_v23 = vld [vmem:[#allocation2 + $0x8] sm:$0xff]  ;;  %570 = vst.msk [vmem:[#allocation2] sm:$0xff] %vm569_vm8, %v567_v18  ;;  %1411 = vmatmul.msk.f32.gmra.mxu1 %vm272_vm0, %v1409_v20 }
 0x135   : > { %v518_v27 = vadd.f32 %v516_v23, %v1707_v19  ;;  %v996_v8 = vpop.f32.mrf.mxu2 }
 0x136   : > { %910 = vrot.lane.b32.xlu1 %v904_v22, %s1503_s21  ;;  %1164 = vperm.xlu0 %1481, %v1160_v21   ;;  %v1002_v10 = vmul.f32 %v1589_v16, %v996_v8  ;;  %v1052_v21 = vmul.f32 %v1572_v11, %v1046_v17 }
 0x137   : > { %520 = vst.msk [vmem:[#allocation2 + $0x8] sm:$0xff] %vm245_vm3, %v518_v27 }
 0x13b   : > { %v616_v61 = vld [vmem:[#allocation2] sm:$0xff] }
 0x13c   : > { %v618_v19 = vadd.f32 %v616_v61, %v614_v28  ;;  %v1049_v28 = vpop.f32.mrf.mxu3 }
 0x13d   : > { %v999_v15 = vpop.f32.mrf.mxu2  ;;  %v1053_v61 = vmul.f32 %v1572_v11, %v1049_v28 }
 0x13e   : > { %v566_v32 = vld [vmem:[#allocation2 + $0x8] sm:$0xff]  ;;  %621 = vst.msk [vmem:[#allocation2] sm:$0xff] %vm620_vm9, %v618_v19  ;;  %1169 = vperm.xlu1 %1482, %v1161_v26   ;;  %v1003_v18 = vmul.f32 %v1589_v16, %v999_v15 }
 0x13f   : > { %v568_v33 = vadd.f32 %v566_v32, %v564_v29 }
 0x141   : > { %571 = vst.msk [vmem:[#allocation2 + $0x8] sm:$0xff] %vm569_vm8, %v568_v33 }
 0x145   : > { %v665_v34 = vld [vmem:[#allocation2] sm:$0xff] }
 0x146   : > { %v667_v36 = vadd.f32 %v665_v34, %v1711_v24  ;;  %v715_v24 = vmul.f32 %v1589_v16, %v1725_v37 }
 0x148   : > { %v617_v30 = vld [vmem:[#allocation2 + $0x8] sm:$0xff]  ;;  %670 = vst.msk [vmem:[#allocation2] sm:$0xff] %vm669_vm10, %v667_v36 }
 0x149   : > { %v619_v38 = vadd.f32 %v617_v30, %v615_v35 }
 0x14b   : > { %622 = vst.msk [vmem:[#allocation2 + $0x8] sm:$0xff] %vm620_vm9, %v619_v38 }
 0x14f   : > { %v716_v39 = vld [vmem:[#allocation2] sm:$0xff] }
 0x150   : > { %v718_v40 = vadd.f32 %v716_v39, %v714_v25 }
 0x152   : > { %v666_v43 = vld [vmem:[#allocation2 + $0x8] sm:$0xff]  ;;  %721 = vst.msk [vmem:[#allocation2] sm:$0xff] %vm720_vm11, %v718_v40 }
 0x153   : > { %v668_v44 = vadd.f32 %v666_v43, %v1720_v31 }
 0x155   : > { %671 = vst.msk [vmem:[#allocation2 + $0x8] sm:$0xff] %vm669_vm10, %v668_v44 }
 0x159   : > { %v758_v49 = vld [vmem:[#allocation2] sm:$0xff] }
 0x15c   : > { %v717_v42 = vld [vmem:[#allocation2 + $0x8] sm:$0xff] }
 0x15d   : > { %v719_v45 = vadd.f32 %v717_v42, %v715_v24 }
 0x15f   : > { %722 = vst.msk [vmem:[#allocation2 + $0x8] sm:$0xff] %vm720_vm11, %v719_v45 }
 0x166   : > { %v759_v46 = vld [vmem:[#allocation2 + $0x8] sm:$0xff] }
 0x17b   : > { %v765_v47 = vpop.permute.xlu2 %764 }
 0x17c   : > { %v769_v48 = vadd.f32 %v765_v47, %v759_v46 }
 0x17e   : > { %771 = vst.msk [vmem:[#allocation2 + $0x8] sm:$0xff] %vm320_vm4, %v769_v48 }
 0x183   : > { %v861_v57 = vpop.permute.xlu2 %860 }
 0x185   : > { %v807_v55 = vld [vmem:[#allocation2 + $0x8] sm:$0xff] }
 0x18b   : > { %v763_v31 = vpop.permute.xlu1 %762  ;;  %v913_v3 = vpop.permute.xlu2 %912 }
 0x18c   : > { %v768_v50 = vadd.f32 %v763_v31, %v758_v49 }
 0x18e   : > { %770 = vst.msk [vmem:[#allocation2] sm:$0xff] %vm320_vm4, %v768_v50 }
 0x195   : > { %v806_v51 = vld [vmem:[#allocation2] sm:$0xff] }
 0x198   : > { %v811_v37 = vpop.permute.xlu0 %810 }
 0x199   : > { %v816_v52 = vadd.f32 %v811_v37, %v806_v51 }
 0x19b   : > { %818 = vst.msk [vmem:[#allocation2] sm:$0xff] %vm369_vm5, %v816_v52 }
 0x1a0   : > { %v813_v54 = vpop.permute.xlu1 %812  ;;  %v863_v59 = vpop.permute.xlu0 %862 }
 0x1a1   : > { %v817_v56 = vadd.f32 %v813_v54, %v807_v55  ;;  %v1096_v29 = vpop.f32.mrf.mxu0 }
 0x1a2   : > { %v856_v58 = vld [vmem:[#allocation2] sm:$0xff] }
 0x1a3   : > { %819 = vst.msk [vmem:[#allocation2 + $0x8] sm:$0xff] %vm369_vm5, %v817_v56  ;;  %v866_v41 = vadd.f32 %v861_v57, %v856_v58 }
 0x1a5   : > { %868 = vst.msk [vmem:[#allocation2] sm:$0xff] %vm424_vm6, %v866_v41 }
 0x1a8   : > { %v911_v63 = vpop.permute.xlu1 %910  ;;  %v1165_v24 = vpop.permute.xlu0 %1164 }
 0x1a9   : > { %v1144_v35 = vpop.f32.mrf.mxu1  ;;  %v1099_v36 = vpop.f32.mrf.mxu0 }
 0x1aa   : > { %v857_v60 = vld [vmem:[#allocation2 + $0x8] sm:$0xff]  ;;  %v1150_v30 = vmul.f32 %v1589_v16, %v1144_v35 }
 0x1ab   : > { %v867_v62 = vadd.f32 %v863_v59, %v857_v60 }
 0x1ac   : > { %v906_v0 = vld [vmem:[#allocation2] sm:$0xff] }
 0x1ad   : > { %869 = vst.msk [vmem:[#allocation2 + $0x8] sm:$0xff] %vm424_vm6, %v867_v62  ;;  %v916_v1 = vadd.f32 %v911_v63, %v906_v0 }
 0x1af   : > { %918 = vst.msk [vmem:[#allocation2] sm:$0xff] %vm478_vm7, %v916_v1 }
 0x1b0   : > { %v1170_v48 = vpop.permute.xlu1 %1169 }
 0x1b1   : > { %v1147_v11 = vpop.f32.mrf.mxu1 }
 0x1b2   : > { %v1151_v43 = vmul.f32 %v1589_v16, %v1147_v11 }
 0x1b4   : > { %v907_v4 = vld [vmem:[#allocation2 + $0x8] sm:$0xff] }
 0x1b5   : > { %v917_v5 = vadd.f32 %v913_v3, %v907_v4 }
 0x1b6   : > { %v954_v6 = vld [vmem:[#allocation2] sm:$0xff] }
 0x1b7   : > { %v956_v7 = vadd.f32 %v954_v6, %v948_v2  ;;  %919 = vst.msk [vmem:[#allocation2 + $0x8] sm:$0xff] %vm478_vm7, %v917_v5 }
 0x1b9   : > { %958 = vst.msk [vmem:[#allocation2] sm:$0xff] %vm245_vm3, %v956_v7 }
 0x1be   : > { %v955_v12 = vld [vmem:[#allocation2 + $0x8] sm:$0xff] }
 0x1bf   : > { %v957_v13 = vadd.f32 %v955_v12, %v951_v9 }
 0x1c0   : > { %v1004_v14 = vld [vmem:[#allocation2] sm:$0xff] }
 0x1c1   : > { %959 = vst.msk [vmem:[#allocation2 + $0x8] sm:$0xff] %vm245_vm3, %v957_v13  ;;  %v1006_v53 = vadd.f32 %v1004_v14, %v1002_v10 }
 0x1c3   : > { %1008 = vst.msk [vmem:[#allocation2] sm:$0xff] %vm569_vm8, %v1006_v53 }
 0x1c8   : > { %v1005_v22 = vld [vmem:[#allocation2 + $0x8] sm:$0xff] }
 0x1c9   : > { %v1007_v23 = vadd.f32 %v1005_v22, %v1003_v18 }
 0x1ca   : > { %v1054_v27 = vld [vmem:[#allocation2] sm:$0xff] }
 0x1cb   : > { %1009 = vst.msk [vmem:[#allocation2 + $0x8] sm:$0xff] %vm569_vm8, %v1007_v23  ;;  %v1056_v20 = vadd.f32 %v1054_v27, %v1052_v21 }
 0x1cd   : > { %1058 = vst.msk [vmem:[#allocation2] sm:$0xff] %vm620_vm9, %v1056_v20 }
 0x1d2   : > { %v1055_v19 = vld [vmem:[#allocation2 + $0x8] sm:$0xff] }
 0x1d3   : > { %v1057_v32 = vadd.f32 %v1055_v19, %v1053_v61 }
 0x1d4   : > { %v1102_v33 = vld [vmem:[#allocation2] sm:$0xff] }
 0x1d5   : > { %1059 = vst.msk [vmem:[#allocation2 + $0x8] sm:$0xff] %vm620_vm9, %v1057_v32  ;;  %v1104_v34 = vadd.f32 %v1102_v33, %v1096_v29 }
 0x1d7   : > { %1106 = vst.msk [vmem:[#allocation2] sm:$0xff] %vm669_vm10, %v1104_v34 }
 0x1dc   : > { %v1103_v38 = vld [vmem:[#allocation2 + $0x8] sm:$0xff] }
 0x1dd   : > { %v1105_v25 = vadd.f32 %v1103_v38, %v1099_v36 }
 0x1de   : > { %v1152_v39 = vld [vmem:[#allocation2] sm:$0xff] }
 0x1df   : > { %1107 = vst.msk [vmem:[#allocation2 + $0x8] sm:$0xff] %vm669_vm10, %v1105_v25  ;;  %v1154_v40 = vadd.f32 %v1152_v39, %v1150_v30 }
 0x1e1   : > { %1156 = vst.msk [vmem:[#allocation2] sm:$0xff] %vm720_vm11, %v1154_v40 }
 0x1e6   : > { %v1153_v44 = vld [vmem:[#allocation2 + $0x8] sm:$0xff] }
 0x1e7   : > { %v1155_v42 = vadd.f32 %v1153_v44, %v1151_v43 }
 0x1e8   : > { %v1158_v45 = vld [vmem:[#allocation2] sm:$0xff] }
 0x1e9   : > { %1157 = vst.msk [vmem:[#allocation2 + $0x8] sm:$0xff] %vm720_vm11, %v1155_v42  ;;  %v1841_v26 = vadd.f32 %v1165_v24, %v1158_v45 }
 0x1eb   : > { %v1176_v46 = vmul.f32 0.70710677, %v1841_v26 }
 0x1ed   : > { %v1178_v47 = vmul.f32 %v1176_v46, %v1176_v46 }
 0x1ef   : > { %v1179_v31 = vmin.f32 %v1178_v47, 16.0 }
 0x1f0   : > { %v1159_v49 = vld [vmem:[#allocation2 + $0x8] sm:$0xff] }
 0x1f1   : > { %v1180_v50 = vmul.f32 2.1237322e-06, %v1179_v31  ;;  %v1191_v37 = vmul.f32 3.8918573e-05, %v1179_v31  ;;  %v1844_v51 = vadd.f32 %v1170_v48, %v1159_v49 }
 0x1f3   : > { %v1181_v52 = vadd.f32 0.00028619796, %v1180_v50  ;;  %v1192_v16 = vadd.f32 0.001143296, %v1191_v37  ;;  %v1847_v54 = vmul.f32 0.70710677, %v1844_v51 }
 0x1f4   : > { %v1174_v37 = vmul.f32 0.5, %v1841_v26  ;;  %v1175_v26 = vmul.f32 0.5, %v1844_v51 }
 0x1f5   : > { %v1182_v55 = vmul.f32 %v1181_v52, %v1179_v31  ;;  %v1193_v56 = vmul.f32 %v1192_v16, %v1179_v31  ;;  %v1218_v57 = vmul.f32 %v1847_v54, %v1847_v54 }
 0x1f7   : > { %v1194_v58 = vadd.f32 0.014752088, %v1193_v56  ;;  %v1183_v41 = vadd.f32 0.0036580483, %v1182_v55  ;;  %v1219_v59 = vmin.f32 %v1218_v57, 16.0 }
 0x1f9   : > { %v1195_v60 = vmul.f32 %v1194_v58, %v1179_v31  ;;  %v1220_v62 = vmul.f32 2.1237322e-06, %v1219_v59  ;;  %v1231_v63 = vmul.f32 3.8918573e-05, %v1219_v59  ;;  %v1184_v1 = vmul.f32 %v1183_v41, %v1179_v31 }
 0x1fb   : > { %v1196_v0 = vadd.f32 0.112945676, %v1195_v60  ;;  %v1221_v2 = vadd.f32 0.00028619796, %v1220_v62  ;;  %v1232_v3 = vadd.f32 0.001143296, %v1231_v63 }
 0x1fc   : > { %v1185_v8 = vadd.f32 0.05243302, %v1184_v1 }
 0x1fd   : > { %v1197_v4 = vmul.f32 %v1196_v0, %v1179_v31  ;;  %v1222_v5 = vmul.f32 %v1221_v2, %v1219_v59  ;;  %v1233_v6 = vmul.f32 %v1232_v3, %v1219_v59 }
 0x1fe   : > { %v1186_v53 = vmul.f32 %v1185_v8, %v1179_v31 }
 0x1ff   : > { %v1198_v7 = vadd.f32 0.4994258, %v1197_v4  ;;  %v1234_v9 = vadd.f32 0.014752088, %v1233_v6  ;;  %v1223_v12 = vadd.f32 0.0036580483, %v1222_v5 }
 0x200   : > { %v1187_v21 = vadd.f32 0.18741608, %v1186_v53 }
 0x201   : > { %v1199_v10 = vmul.f32 %v1198_v7, %v1179_v31  ;;  %v1235_v13 = vmul.f32 %v1234_v9, %v1219_v59  ;;  %v1224_v17 = vmul.f32 %v1223_v12, %v1219_v59 }
 0x202   : > { %v1188_v28 = vmul.f32 %v1187_v21, %v1179_v31 }
 0x203   : > { %v1200_v14 = vadd.f32 1.0, %v1199_v10  ;;  %v1236_v15 = vadd.f32 0.112945676, %v1235_v13  ;;  %v1225_v23 = vadd.f32 0.05243302, %v1224_v17 }
 0x204   : > { %v1189_v34 = vadd.f32 1.1283791, %v1188_v28 }
 0x205   : > { %1483 = vrcp.f32 %v1200_v14  ;;  %v1237_v18 = vmul.f32 %v1236_v15, %v1219_v59  ;;  %v1226_v19 = vmul.f32 %v1225_v23, %v1219_v59  ;;  %v1212_v33 = vand.u32 2147483648, %v1200_v14 }
 0x206   : > { %v1210_v36 = vand.u32 2147483647, %v1200_v14  ;;  %vm1206_vm13 = vweird.f32 %v1200_v14  ;;  %v1190_v40 = vmul.f32 %v1189_v34, %v1176_v46 }
 0x207   : > { %v1238_v22 = vadd.f32 0.4994258, %v1237_v18  ;;  %v1227_v30 = vadd.f32 0.18741608, %v1226_v19  ;;  %v1213_v25 = vor.u32 1.1754944e-38, %v1212_v33 }
 0x208   : > { %vm1211_vm15 = vcmp.eq.f32.partialorder %v1210_v36, 8.507059e+37 }
 0x209   : > { %v1239_v27 = vmul.f32 %v1238_v22, %v1219_v59  ;;  %v1228_v44 = vmul.f32 %v1227_v30, %v1219_v59 }
 0x20b   : > { %v1484_v20 = vpop.eup %1483  ;;  %v1240_v29 = vadd.f32 1.0, %v1239_v27  ;;  %v1229_v31 = vadd.f32 1.1283791, %v1228_v44 }
 0x20c   : > { %v1202_v61 = vmul.f32 %v1484_v20, %v1200_v14  ;;  %vm1207_vm12 = vweird.f32 %v1484_v20 }
 0x20d   : > { %1485 = vrcp.f32 %v1240_v29  ;;  %vm1208_vm14 = vmor %vm1206_vm13, %vm1207_vm12  ;;  %v1252_v48 = vand.u32 2147483648, %v1240_v29  ;;  %v1250_v50 = vand.u32 2147483647, %v1240_v29  ;;  %vm1246_vm1 = vweird.f32 %v1240_v29 }
 0x20e   : > { %v1203_v32 = vsub.f32 1.0, %v1202_v61  ;;  %v1230_v56 = vmul.f32 %v1229_v31, %v1847_v54 }
 0x20f   : > { %v1253_v55 = vor.u32 1.1754944e-38, %v1252_v48  ;;  %vm1251_vm4 = vcmp.eq.f32.partialorder %v1250_v50, 8.507059e+37 }
 0x210   : > { %v1204_v35 = vmul.f32 %v1484_v20, %v1203_v32 }
 0x212   : > { %v1205_v38 = vadd.f32 %v1484_v20, %v1204_v35 }
 0x213   : > { %v1486_v39 = vpop.eup %1485 }
 0x214   : > { %v1209_v11 = vsel %vm1208_vm14, %v1484_v20, %v1205_v38  ;;  %v1242_v24 = vmul.f32 %v1486_v39, %v1240_v29  ;;  %vm1247_vm0 = vweird.f32 %v1486_v39 }
 0x215   : > { %v1214_v43 = vsel %vm1211_vm15, %v1213_v25, %v1209_v11  ;;  %vm1248_vm2 = vmor %vm1246_vm1, %vm1247_vm0 }
 0x216   : > { %v1215_v42 = vmul.f32 %v1214_v43, %v1190_v40  ;;  %v1243_v45 = vsub.f32 1.0, %v1242_v24 }
 0x218   : > { %v1412_v47 = vclamps-f32 %v1215_v42, 1.0  ;;  %v1244_v49 = vmul.f32 %v1486_v39, %v1243_v45 }
 0x21a   : > { %v1258_v52 = vadd.f32 1.0, %v1412_v47  ;;  %v1245_v46 = vadd.f32 %v1486_v39, %v1244_v49 }
 0x21c   : > { %v1260_v16 = vmul.f32 %v1258_v52, %v1174_v37  ;;  %v1249_v57 = vsel %vm1248_vm2, %v1486_v39, %v1245_v46 }
 0x21d   : > { %v1254_v58 = vsel %vm1251_vm4, %v1253_v55, %v1249_v57 }
 0x21e   : > { %1262 = vst.msk [vmem:[%s244_s23] sm:$0xff] %vm245_vm3, %v1260_v16  ;;  %v1255_v41 = vmul.f32 %v1254_v58, %v1230_v56 }
 0x220   : > { %v1413_v59 = vclamps-f32 %v1255_v41, 1.0 }
 0x222   : > { %v1259_v60 = vadd.f32 1.0, %v1413_v59 }
 0x224   : > { %v1261_v62 = vmul.f32 %v1259_v60, %v1175_v26 }
 0x226   : > { %1263 = vst.msk [vmem:[%s244_s23 + $0x8] sm:$0xff] %vm245_vm3, %v1261_v62 }
 0x227 PF: > { %s15_s18 = sadd.s32 1, %s1493_s18  }
 0x228   : > { %p12_p4 = scmp.ge.s32.totalorder %s15_s18, 4  }
 0x22a   :  { %14 = sbr.rel (!%p12_p4) target bundleno = 1 (0x1), region = 89 }

// kernel: decoder_forward_pallas.13
= control target key start
LH: loop header
LB: loop body
LE: loop exit
PB: predicated region body
PF: predicated region fallthrough
CT: control target
= control target key end

     0   :  { %s340_s12 = smov 0   ;;  %s363_s0 = inlined_call_operand.vmem [shape: f32[2,8,256], index: 0, kind: input, shape index: {}]   ;;  %s364_s1 = inlined_call_operand.vmem [shape: f32[4,8], index: 1, kind: input, shape index: {}]   ;;  %s365_s2 = inlined_call_operand.vmem [shape: f32[4,1], index: 2, kind: input, shape index: {}]   ;;  %s366_s3 = inlined_call_operand.vmem [shape: f32[2,4,256], index: 3, kind: output, shape index: {}]  }
   0x1 LB: > { %s286_s13 = sadd.s32 4294967295, %s317_s12   ;;  %p290_p0 = scmp.ge.s32.totalorder %s317_s12, 1  ;;  %s317_s12 = sphi %s340_s12, %s13_s12  }
   0x2   : > { %p137_p1 = scmp.lt.s32.totalorder %s317_s12, 3 }
   0x4   : > { %p138_p2 = pnand %p290_p0, %p137_p1 }
   0x5   : > { %p161_p3 = scmp.lt.s32.totalorder (!%p138_p2), %s286_s13, 1 }
   0x6   : > { %141 = sbr.rel (%p138_p2) target bundleno = 148 (0x94), region = 32 }
   0xb   : > { %v319_v0 = vmov 0   ;;  %v174_v1 = vld [vmem:[%s365_s2] sm:$0xf]  ;;  %s368_s13 = smov (!%p161_p3, %s286_s13), 1  ;;  %vm180_vm0 = vcmask 64512   ;;  %vm227_vm1 = vcmask 1043456  }
   0xc   : > { %310 = vset.pattern.permute.xlu0 %v319_v0  ;;  %s299_s16 = sshll.u32 %s368_s13, 4  ;;  %v171_v2 = vld [vmem:[%s364_s1] sm:$0xf]  ;;  %s300_s22 = sshll.u32 %s368_s13, 3 }
   0xd   : > { %177 = vperm.xlu0 %310, %v174_v1   ;;  %s165_s19 = scalar_lea.vmem %s363_s0, %s299_s16  ;;  %s170_s25 = scalar_lea.vmem %s366_s3, %s300_s22 }
   0xe   : > { %v172_v3 = vld [vmem:[%s165_s19] sm:$0xff]  ;;  %v173_v4 = vld [vmem:[%s165_s19 + $0x8] sm:$0xff] }
   0xf   : > { %199 = vmatpush.msra.mxu0 %v172_v3  ;;  %219 = vmatpush.msra.mxu1 %v173_v4 }
  0x10   : > { %295 = vmatmul.msk.f32.vlgmr.msra.gmra.mxu0 %vm180_vm0, %v171_v2  ;;  %296 = vmatmul.msk.f32.vlgmr.msra.gmra.mxu1 %vm180_vm0, %v171_v2 }
  0x7f   : > { %v178_v5 = vpop.permute.xlu0 %177 }
  0x8d   : > { %v201_v6 = vpop.f32.mrf.mxu0  ;;  %v221_v7 = vpop.f32.mrf.mxu1 }
  0x8e   : > { %v222_v8 = vadd.f32 %v221_v7, %v178_v5  ;;  %v202_v9 = vadd.f32 %v201_v6, %v178_v5 }
  0x90   : > { %v226_v10 = vrot.slane %v222_v8, 4 }
  0x92   : > { %v228_v11 = vsel %vm227_vm1, %v202_v9, %v226_v10 }
  0x93   : > { %230 = vst [vmem:[%s170_s25] sm:$0xff] %v228_v11 }
  0x94 PF: > { %s13_s12 = sadd.s32 1, %s317_s12  }
  0x95   : > { %p10_p4 = scmp.ge.s32.totalorder %s13_s12, 4  }
  0x97   :  { %12 = sbr.rel (!%p10_p4) target bundleno = 1 (0x1), region = 62 }

// kernel: decoder_forward_pallas.12
= control target key start
LH: loop header
LB: loop body
LE: loop exit
PB: predicated region body
PF: predicated region fallthrough
CT: control target
= control target key end

     0   :  { %s1106_s12 = smov 0   ;;  %s1220_s0 = inlined_call_operand.vmem [shape: f32[2,8,256], index: 0, kind: input, shape index: {}]   ;;  %s1221_s1 = inlined_call_operand.vmem [shape: f32[9,8,8], index: 1, kind: input, shape index: {}]   ;;  %s1222_s2 = inlined_call_operand.vmem [shape: f32[8,1], index: 2, kind: input, shape index: {}]   ;;  %s1223_s3 = inlined_call_operand.vmem [shape: f32[2,8,256], index: 3, kind: output, shape index: {}]  }
   0x1 LB: > { %s965_s13 = sadd.s32 4294967295, %s1074_s12   ;;  %p969_p0 = scmp.ge.s32.totalorder %s1074_s12, 1  ;;  %s1074_s12 = sphi %s1106_s12, %s13_s12  }
   0x2   : > { %p137_p1 = scmp.lt.s32.totalorder %s1074_s12, 3 }
   0x4   : > { %p138_p2 = pnand %p969_p0, %p137_p1 }
   0x5   : > { %p161_p3 = scmp.lt.s32.totalorder (!%p138_p2), %s965_s13, 1  ;;  %s1077_s22 = smov (!%p138_p2), 127  }
   0x6   : > { %141 = sbr.rel (%p138_p2) target bundleno = 374 (0x176), region = 32  ;;  %s1078_s25 = smov (!%p138_p2), 111  }
   0x7   : > { %s1079_s28 = smov (!%p138_p2), 112   ;;  %s1080_s29 = smov (!%p138_p2), 113  }
   0x8   : > { %s1082_s9 = smov (!%p138_p2), 17   ;;  %s1083_s15 = smov (!%p138_p2), 16  }
   0x9   : > { %s1084_s18 = smov (!%p138_p2), 15   ;;  %s1085_s19 = smov (!%p138_p2), 1  }
   0xb   : > { %v173_v0 = vlaneseq  ;;  %s1225_s13 = smov (!%p161_p3, %s965_s13), 1  ;;  %v1076_v2 = vmov 0.0   ;;  %v212_v5 = vld [vmem:[%s1221_s1] sm:$0xff]  ;;  %vm215_vm0 = vcmask 64512   ;;  %v980_v8 = vld [vmem:[%s1221_s1 + $0x8] sm:$0xff]  ;;  %v983_v14 = vld [vmem:[%s1221_s1 + $0x10] sm:$0xff] }
   0xc   : > { %171 = vst [vmem:[#allocation2] sm:$0xff] %v1076_v2  ;;  %s1008_s14 = sshll.u32 %s1225_s13, 4  ;;  %v986_v15 = vld [vmem:[%s1221_s1 + $0x18] sm:$0xff]  ;;  %v989_v19 = vld [vmem:[%s1221_s1 + $0x20] sm:$0xff]  ;;  %v1081_v21 = vmov 0   ;;  %vm479_vm5 = vcmask 1039360  }
   0xd   : > { %v174_v1 = vand.u32 127, %v173_v0  ;;  %s165_s17 = scalar_lea.vmem %s1220_s0, %s1008_s14  ;;  %1063 = vset.pattern.permute.xlu0 %v1081_v21  ;;  %v992_v25 = vld [vmem:[%s1221_s1 + $0x28] sm:$0xff]  ;;  %vm265_vm6 = vcmask 908288   ;;  %vm693_vm7 = vcmask 916480   ;;  %vm405_vm8 = vcmask 924672   ;;  %v995_v45 = vld [vmem:[%s1221_s1 + $0x30] sm:$0xff]  ;;  %s170_s24 = scalar_lea.vmem %s1223_s3, %s1008_s14 }
   0xe   : > { %v213_v6 = vld [vmem:[%s165_s17] sm:$0xff]  ;;  %v214_v7 = vld [vmem:[%s165_s17 + $0x8] sm:$0xff]  ;;  %v998_v46 = vld [vmem:[%s1221_s1 + $0x38] sm:$0xff]  ;;  %vm285_vm9 = vcmask 1047688   ;;  %vm279_vm10 = vcmask 138240   ;;  %vm343_vm11 = vcmask 130048  }
   0xf   : > { %v175_v3 = vadd.s32 128, %v174_v1  ;;  %v180_v4 = vand.u32 15, %v174_v1  ;;  %234 = vmatpush.msra.mxu0 %v213_v6  ;;  %254 = vmatpush.msra.mxu1 %v214_v7  ;;  %v1028_v10 = vpack.i.bf16 %v214_v7, %v213_v6  ;;  %v1001_v60 = vld [vmem:[%s1221_s1 + $0x40] sm:$0xff]  ;;  %vm349_vm12 = vcmask 1047680  }
  0x10   : > { %310 = vmatpush.msra.mxu2 %v213_v6  ;;  %978 = vmatmul.msk.f32.vlgmr.msra.gmra.mxu0 %vm215_vm0, %v212_v5  ;;  %vm419_vm13 = vcmask 121856   ;;  %vm493_vm14 = vcmask 7168   ;;  %vm425_vm15 = vcmask 1047672  }
  0x11   : > { %v187_v9 = vand.u32 15, %v175_v3  ;;  %vm200_vm1 = vcmp.ge.s32.totalorder %v180_v4, 1  ;;  %979 = vmatmul.msk.f32.vlgmr.msra.gmra.mxu1 %vm215_vm0, %v212_v5  ;;  %981 = vmatmul.msk.f32.vlgmr.msra.gmra.mxu2 %vm215_vm0, %v980_v8  ;;  %vm206_vm3 = vcmp.le.s32.totalorder %v180_v4, 14  ;;  %v812_v3 = vld [vmem:[%s1222_s2] sm:$0xff] }
  0x12   : > { %v1129_v11 = vsel %vm200_vm1, 1.0, %v1076_v2  ;;  %330 = vmatpush.msra.mxu3 %v214_v7  ;;  %1029 = vrot.lane.b32.xlu0 %v1028_v10, %s1077_s22  ;;  %v1144_v16 = vsel %vm206_vm3, 1.0, %v1076_v2 }
  0x13   : > { %vm201_vm2 = vcmp.ge.s32.totalorder %v187_v9, 1  ;;  %982 = vmatmul.msk.f32.vlgmr.msra.gmra.mxu3 %vm215_vm0, %v980_v8  ;;  %450 = vmatpush.msrb.mxu2 %v213_v6  ;;  %vm207_vm4 = vcmp.le.s32.totalorder %v187_v9, 14 }
  0x14   : > { %v1133_v12 = vsel %vm201_vm2, 1.0, %v1076_v2  ;;  %394 = vmatpush.msrb.mxu1 %v214_v7  ;;  %374 = vmatpush.msrb.mxu0 %v213_v6  ;;  %v1146_v17 = vsel %vm207_vm4, 1.0, %v1076_v2 }
  0x15   : > { %v1058_v13 = vpack.i.bf16 %v1133_v12, %v1129_v11  ;;  %470 = vmatpush.msrb.mxu3 %v214_v7  ;;  %1039 = vrot.lane.b32.xlu1 %v1028_v10, %s1079_s28  ;;  %v1053_v18 = vpack.i.bf16 %v1146_v17, %v1144_v16 }
  0x16   : > { %544 = vmatpush.msra.mxu1 %v214_v7  ;;  %524 = vmatpush.msra.mxu0 %v213_v6 }
  0x17   : > { %1049 = vrot.lane.b32.xlu2 %v1058_v13, %s1078_s25 }
  0x18   : > { %984 = vmatmul.msk.f32.vlgmr.msrb.gmra.mxu0 %vm215_vm0, %v983_v14 }
  0x19   : > { %987 = vmatmul.msk.f32.vlgmr.msrb.gmra.mxu2 %vm215_vm0, %v986_v15  ;;  %985 = vmatmul.msk.f32.vlgmr.msrb.gmra.mxu1 %vm215_vm0, %v983_v14 }
  0x1a   : > { %1034 = vrot.lane.b32.xlu0 %v1028_v10, %s1080_s29 }
  0x1b   : > { %988 = vmatmul.msk.f32.vlgmr.msrb.gmra.mxu3 %vm215_vm0, %v986_v15 }
  0x1d   : > { %1044 = vrot.lane.b32.xlu1 %v1028_v10, %s1078_s25 }
  0x1f   : > { %1054 = vrot.lane.b32.xlu2 %v1053_v18, %s1080_s29 }
  0x20   : > { %990 = vmatmul.msk.f32.vlgmr.msra.gmra.mxu0 %vm215_vm0, %v989_v19 }
  0x21   : > { %991 = vmatmul.msk.f32.vlgmr.msra.gmra.mxu1 %vm215_vm0, %v989_v19 }
  0x22   : > { %1059 = vrot.lane.b32.xlu0 %v1058_v13, %s1077_s22 }
  0x71   : > { %v1050_v20 = vpop.permute.xlu2 %1049 }
  0x72   : > { %v1052_v26 = vunpack.i.h.bf16 %v1050_v20  ;;  %v1051_v27 = vunpack.i.l.bf16 %v1050_v20 }
  0x74   : > { %v266_v32 = vsel %vm265_vm6, %v1051_v27, %v1052_v26 }
  0x79   : > { %v1055_v35 = vpop.permute.xlu2 %1054 }
  0x7a   : > { %v1057_v42 = vunpack.i.h.bf16 %v1055_v35  ;;  %v1056_v43 = vunpack.i.l.bf16 %v1055_v35 }
  0x7c   : > { %v406_v50 = vsel %vm405_vm8, %v1056_v43, %v1057_v42 }
  0x84   : > { %v1030_v22 = vpop.permute.xlu0 %1029 }
  0x85   : > { %v1032_v23 = vunpack.i.h.bf16 %v1030_v22  ;;  %v1031_v24 = vunpack.i.l.bf16 %v1030_v22 }
  0x87   : > { %606 = vmatpush.msra.mxu3 %v1032_v23  ;;  %v565_v28 = vsel %vm479_vm5, %v1031_v24, %v1032_v23  ;;  %v1040_v29 = vpop.permute.xlu1 %1039 }
  0x88   : > { %586 = vmatpush.msra.mxu2 %v565_v28  ;;  %994 = vmatmul.msk.f32.vlgmr.msra.gmra.mxu3 %vm215_vm0, %v992_v25  ;;  %v1042_v30 = vunpack.i.h.bf16 %v1040_v29  ;;  %v1041_v31 = vunpack.i.l.bf16 %v1040_v29 }
  0x89   : > { %993 = vmatmul.msk.f32.vlgmr.msra.gmra.mxu2 %vm215_vm0, %v992_v25 }
  0x8a   : > { %735 = vmatpush.msrb.mxu3 %v1042_v30  ;;  %v694_v33 = vsel %vm693_vm7, %v1041_v31, %v1042_v30 }
  0x8b   : > { %715 = vmatpush.msrb.mxu2 %v694_v33 }
  0x8c   : > { %v1035_v34 = vpop.permute.xlu0 %1034 }
  0x8d   : > { %v236_v36 = vpop.f32.mrf.mxu0  ;;  %v1037_v37 = vunpack.i.h.bf16 %v1035_v34  ;;  %v1036_v38 = vunpack.i.l.bf16 %v1035_v34 }
  0x8e   : > { %v269_v39 = vmul.f32 %v266_v32, %v236_v36  ;;  %v256_v40 = vpop.f32.mrf.mxu1 }
  0x8f   : > { %v270_v41 = vmul.f32 %v1052_v26, %v256_v40  ;;  %670 = vmatpush.msrb.mxu1 %v1037_v37  ;;  %v629_v44 = vsel %vm405_vm8, %v1036_v38, %v1037_v37  ;;  %v1045_v47 = vpop.permute.xlu1 %1044 }
  0x90   : > { %275 = vrot.lane.b32.xlu1 %v269_v39, %s1082_s9  ;;  %650 = vmatpush.msrb.mxu0 %v629_v44  ;;  %v1047_v48 = vunpack.i.h.bf16 %v1045_v47  ;;  %v1046_v49 = vunpack.i.l.bf16 %v1045_v47 }
  0x91   : > { %277 = vrot.lane.b32.xlu2 %v270_v41, %s1082_s9  ;;  %996 = vmatmul.msk.f32.vlgmr.msrb.gmra.mxu0 %vm215_vm0, %v995_v45 }
  0x92   : > { %997 = vmatmul.msk.f32.vlgmr.msrb.gmra.mxu1 %vm215_vm0, %v995_v45  ;;  %999 = vmatmul.msk.f32.vlgmr.msrb.gmra.mxu2 %vm215_vm0, %v998_v46  ;;  %v756_v51 = vsel %vm265_vm6, %v1046_v49, %v1047_v48 }
  0x93   : > { %1000 = vmatmul.msk.f32.vlgmr.msrb.gmra.mxu3 %vm215_vm0, %v998_v46  ;;  %797 = vmatpush.msra.mxu1 %v1047_v48 }
  0x94   : > { %v312_v52 = vpop.f32.mrf.mxu2  ;;  %v1060_v53 = vpop.permute.xlu0 %1059  ;;  %777 = vmatpush.msra.mxu0 %v756_v51 }
  0x95   : > { %339 = vrot.lane.b32.xlu0 %v312_v52, %s1083_s15  ;;  %v376_v54 = vpop.f32.mrf.mxu0  ;;  %v1062_v57 = vunpack.i.h.bf16 %v1060_v53  ;;  %v1061_v58 = vunpack.i.l.bf16 %v1060_v53 }
  0x96   : > { %v332_v55 = vpop.f32.mrf.mxu3  ;;  %v396_v56 = vpop.f32.mrf.mxu1  ;;  %v409_v59 = vmul.f32 %v406_v50, %v376_v54 }
  0x97   : > { %v410_v61 = vmul.f32 %v1057_v42, %v396_v56  ;;  %v480_v62 = vsel %vm479_vm5, %v1061_v58, %v1062_v57 }
  0x98   : > { %341 = vrot.lane.b32.xlu1 %v332_v55, %s1083_s15 }
  0x99   : > { %415 = vrot.lane.b32.xlu2 %v409_v59, %s1084_s18  ;;  %1002 = vmatmul.msk.f32.vlgmr.msra.gmra.mxu0 %vm215_vm0, %v1001_v60 }
  0x9a   : > { %1003 = vmatmul.msk.f32.vlgmr.msra.gmra.mxu1 %vm215_vm0, %v1001_v60  ;;  %vm499_vm0 = vcmask 1047560  }
  0x9c   : > { %v452_v63 = vpop.f32.mrf.mxu2 }
  0x9d   : > { %417 = vrot.lane.b32.xlu0 %v410_v61, %s1084_s18  ;;  %v483_v0 = vmul.f32 %v480_v62, %v452_v63  ;;  %v526_v31 = vpop.f32.mrf.mxu0 }
  0x9e   : > { %v472_v1 = vpop.f32.mrf.mxu3  ;;  %v546_v25 = vpop.f32.mrf.mxu1 }
  0x9f   : > { %v484_v2 = vmul.f32 %v1062_v57, %v472_v1 }
  0xa0   : > { %489 = vrot.lane.b32.xlu1 %v483_v0, %s1085_s19 }
  0xa1   : > { %491 = vrot.lane.b32.xlu2 %v484_v2, %s1085_s19 }
  0xa5   : > { %815 = vperm.xlu0 %1063, %v812_v3  }
  0xeb   : > { %v278_v4 = vpop.permute.xlu2 %277 }
  0xf3   : > { %v416_v7 = vpop.permute.xlu2 %415 }
  0xfb   : > { %v492_v21 = vpop.permute.xlu2 %491 }
 0x102   : > { %v276_v5 = vpop.permute.xlu1 %275 }
 0x103   : > { %286 = vst.msk [vmem:[#allocation2] sm:$0xff] %vm285_vm9, %v276_v5  ;;  %v280_v9 = vsel %vm279_vm10, %v276_v5, %v278_v4 }
 0x107   : > { %v340_v6 = vpop.permute.xlu0 %339 }
 0x10a   : > { %v342_v8 = vpop.permute.xlu1 %341  ;;  %v335_v10 = vld [vmem:[#allocation2] sm:$0xff] }
 0x10b   : > { %v347_v13 = vadd.f32 %v340_v6, %v335_v10  ;;  %v344_v14 = vsel %vm343_vm11, %v340_v6, %v342_v8  ;;  %v608_v20 = vpop.f32.mrf.mxu3 }
 0x10c   : > { %v348_v18 = vadd.f32 %v344_v14, %v280_v9  ;;  %v612_v27 = vmul.f32 %v1146_v17, %v608_v20  ;;  %v588_v40 = vpop.f32.mrf.mxu2 }
 0x10d   : > { %350 = vst.msk [vmem:[#allocation2] sm:$0xff] %vm349_vm12, %v347_v13  ;;  %v611_v41 = vmul.f32 %v1144_v16, %v588_v40 }
 0x10e   : > { %v652_v38 = vpop.f32.mrf.mxu0 }
 0x10f   : > { %v418_v15 = vpop.permute.xlu0 %417  ;;  %v672_v33 = vpop.f32.mrf.mxu1  ;;  %v675_v45 = vmul.f32 %v1129_v11, %v652_v38 }
 0x110   : > { %v420_v19 = vsel %vm419_vm13, %v416_v7, %v418_v15  ;;  %v676_v34 = vmul.f32 %v1133_v12, %v672_v33 }
 0x111   : > { %v424_v22 = vadd.f32 %v420_v19, %v348_v18 }
 0x112   : > { %v490_v23 = vpop.permute.xlu1 %489 }
 0x113   : > { %v494_v24 = vsel %vm493_vm14, %v490_v23, %v492_v21 }
 0x114   : > { %v498_v26 = vadd.f32 %v494_v24, %v424_v22  ;;  %v411_v28 = vld [vmem:[#allocation2] sm:$0xff] }
 0x115   : > { %v423_v30 = vadd.f32 %v416_v7, %v411_v28  ;;  %v717_v49 = vpop.f32.mrf.mxu2 }
 0x116   : > { %v552_v29 = vadd.f32 %v546_v25, %v498_v26  ;;  %v737_v42 = vpop.f32.mrf.mxu3  ;;  %v779_v12 = vpop.f32.mrf.mxu0 }
 0x117   : > { %426 = vst.msk [vmem:[#allocation2] sm:$0xff] %vm425_vm15, %v423_v30  ;;  %v802_v51 = vmul.f32 %v1144_v16, %v779_v12  ;;  %v799_v52 = vpop.f32.mrf.mxu1  ;;  %v816_v55 = vpop.permute.xlu0 %815 }
 0x118   : > { %554 = vst [vmem:[#allocation2 + $0x8] sm:$0xff] %v552_v29  ;;  %v616_v32 = vadd.f32 %v612_v27, %v552_v29  ;;  %v803_v54 = vmul.f32 %v1146_v17, %v799_v52 }
 0x11a   : > { %618 = vst.msk [vmem:[#allocation2 + $0x8] sm:$0xff] %vm479_vm5, %v616_v32 }
 0x11e   : > { %v485_v35 = vld [vmem:[#allocation2] sm:$0xff] }
 0x11f   : > { %v497_v36 = vadd.f32 %v490_v23, %v485_v35 }
 0x121   : > { %v678_v37 = vld [vmem:[#allocation2 + $0x8] sm:$0xff]  ;;  %500 = vst.msk [vmem:[#allocation2] sm:$0xff] %vm499_vm0, %v497_v36 }
 0x122   : > { %v680_v39 = vadd.f32 %v678_v37, %v676_v34 }
 0x124   : > { %682 = vst.msk [vmem:[#allocation2 + $0x8] sm:$0xff] %vm405_vm8, %v680_v39 }
 0x128   : > { %v549_v43 = vld [vmem:[#allocation2] sm:$0xff] }
 0x129   : > { %v551_v44 = vadd.f32 %v549_v43, %v526_v31 }
 0x12b   : > { %v741_v46 = vld [vmem:[#allocation2 + $0x8] sm:$0xff]  ;;  %v615_v48 = vadd.f32 %v611_v41, %v551_v44 }
 0x12c   : > { %v743_v47 = vadd.f32 %v741_v46, %v737_v42 }
 0x12d   : > { %v679_v50 = vadd.f32 %v675_v45, %v615_v48 }
 0x12e   : > { %745 = vst.msk [vmem:[#allocation2 + $0x8] sm:$0xff] %vm693_vm7, %v743_v47 }
 0x12f   : > { %v742_v53 = vadd.f32 %v717_v49, %v679_v50 }
 0x131   : > { %v806_v56 = vadd.f32 %v802_v51, %v742_v53 }
 0x133   : > { %808 = vst [vmem:[#allocation2] sm:$0xff] %v806_v56  ;;  %v1198_v58 = vadd.f32 %v816_v55, %v806_v56 }
 0x135   : > { %v805_v57 = vld [vmem:[#allocation2 + $0x8] sm:$0xff]  ;;  %v822_v59 = vmul.f32 0.70710677, %v1198_v58 }
 0x136   : > { %v807_v11 = vadd.f32 %v805_v57, %v803_v54 }
 0x137   : > { %v824_v60 = vmul.f32 %v822_v59, %v822_v59 }
 0x138   : > { %809 = vst.msk [vmem:[#allocation2 + $0x8] sm:$0xff] %vm265_vm6, %v807_v11 }
 0x139   : > { %v825_v61 = vmin.f32 %v824_v60, 16.0  ;;  %v820_v60 = vmul.f32 0.5, %v1198_v58 }
 0x13b   : > { %v826_v62 = vmul.f32 2.1237322e-06, %v825_v61  ;;  %v837_v63 = vmul.f32 3.8918573e-05, %v825_v61 }
 0x13d   : > { %v827_v0 = vadd.f32 0.00028619796, %v826_v62  ;;  %v838_v1 = vadd.f32 0.001143296, %v837_v63 }
 0x13f   : > { %v811_v16 = vld [vmem:[#allocation2 + $0x8] sm:$0xff]  ;;  %v828_v17 = vmul.f32 %v827_v0, %v825_v61  ;;  %v839_v3 = vmul.f32 %v838_v1, %v825_v61 }
 0x140   : > { %v1202_v2 = vadd.f32 %v816_v55, %v811_v16 }
 0x141   : > { %v829_v5 = vadd.f32 0.0036580483, %v828_v17  ;;  %v840_v6 = vadd.f32 0.014752088, %v839_v3 }
 0x142   : > { %v1205_v4 = vmul.f32 0.70710677, %v1202_v2 }
 0x143   : > { %v841_v8 = vmul.f32 %v840_v6, %v825_v61  ;;  %v830_v10 = vmul.f32 %v829_v5, %v825_v61 }
 0x144   : > { %v864_v7 = vmul.f32 %v1205_v4, %v1205_v4 }
 0x145   : > { %v842_v13 = vadd.f32 0.112945676, %v841_v8  ;;  %v831_v21 = vadd.f32 0.05243302, %v830_v10  ;;  %v821_v8 = vmul.f32 0.5, %v1202_v2 }
 0x146   : > { %v865_v9 = vmin.f32 %v864_v7, 16.0 }
 0x147   : > { %v843_v18 = vmul.f32 %v842_v13, %v825_v61  ;;  %v832_v27 = vmul.f32 %v831_v21, %v825_v61 }
 0x148   : > { %v866_v14 = vmul.f32 2.1237322e-06, %v865_v9  ;;  %v877_v15 = vmul.f32 3.8918573e-05, %v865_v9 }
 0x149   : > { %v844_v22 = vadd.f32 0.4994258, %v843_v18  ;;  %v833_v32 = vadd.f32 0.18741608, %v832_v27 }
 0x14a   : > { %v867_v19 = vadd.f32 0.00028619796, %v866_v14  ;;  %v878_v20 = vadd.f32 0.001143296, %v877_v15 }
 0x14b   : > { %v845_v25 = vmul.f32 %v844_v22, %v825_v61  ;;  %v834_v37 = vmul.f32 %v833_v32, %v825_v61 }
 0x14c   : > { %v868_v23 = vmul.f32 %v867_v19, %v865_v9  ;;  %v879_v24 = vmul.f32 %v878_v20, %v865_v9 }
 0x14d   : > { %v846_v28 = vadd.f32 1.0, %v845_v25  ;;  %v835_v43 = vadd.f32 1.1283791, %v834_v37 }
 0x14e   : > { %v880_v26 = vadd.f32 0.014752088, %v879_v24  ;;  %v869_v29 = vadd.f32 0.0036580483, %v868_v23 }
 0x14f   : > { %1064 = vrcp.f32 %v846_v28  ;;  %v858_v44 = vand.u32 2147483648, %v846_v28  ;;  %v856_v47 = vand.u32 2147483647, %v846_v28  ;;  %vm852_vm2 = vweird.f32 %v846_v28 }
 0x150   : > { %v881_v30 = vmul.f32 %v880_v26, %v865_v9  ;;  %v870_v33 = vmul.f32 %v869_v29, %v865_v9  ;;  %v836_v50 = vmul.f32 %v835_v43, %v822_v59 }
 0x151   : > { %v859_v48 = vor.u32 1.1754944e-38, %v858_v44  ;;  %vm857_vm4 = vcmp.eq.f32.partialorder %v856_v47, 8.507059e+37 }
 0x152   : > { %v882_v31 = vadd.f32 0.112945676, %v881_v30  ;;  %v871_v38 = vadd.f32 0.05243302, %v870_v33 }
 0x154   : > { %v883_v34 = vmul.f32 %v882_v31, %v865_v9  ;;  %v872_v45 = vmul.f32 %v871_v38, %v865_v9 }
 0x155   : > { %v1065_v36 = vpop.eup %1064 }
 0x156   : > { %v884_v35 = vadd.f32 0.4994258, %v883_v34  ;;  %v848_v39 = vmul.f32 %v1065_v36, %v846_v28  ;;  %vm853_vm1 = vweird.f32 %v1065_v36  ;;  %v873_v49 = vadd.f32 0.18741608, %v872_v45 }
 0x157   : > { %vm854_vm3 = vmor %vm852_vm2, %vm853_vm1 }
 0x158   : > { %v885_v40 = vmul.f32 %v884_v35, %v865_v9  ;;  %v849_v41 = vsub.f32 1.0, %v848_v39  ;;  %v874_v55 = vmul.f32 %v873_v49, %v865_v9 }
 0x15a   : > { %v886_v42 = vadd.f32 1.0, %v885_v40  ;;  %v850_v46 = vmul.f32 %v1065_v36, %v849_v41  ;;  %v875_v63 = vadd.f32 1.1283791, %v874_v55 }
 0x15c   : > { %1066 = vrcp.f32 %v886_v42  ;;  %v851_v12 = vadd.f32 %v1065_v36, %v850_v46  ;;  %v898_v61 = vand.u32 2147483648, %v886_v42  ;;  %v896_v16 = vand.u32 2147483647, %v886_v42 }
 0x15d   : > { %vm892_vm6 = vweird.f32 %v886_v42  ;;  %v876_v3 = vmul.f32 %v875_v63, %v1205_v4 }
 0x15e   : > { %v855_v51 = vsel %vm854_vm3, %v1065_v36, %v851_v12  ;;  %v899_v17 = vor.u32 1.1754944e-38, %v898_v61  ;;  %vm897_vm8 = vcmp.eq.f32.partialorder %v896_v16, 8.507059e+37 }
 0x15f   : > { %v860_v52 = vsel %vm857_vm4, %v859_v48, %v855_v51 }
 0x160   : > { %v861_v54 = vmul.f32 %v860_v52, %v836_v50 }
 0x162   : > { %v1067_v53 = vpop.eup %1066  ;;  %v1004_v57 = vclamps-f32 %v861_v54, 1.0 }
 0x163   : > { %v888_v56 = vmul.f32 %v1067_v53, %v886_v42  ;;  %vm893_vm5 = vweird.f32 %v1067_v53 }
 0x164   : > { %v904_v62 = vadd.f32 1.0, %v1004_v57  ;;  %vm894_vm7 = vmor %vm892_vm6, %vm893_vm5 }
 0x165   : > { %v889_v11 = vsub.f32 1.0, %v888_v56 }
 0x166   : > { %v906_v0 = vmul.f32 %v904_v62, %v820_v60 }
 0x167   : > { %v890_v59 = vmul.f32 %v1067_v53, %v889_v11 }
 0x168   : > { %908 = vst [vmem:[%s170_s24] sm:$0xff] %v906_v0 }
 0x169   : > { %v891_v1 = vadd.f32 %v1067_v53, %v890_v59 }
 0x16b   : > { %v895_v58 = vsel %vm894_vm7, %v1067_v53, %v891_v1 }
 0x16c   : > { %v900_v5 = vsel %vm897_vm8, %v899_v17, %v895_v58 }
 0x16d   : > { %v901_v6 = vmul.f32 %v900_v5, %v876_v3 }
 0x16f   : > { %v1005_v7 = vclamps-f32 %v901_v6, 1.0 }
 0x171   : > { %v905_v9 = vadd.f32 1.0, %v1005_v7 }
 0x173   : > { %v907_v10 = vmul.f32 %v905_v9, %v821_v8 }
 0x175   : > { %909 = vst [vmem:[%s170_s24 + $0x8] sm:$0xff] %v907_v10 }
 0x176 PF: > { %s13_s12 = sadd.s32 1, %s1074_s12  }
 0x177   : > { %p10_p4 = scmp.ge.s32.totalorder %s13_s12, 4  }
 0x179   :  { %12 = sbr.rel (!%p10_p4) target bundleno = 1 (0x1), region = 70 }

// kernel: decoder_forward_pallas.11
= control target key start
LH: loop header
LB: loop body
LE: loop exit
PB: predicated region body
PF: predicated region fallthrough
CT: control target
= control target key end

     0   :  { %s1811_s18 = smov 0   ;;  %s2082_s0 = inlined_call_operand.vmem [shape: f32[2,8,256], index: 0, kind: input, shape index: {}]   ;;  %s2083_s1 = inlined_call_operand.vmem [shape: f32[2,8,256], index: 1, kind: input, shape index: {}]   ;;  %s2084_s2 = inlined_call_operand.vmem [shape: f32[9,8,8], index: 2, kind: input, shape index: {}]   ;;  %s2085_s3 = inlined_call_operand.vmem [shape: f32[9,8,8], index: 3, kind: input, shape index: {}]   ;;  %s2086_s4 = inlined_call_operand.vmem [shape: f32[8,1], index: 4, kind: input, shape index: {}]   ;;  %s2087_s5 = inlined_call_operand.vmem [shape: f32[2,8,256], index: 5, kind: output, shape index: {}]  }
   0x1 LB: > { %s1611_s19 = sadd.s32 4294967295, %s1769_s18   ;;  %p1615_p0 = scmp.ge.s32.totalorder %s1769_s18, 1  ;;  %s1769_s18 = sphi %s1811_s18, %s15_s18  }
   0x2   : > { %p197_p1 = scmp.lt.s32.totalorder %s1769_s18, 3 }
   0x4   : > { %p198_p2 = pnand %p1615_p0, %p197_p1 }
   0x5   : > { %p230_p3 = scmp.lt.s32.totalorder (!%p198_p2), %s1611_s19, 1  ;;  %s1772_s28 = smov (!%p198_p2), 113  }
   0x6   : > { %201 = sbr.rel (%p198_p2) target bundleno = 517 (0x205), region = 40  ;;  %s1773_s29 = smov (!%p198_p2), 127  }
   0x7   : > { %s1774_s7 = smov (!%p198_p2), 111   ;;  %s1775_s10 = smov (!%p198_p2), 112  }
   0x8   : > { %s1776_s26 = smov (!%p198_p2), 17   ;;  %s1777_s9 = smov (!%p198_p2), 16  }
   0x9   : > { %s1778_s15 = smov (!%p198_p2), 15  }
   0xb   : > { %v247_v0 = vlaneseq  ;;  %s2089_s19 = smov (!%p230_p3, %s1611_s19), 1  ;;  %v1771_v2 = vmov 0.0   ;;  %v286_v5 = vld [vmem:[%s2084_s2] sm:$0xff]  ;;  %vm289_vm0 = vcmask 64512   ;;  %v1628_v10 = vld [vmem:[%s2084_s2 + $0x8] sm:$0xff]  ;;  %v1631_v14 = vld [vmem:[%s2084_s2 + $0x10] sm:$0xff] }
   0xc   : > { %245 = vst [vmem:[#allocation2] sm:$0xff] %v1771_v2  ;;  %s1819_s20 = sshll.u32 %s2089_s19, 4  ;;  %v1634_v17 = vld [vmem:[%s2084_s2 + $0x18] sm:$0xff]  ;;  %v1637_v19 = vld [vmem:[%s2084_s2 + $0x20] sm:$0xff]  ;;  %vm553_vm5 = vcmask 1039360   ;;  %vm479_vm6 = vcmask 924672  }
   0xd   : > { %v248_v1 = vand.u32 127, %v247_v0  ;;  %s234_s23 = scalar_lea.vmem %s2082_s0, %s1819_s20  ;;  %v1640_v26 = vld [vmem:[%s2084_s2 + $0x28] sm:$0xff]  ;;  %v1643_v28 = vld [vmem:[%s2084_s2 + $0x30] sm:$0xff]  ;;  %vm339_vm7 = vcmask 908288   ;;  %vm767_vm8 = vcmask 916480   ;;  %v1646_v40 = vld [vmem:[%s2084_s2 + $0x38] sm:$0xff]  ;;  %s244_s6 = scalar_lea.vmem %s2087_s5, %s1819_s20 }
   0xe   : > { %v287_v6 = vld [vmem:[%s234_s23] sm:$0xff]  ;;  %v696_v7 = vld [vmem:[%s234_s23 + $0x8] sm:$0xff]  ;;  %s239_s23 = scalar_lea.vmem %s2083_s1, %s1819_s20  ;;  %v1657_v63 = vld [vmem:[%s2085_s3 + $0x10] sm:$0xff]  ;;  %vm359_vm9 = vcmask 1047688   ;;  %vm353_vm10 = vcmask 138240   ;;  %vm423_vm11 = vcmask 1047680  }
   0xf   : > { %v249_v3 = vadd.s32 128, %v248_v1  ;;  %v254_v4 = vand.u32 15, %v248_v1  ;;  %308 = vmatpush.msra.mxu0 %v287_v6  ;;  %v1713_v9 = vpack.i.bf16 %v696_v7, %v287_v6  ;;  %384 = vmatpush.msra.mxu2 %v287_v6  ;;  %v1649_v42 = vld [vmem:[%s2084_s2 + $0x40] sm:$0xff]  ;;  %v886_v46 = vld [vmem:[%s239_s23 + $0x8] sm:$0xff]  ;;  %v1660_v0 = vld [vmem:[%s2085_s3 + $0x18] sm:$0xff]  ;;  %vm417_vm12 = vcmask 130048  }
  0x10   : > { %1626 = vmatmul.msk.f32.vlgmr.msra.gmra.mxu0 %vm289_vm0, %v286_v5  ;;  %404 = vmatpush.msra.mxu3 %v696_v7  ;;  %v885_v47 = vld [vmem:[%s239_s23] sm:$0xff]  ;;  %v1654_v52 = vld [vmem:[%s2085_s3 + $0x8] sm:$0xff]  ;;  %vm493_vm13 = vcmask 121856   ;;  %vm499_vm14 = vcmask 1047672   ;;  %vm567_vm15 = vcmask 7168  }
  0x11   : > { %v261_v8 = vand.u32 15, %v249_v3  ;;  %vm274_vm1 = vcmp.ge.s32.totalorder %v254_v4, 1  ;;  %1714 = vrot.lane.b32.xlu1 %v1713_v9, %s1772_s28  ;;  %1704 = vrot.lane.b32.xlu0 %v1713_v9, %s1773_s29  ;;  %vm280_vm3 = vcmp.le.s32.totalorder %v254_v4, 14  ;;  %v884_v50 = vld [vmem:[%s2085_s3] sm:$0xff]  ;;  %v1743_v58 = vpack.i.bf16 %v886_v46, %v885_v47 }
  0x12   : > { %v1831_v11 = vsel %vm274_vm1, 1.0, %v1771_v2  ;;  %1629 = vmatmul.msk.f32.vlgmr.msra.gmra.mxu2 %vm289_vm0, %v1628_v10  ;;  %1630 = vmatmul.msk.f32.vlgmr.msra.gmra.mxu3 %vm289_vm0, %v1628_v10  ;;  %v1847_v15 = vsel %vm280_vm3, 1.0, %v1771_v2  ;;  %vm573_vm1 = vcmask 1047560  }
  0x13   : > { %vm275_vm2 = vcmp.ge.s32.totalorder %v261_v8, 1  ;;  %448 = vmatpush.msrb.mxu0 %v287_v6  ;;  %328 = vmatpush.msra.mxu1 %v696_v7  ;;  %vm281_vm4 = vcmp.le.s32.totalorder %v261_v8, 14 }
  0x14   : > { %v1836_v12 = vsel %vm275_vm2, 1.0, %v1771_v2  ;;  %524 = vmatpush.msrb.mxu2 %v287_v6  ;;  %544 = vmatpush.msrb.mxu3 %v696_v7  ;;  %v1849_v16 = vsel %vm281_vm4, 1.0, %v1771_v2 }
  0x15   : > { %v1723_v13 = vpack.i.bf16 %v1836_v12, %v1831_v11  ;;  %1627 = vmatmul.msk.f32.vlgmr.msra.gmra.mxu1 %vm289_vm0, %v286_v5  ;;  %598 = vmatpush.msra.mxu0 %v287_v6  ;;  %v1728_v18 = vpack.i.bf16 %v1849_v16, %v1847_v15 }
  0x16   : > { %468 = vmatpush.msrb.mxu1 %v696_v7 }
  0x17   : > { %1724 = vrot.lane.b32.xlu2 %v1723_v13, %s1774_s7 }
  0x18   : > { %618 = vmatpush.msra.mxu1 %v696_v7  ;;  %1632 = vmatmul.msk.f32.vlgmr.msrb.gmra.mxu0 %vm289_vm0, %v1631_v14 }
  0x19   : > { %1719 = vrot.lane.b32.xlu1 %v1713_v9, %s1774_s7  ;;  %1709 = vrot.lane.b32.xlu0 %v1713_v9, %s1775_s10 }
  0x1a   : > { %1635 = vmatmul.msk.f32.vlgmr.msrb.gmra.mxu2 %vm289_vm0, %v1634_v17  ;;  %1636 = vmatmul.msk.f32.vlgmr.msrb.gmra.mxu3 %vm289_vm0, %v1634_v17 }
  0x1d   : > { %1633 = vmatmul.msk.f32.vlgmr.msrb.gmra.mxu1 %vm289_vm0, %v1631_v14 }
  0x1f   : > { %1729 = vrot.lane.b32.xlu2 %v1728_v18, %s1772_s28  ;;  %v1663_v18 = vld [vmem:[%s2085_s3 + $0x20] sm:$0xff] }
  0x20   : > { %1638 = vmatmul.msk.f32.vlgmr.msra.gmra.mxu0 %vm289_vm0, %v1637_v19 }
  0x21   : > { %1734 = vrot.lane.b32.xlu0 %v1723_v13, %s1773_s29 }
  0x25   : > { %1639 = vmatmul.msk.f32.vlgmr.msra.gmra.mxu1 %vm289_vm0, %v1637_v19 }
  0x71   : > { %v1725_v27 = vpop.permute.xlu2 %1724 }
  0x72   : > { %v1878_v31 = vunpack.i.h.bf16 %v1725_v27  ;;  %v1726_v32 = vunpack.i.l.bf16 %v1725_v27 }
  0x74   : > { %v1885_v35 = vsel %vm339_vm7, %v1726_v32, %v1878_v31 }
  0x79   : > { %v1730_v51 = vpop.permute.xlu2 %1729 }
  0x7a   : > { %v1914_v55 = vunpack.i.h.bf16 %v1730_v51  ;;  %v1731_v56 = vunpack.i.l.bf16 %v1730_v51 }
  0x7c   : > { %v1923_v60 = vsel %vm479_vm6, %v1731_v56, %v1914_v55 }
  0x83   : > { %v1715_v20 = vpop.permute.xlu1 %1714  ;;  %v1705_v21 = vpop.permute.xlu0 %1704 }
  0x84   : > { %v1717_v22 = vunpack.i.h.bf16 %v1715_v20  ;;  %v1716_v23 = vunpack.i.l.bf16 %v1715_v20  ;;  %v1707_v24 = vunpack.i.h.bf16 %v1705_v21  ;;  %v1706_v25 = vunpack.i.l.bf16 %v1705_v21 }
  0x86   : > { %680 = vmatpush.msra.mxu3 %v1707_v24  ;;  %744 = vmatpush.msrb.mxu1 %v1717_v22  ;;  %v639_v29 = vsel %vm553_vm5, %v1706_v25, %v1707_v24  ;;  %v703_v30 = vsel %vm479_vm6, %v1716_v23, %v1717_v22  ;;  %v1666_v23 = vld [vmem:[%s2085_s3 + $0x28] sm:$0xff] }
  0x87   : > { %660 = vmatpush.msra.mxu2 %v639_v29  ;;  %1642 = vmatmul.msk.f32.vlgmr.msra.gmra.mxu3 %vm289_vm0, %v1640_v26 }
  0x88   : > { %724 = vmatpush.msrb.mxu0 %v703_v30  ;;  %1645 = vmatmul.msk.f32.vlgmr.msrb.gmra.mxu1 %vm289_vm0, %v1643_v28 }
  0x89   : > { %1641 = vmatmul.msk.f32.vlgmr.msra.gmra.mxu2 %vm289_vm0, %v1640_v26  ;;  %1644 = vmatmul.msk.f32.vlgmr.msrb.gmra.mxu0 %vm289_vm0, %v1643_v28 }
  0x8b   : > { %v1720_v33 = vpop.permute.xlu1 %1719  ;;  %v1710_v34 = vpop.permute.xlu0 %1709 }
  0x8c   : > { %v1722_v36 = vunpack.i.h.bf16 %v1720_v33  ;;  %v1721_v37 = vunpack.i.l.bf16 %v1720_v33  ;;  %v1712_v38 = vunpack.i.h.bf16 %v1710_v34  ;;  %v1711_v39 = vunpack.i.l.bf16 %v1710_v34 }
  0x8d   : > { %v310_v41 = vpop.f32.mrf.mxu0 }
  0x8e   : > { %v343_v43 = vmul.f32 %v1885_v35, %v310_v41  ;;  %809 = vmatpush.msrb.mxu3 %v1712_v38  ;;  %871 = vmatpush.msra.mxu1 %v1722_v36  ;;  %v768_v44 = vsel %vm767_vm8, %v1711_v39, %v1712_v38  ;;  %v830_v45 = vsel %vm339_vm7, %v1721_v37, %v1722_v36  ;;  %v1669_v39 = vld [vmem:[%s2085_s3 + $0x30] sm:$0xff] }
  0x8f   : > { %789 = vmatpush.msrb.mxu2 %v768_v44  ;;  %1648 = vmatmul.msk.f32.vlgmr.msrb.gmra.mxu3 %vm289_vm0, %v1646_v40  ;;  %v1780_v44 = vmov 0  }
  0x90   : > { %851 = vmatpush.msra.mxu0 %v830_v45  ;;  %1651 = vmatmul.msk.f32.vlgmr.msra.gmra.mxu1 %vm289_vm0, %v1649_v42 }
  0x91   : > { %1647 = vmatmul.msk.f32.vlgmr.msrb.gmra.mxu2 %vm289_vm0, %v1646_v40  ;;  %1650 = vmatmul.msk.f32.vlgmr.msra.gmra.mxu0 %vm289_vm0, %v1649_v42 }
  0x92   : > { %349 = vrot.lane.b32.xlu1 %v343_v43, %s1776_s26  ;;  %925 = vmatpush.msra.mxu3 %v886_v46  ;;  %v330_v48 = vpop.f32.mrf.mxu1 }
  0x93   : > { %989 = vmatpush.msrb.mxu1 %v886_v46  ;;  %905 = vmatpush.msra.mxu2 %v885_v47  ;;  %v344_v49 = vmul.f32 %v1878_v31, %v330_v48  ;;  %v1735_v57 = vpop.permute.xlu0 %1734 }
  0x94   : > { %969 = vmatpush.msrb.mxu0 %v885_v47  ;;  %1051 = vmatpush.msrb.mxu3 %v886_v46  ;;  %v1925_v61 = vunpack.i.h.bf16 %v1735_v57  ;;  %v1736_v62 = vunpack.i.l.bf16 %v1735_v57 }
  0x95   : > { %v386_v53 = vpop.f32.mrf.mxu2  ;;  %1115 = vmatpush.msra.mxu1 %v886_v46  ;;  %1031 = vmatpush.msrb.mxu2 %v885_v47  ;;  %v406_v54 = vpop.f32.mrf.mxu3 }
  0x96   : > { %413 = vrot.lane.b32.xlu0 %v386_v53, %s1777_s9  ;;  %1095 = vmatpush.msra.mxu0 %v885_v47  ;;  %v450_v59 = vpop.f32.mrf.mxu0  ;;  %v1938_v3 = vsel %vm553_vm5, %v1736_v62, %v1925_v61 }
  0x97   : > { %1653 = vmatmul.msk.f32.vlgmr.msra.gmra.mxu3 %vm289_vm0, %v884_v50  ;;  %351 = vrot.lane.b32.xlu2 %v344_v49, %s1776_s26  ;;  %v483_v1 = vmul.f32 %v1923_v60, %v450_v59 }
  0x98   : > { %1656 = vmatmul.msk.f32.vlgmr.msrb.gmra.mxu1 %vm289_vm0, %v1654_v52  ;;  %1179 = vmatpush.msra.mxu3 %v886_v46 }
  0x99   : > { %1652 = vmatmul.msk.f32.vlgmr.msra.gmra.mxu2 %vm289_vm0, %v884_v50  ;;  %1655 = vmatmul.msk.f32.vlgmr.msrb.gmra.mxu0 %vm289_vm0, %v1654_v52  ;;  %v1672_v50 = vld [vmem:[%s2085_s3 + $0x38] sm:$0xff] }
  0x9a   : > { %415 = vrot.lane.b32.xlu1 %v406_v54, %s1777_s9  ;;  %1159 = vmatpush.msra.mxu2 %v885_v47  ;;  %v470_v4 = vpop.f32.mrf.mxu1 }
  0x9b   : > { %v484_v7 = vmul.f32 %v1914_v55, %v470_v4  ;;  %1758 = vset.pattern.permute.xlu0 %v1780_v44 }
  0x9d   : > { %v526_v2 = vpop.f32.mrf.mxu2  ;;  %v546_v6 = vpop.f32.mrf.mxu3 }
  0x9e   : > { %1744 = vrot.lane.b32.xlu0 %v1743_v58, %s1772_s28  ;;  %v557_v5 = vmul.f32 %v1938_v3, %v526_v2  ;;  %v558_v8 = vmul.f32 %v1925_v61, %v546_v6  ;;  %s1779_s28 = smov 1   ;;  %v1953_v14 = vpop.f32.mrf.mxu0 }
  0x9f   : > { %1659 = vmatmul.msk.f32.vlgmr.msrb.gmra.mxu3 %vm289_vm0, %v1657_v63  ;;  %1739 = vrot.lane.b32.xlu2 %v1743_v58, %s1773_s29 }
  0xa0   : > { %1662 = vmatmul.msk.f32.vlgmr.msra.gmra.mxu1 %vm289_vm0, %v1660_v0 }
  0xa1   : > { %1658 = vmatmul.msk.f32.vlgmr.msrb.gmra.mxu2 %vm289_vm0, %v1657_v63  ;;  %1661 = vmatmul.msk.f32.vlgmr.msra.gmra.mxu0 %vm289_vm0, %v1660_v0 }
  0xa2   : > { %489 = vrot.lane.b32.xlu1 %v483_v1, %s1778_s15  ;;  %v1955_v17 = vpop.f32.mrf.mxu1 }
  0xa6   : > { %563 = vrot.lane.b32.xlu0 %v557_v5, %s1779_s28 }
  0xa7   : > { %491 = vrot.lane.b32.xlu2 %v484_v7, %s1778_s15  ;;  %1665 = vmatmul.msk.f32.vlgmr.msra.gmra.mxu3 %vm289_vm0, %v1663_v18 }
  0xa9   : > { %1664 = vmatmul.msk.f32.vlgmr.msra.gmra.mxu2 %vm289_vm0, %v1663_v18 }
  0xaa   : > { %565 = vrot.lane.b32.xlu1 %v558_v8, %s1779_s28 }
  0xae   : > { %1754 = vrot.lane.b32.xlu0 %v1743_v58, %s1774_s7 }
  0xaf   : > { %1749 = vrot.lane.b32.xlu2 %v1743_v58, %s1775_s10 }
  0xf1   : > { %v352_v9 = vpop.permute.xlu2 %351 }
  0xf9   : > { %v1740_v10 = vpop.permute.xlu2 %1739 }
  0xfa   : > { %v1742_v13 = vunpack.i.h.bf16 %v1740_v10  ;;  %v1741_v19 = vunpack.i.l.bf16 %v1740_v10 }
  0xfc   : > { %1241 = vmatpush.msrb.mxu1 %v1742_v13  ;;  %v1200_v22 = vsel %vm553_vm5, %v1741_v19, %v1742_v13  ;;  %v1675_v19 = vld [vmem:[%s2085_s3 + $0x40] sm:$0xff] }
  0xfd   : > { %1221 = vmatpush.msrb.mxu0 %v1200_v22  ;;  %1668 = vmatmul.msk.f32.vlgmr.msrb.gmra.mxu1 %vm289_vm0, %v1666_v23 }
  0xfe   : > { %1667 = vmatmul.msk.f32.vlgmr.msrb.gmra.mxu0 %vm289_vm0, %v1666_v23 }
 0x101   : > { %v492_v25 = vpop.permute.xlu2 %491 }
 0x104   : > { %v350_v20 = vpop.permute.xlu1 %349 }
 0x105   : > { %360 = vst.msk [vmem:[#allocation2] sm:$0xff] %vm359_vm9, %v350_v20  ;;  %v1971_v27 = vpop.f32.mrf.mxu1  ;;  %v354_v33 = vsel %vm353_vm10, %v350_v20, %v352_v9 }
 0x106   : > { %v1962_v21 = vpop.f32.mrf.mxu0 }
 0x108   : > { %v414_v24 = vpop.permute.xlu0 %413 }
 0x109   : > { %v1750_v40 = vpop.permute.xlu2 %1749 }
 0x10a   : > { %v682_v26 = vpop.f32.mrf.mxu3  ;;  %v1752_v42 = vunpack.i.h.bf16 %v1750_v40  ;;  %v1751_v43 = vunpack.i.l.bf16 %v1750_v40 }
 0x10b   : > { %v686_v6 = vmul.f32 %v1849_v16, %v682_v26 }
 0x10c   : > { %v1973_v28 = vpop.f32.mrf.mxu2  ;;  %v416_v29 = vpop.permute.xlu1 %415  ;;  %v409_v30 = vld [vmem:[#allocation2] sm:$0xff]  ;;  %v1328_v49 = vsel %vm767_vm8, %v1751_v43, %v1752_v42  ;;  %1369 = vmatpush.msra.mxu1 %v1752_v42 }
 0x10d   : > { %v421_v34 = vadd.f32 %v414_v24, %v409_v30  ;;  %v418_v45 = vsel %vm417_vm12, %v414_v24, %v416_v29  ;;  %1349 = vmatpush.msra.mxu0 %v1328_v49  ;;  %v1994_v51 = vpop.f32.mrf.mxu1  ;;  %1674 = vmatmul.msk.f32.vlgmr.msra.gmra.mxu1 %vm289_vm0, %v1672_v50 }
 0x10e   : > { %v1975_v32 = vpop.f32.mrf.mxu0  ;;  %v422_v52 = vadd.f32 %v418_v45, %v354_v33  ;;  %1673 = vmatmul.msk.f32.vlgmr.msra.gmra.mxu0 %vm289_vm0, %v1672_v50  ;;  %v877_v42 = vmul.f32 %v1849_v16, %v1994_v51 }
 0x10f   : > { %424 = vst.msk [vmem:[#allocation2] sm:$0xff] %vm423_vm11, %v421_v34  ;;  %v685_v34 = vmul.f32 %v1847_v15, %v1973_v28  ;;  %v1446_v28 = vld [vmem:[%s2086_s4] sm:$0xff] }
 0x110   : > { %v1745_v36 = vpop.permute.xlu0 %1744 }
 0x111   : > { %v1747_v37 = vunpack.i.h.bf16 %v1745_v36  ;;  %v1746_v38 = vunpack.i.l.bf16 %v1745_v36 }
 0x112   : > { %v1982_v41 = vpop.f32.mrf.mxu3 }
 0x113   : > { %v1264_v46 = vsel %vm479_vm6, %v1746_v38, %v1747_v37  ;;  %1305 = vmatpush.msrb.mxu3 %v1747_v37  ;;  %v749_v38 = vmul.f32 %v1831_v11, %v1962_v21 }
 0x114   : > { %v1986_v47 = vpop.f32.mrf.mxu2  ;;  %v490_v48 = vpop.permute.xlu1 %489  ;;  %1285 = vmatpush.msrb.mxu2 %v1264_v46  ;;  %1671 = vmatmul.msk.f32.vlgmr.msrb.gmra.mxu3 %vm289_vm0, %v1669_v39 }
 0x115   : > { %1670 = vmatmul.msk.f32.vlgmr.msrb.gmra.mxu2 %vm289_vm0, %v1669_v39  ;;  %v494_v54 = vsel %vm493_vm13, %v490_v48, %v492_v25  ;;  %v991_v7 = vpop.f32.mrf.mxu1 }
 0x116   : > { %v971_v53 = vpop.f32.mrf.mxu0  ;;  %v485_v56 = vld [vmem:[#allocation2] sm:$0xff]  ;;  %v498_v59 = vadd.f32 %v494_v54, %v422_v52 }
 0x117   : > { %998 = vrot.lane.b32.xlu0 %v971_v53, %s1777_s9  ;;  %v497_v58 = vadd.f32 %v490_v48, %v485_v56 }
 0x118   : > { %v564_v57 = vpop.permute.xlu0 %563 }
 0x119   : > { %500 = vst.msk [vmem:[#allocation2] sm:$0xff] %vm499_vm14, %v497_v58 }
 0x11a   : > { %v927_v62 = vpop.f32.mrf.mxu3 }
 0x11b   : > { %v931_v63 = vmul.f32 %v1878_v31, %v927_v62 }
 0x11c   : > { %v907_v0 = vpop.f32.mrf.mxu2  ;;  %v566_v1 = vpop.permute.xlu1 %565 }
 0x11d   : > { %v930_v2 = vmul.f32 %v907_v0, %v1885_v35  ;;  %938 = vrot.lane.b32.xlu2 %v931_v63, %s1776_s26  ;;  %v568_v4 = vsel %vm567_vm15, %v564_v57, %v566_v1  ;;  %v1117_v25 = vpop.f32.mrf.mxu1 }
 0x11e   : > { %v572_v5 = vadd.f32 %v568_v4, %v498_v59  ;;  %v1097_v26 = vpop.f32.mrf.mxu0 }
 0x11f   : > { %936 = vrot.lane.b32.xlu1 %v930_v2, %s1776_s26  ;;  %v1120_v36 = vmul.f32 %v1097_v26, %v1938_v3 }
 0x120   : > { %v626_v8 = vadd.f32 %v1955_v17, %v572_v5  ;;  %v1755_v9 = vpop.permute.xlu0 %1754  ;;  %v559_v31 = vld [vmem:[#allocation2] sm:$0xff] }
 0x121   : > { %v1757_v10 = vunpack.i.h.bf16 %v1755_v9  ;;  %v1756_v13 = vunpack.i.l.bf16 %v1755_v9  ;;  %v571_v20 = vadd.f32 %v564_v57, %v559_v31 }
 0x122   : > { %628 = vst [vmem:[#allocation2 + $0x8] sm:$0xff] %v626_v8  ;;  %v690_v18 = vadd.f32 %v686_v6, %v626_v8  ;;  %v1053_v35 = vpop.f32.mrf.mxu3 }
 0x123   : > { %v1057_v22 = vmul.f32 %v1914_v55, %v1053_v35  ;;  %v1390_v23 = vsel %vm339_vm7, %v1756_v13, %v1757_v10  ;;  %1431 = vmatpush.msra.mxu3 %v1757_v10  ;;  %574 = vst.msk [vmem:[#allocation2] sm:$0xff] %vm573_vm1, %v571_v20  ;;  %v750_v55 = vmul.f32 %v1836_v12, %v1971_v27 }
 0x124   : > { %692 = vst.msk [vmem:[#allocation2 + $0x8] sm:$0xff] %vm553_vm5, %v690_v18  ;;  %v1033_v17 = vpop.f32.mrf.mxu2  ;;  %1411 = vmatpush.msra.mxu2 %v1390_v23  ;;  %1677 = vmatmul.msk.f32.vlgmr.msra.gmra.mxu3 %vm289_vm0, %v1675_v19 }
 0x125   : > { %v1056_v24 = vmul.f32 %v1033_v17, %v1923_v60  ;;  %1064 = vrot.lane.b32.xlu0 %v1057_v22, %s1778_s15  ;;  %1676 = vmatmul.msk.f32.vlgmr.msra.gmra.mxu2 %vm289_vm0, %v1675_v19  ;;  %v1121_v60 = vmul.f32 %v1925_v61, %v1117_v25  ;;  %v876_v61 = vmul.f32 %v1847_v15, %v1975_v32 }
 0x127   : > { %1062 = vrot.lane.b32.xlu2 %v1056_v24, %s1778_s15  ;;  %1000 = vrot.lane.b32.xlu1 %v991_v7, %s1777_s9 }
 0x12a   : > { %v623_v30 = vld [vmem:[#allocation2] sm:$0xff]  ;;  %v1181_v2 = vpop.f32.mrf.mxu3 }
 0x12b   : > { %v752_v29 = vld [vmem:[#allocation2 + $0x8] sm:$0xff]  ;;  %v625_v37 = vadd.f32 %v623_v30, %v1953_v14 }
 0x12c   : > { %v754_v33 = vadd.f32 %v752_v29, %v750_v55  ;;  %v1161_v9 = vpop.f32.mrf.mxu2 }
 0x12d   : > { %v689_v27 = vadd.f32 %v685_v34, %v625_v37  ;;  %1449 = vperm.xlu0 %1758, %v1446_v28  }
 0x12e   : > { %756 = vst.msk [vmem:[#allocation2 + $0x8] sm:$0xff] %vm479_vm6, %v754_v33 }
 0x12f   : > { %1128 = vrot.lane.b32.xlu2 %v1121_v60, %s1779_s28  ;;  %1126 = vrot.lane.b32.xlu1 %v1120_v36, %s1779_s28  ;;  %v753_v39 = vadd.f32 %v749_v38, %v689_v27 }
 0x131   : > { %v816_v3 = vadd.f32 %v1986_v47, %v753_v39 }
 0x133   : > { %v880_v40 = vadd.f32 %v876_v61, %v816_v3 }
 0x135   : > { %v815_v14 = vld [vmem:[#allocation2 + $0x8] sm:$0xff]  ;;  %882 = vst [vmem:[#allocation2] sm:$0xff] %v880_v40 }
 0x136   : > { %v817_v21 = vadd.f32 %v815_v14, %v1982_v41 }
 0x138   : > { %819 = vst.msk [vmem:[#allocation2 + $0x8] sm:$0xff] %vm767_vm8, %v817_v21 }
 0x13f   : > { %v879_v43 = vld [vmem:[#allocation2 + $0x8] sm:$0xff] }
 0x140   : > { %v881_v44 = vadd.f32 %v879_v43, %v877_v42 }
 0x142   : > { %883 = vst.msk [vmem:[#allocation2 + $0x8] sm:$0xff] %vm339_vm7, %v881_v44 }
 0x149   : > { %v933_v50 = vld [vmem:[#allocation2 + $0x8] sm:$0xff] }
 0x177   : > { %v939_v45 = vpop.permute.xlu2 %938 }
 0x17a   : > { %v1243_v59 = vpop.f32.mrf.mxu1 }
 0x17b   : > { %v1247_v5 = vmul.f32 %v1849_v16, %v1243_v59  ;;  %v1223_v23 = vpop.f32.mrf.mxu0 }
 0x17c   : > { %v1246_v17 = vmul.f32 %v1847_v15, %v1223_v23 }
 0x181   : > { %v1063_v47 = vpop.permute.xlu2 %1062 }
 0x189   : > { %v999_v32 = vpop.permute.xlu0 %998  ;;  %v1129_v62 = vpop.permute.xlu2 %1128 }
 0x18a   : > { %v1371_v24 = vpop.f32.mrf.mxu1 }
 0x18b   : > { %v1351_v34 = vpop.f32.mrf.mxu0 }
 0x191   : > { %v937_v46 = vpop.permute.xlu1 %936 }
 0x192   : > { %v943_v48 = vadd.f32 %v937_v46, %v880_v40  ;;  %v940_v49 = vsel %vm353_vm10, %v937_v46, %v939_v45 }
 0x193   : > { %v944_v53 = vadd.f32 %v940_v49, %v933_v50 }
 0x194   : > { %945 = vst.msk [vmem:[#allocation2] sm:$0xff] %vm359_vm9, %v943_v48 }
 0x197   : > { %v1065_v56 = vpop.permute.xlu0 %1064  ;;  %v1307_v13 = vpop.f32.mrf.mxu3 }
 0x198   : > { %v1066_v58 = vsel %vm493_vm13, %v1063_v47, %v1065_v56  ;;  %v1311_v31 = vmul.f32 %v1836_v12, %v1307_v13  ;;  %v1287_v20 = vpop.f32.mrf.mxu2 }
 0x199   : > { %v1001_v41 = vpop.permute.xlu1 %1000  ;;  %v1310_v26 = vmul.f32 %v1831_v11, %v1287_v20 }
 0x19a   : > { %v1002_v52 = vsel %vm417_vm12, %v999_v32, %v1001_v41 }
 0x19b   : > { %v994_v54 = vld [vmem:[#allocation2] sm:$0xff]  ;;  %v1006_v57 = vadd.f32 %v1002_v52, %v944_v53 }
 0x19c   : > { %v1005_v51 = vadd.f32 %v999_v32, %v994_v54 }
 0x19d   : > { %v1070_v63 = vadd.f32 %v1066_v58, %v1006_v57 }
 0x19e   : > { %1007 = vst.msk [vmem:[#allocation2] sm:$0xff] %vm423_vm11, %v1005_v51 }
 0x19f   : > { %v1450_v39 = vpop.permute.xlu0 %1449 }
 0x1a1   : > { %v1127_v0 = vpop.permute.xlu1 %1126 }
 0x1a2   : > { %v1130_v1 = vsel %vm567_vm15, %v1127_v0, %v1129_v62 }
 0x1a3   : > { %v1134_v4 = vadd.f32 %v1130_v1, %v1070_v63 }
 0x1a5   : > { %v1058_v6 = vld [vmem:[#allocation2] sm:$0xff]  ;;  %v1187_v7 = vadd.f32 %v1181_v2, %v1134_v4 }
 0x1a6   : > { %v1069_v8 = vadd.f32 %v1063_v47, %v1058_v6 }
 0x1a7   : > { %1189 = vst [vmem:[#allocation2 + $0x8] sm:$0xff] %v1187_v7  ;;  %v1251_v10 = vadd.f32 %v1247_v5, %v1187_v7  ;;  %v1433_v37 = vpop.f32.mrf.mxu3 }
 0x1a8   : > { %1071 = vst.msk [vmem:[#allocation2] sm:$0xff] %vm499_vm14, %v1069_v8  ;;  %v1413_v12 = vpop.f32.mrf.mxu2  ;;  %v1437_v27 = vmul.f32 %v1849_v16, %v1433_v37 }
 0x1a9   : > { %1253 = vst.msk [vmem:[#allocation2 + $0x8] sm:$0xff] %vm553_vm5, %v1251_v10  ;;  %v1436_v36 = vmul.f32 %v1847_v15, %v1413_v12 }
 0x1af   : > { %v1122_v18 = vld [vmem:[#allocation2] sm:$0xff] }
 0x1b0   : > { %v1133_v35 = vadd.f32 %v1127_v0, %v1122_v18  ;;  %v1313_v19 = vld [vmem:[#allocation2 + $0x8] sm:$0xff] }
 0x1b1   : > { %v1315_v22 = vadd.f32 %v1313_v19, %v1311_v31 }
 0x1b2   : > { %1135 = vst.msk [vmem:[#allocation2] sm:$0xff] %vm573_vm1, %v1133_v35 }
 0x1b3   : > { %1317 = vst.msk [vmem:[#allocation2 + $0x8] sm:$0xff] %vm479_vm6, %v1315_v22 }
 0x1b9   : > { %v1184_v55 = vld [vmem:[#allocation2] sm:$0xff] }
 0x1ba   : > { %v1186_v25 = vadd.f32 %v1184_v55, %v1161_v9  ;;  %v1375_v29 = vld [vmem:[#allocation2 + $0x8] sm:$0xff] }
 0x1bb   : > { %v1377_v30 = vadd.f32 %v1375_v29, %v1371_v24 }
 0x1bc   : > { %v1250_v33 = vadd.f32 %v1246_v17, %v1186_v25 }
 0x1bd   : > { %1379 = vst.msk [vmem:[#allocation2 + $0x8] sm:$0xff] %vm767_vm8, %v1377_v30 }
 0x1be   : > { %v1314_v60 = vadd.f32 %v1310_v26, %v1250_v33 }
 0x1c0   : > { %v1376_v38 = vadd.f32 %v1351_v34, %v1314_v60 }
 0x1c2   : > { %v1440_v28 = vadd.f32 %v1436_v36, %v1376_v38 }
 0x1c4   : > { %1442 = vst [vmem:[#allocation2] sm:$0xff] %v1440_v28  ;;  %v1439_v61 = vld [vmem:[#allocation2 + $0x8] sm:$0xff]  ;;  %v2061_v3 = vadd.f32 %v1450_v39, %v1440_v28 }
 0x1c5   : > { %v1441_v11 = vadd.f32 %v1439_v61, %v1437_v27 }
 0x1c6   : > { %v1456_v14 = vmul.f32 0.70710677, %v2061_v3 }
 0x1c7   : > { %1443 = vst.msk [vmem:[#allocation2 + $0x8] sm:$0xff] %vm339_vm7, %v1441_v11 }
 0x1c8   : > { %v1458_v40 = vmul.f32 %v1456_v14, %v1456_v14 }
 0x1ca   : > { %v1459_v21 = vmin.f32 %v1458_v40, 16.0  ;;  %v1454_v40 = vmul.f32 0.5, %v2061_v3 }
 0x1cc   : > { %v1460_v42 = vmul.f32 2.1237322e-06, %v1459_v21  ;;  %v1471_v43 = vmul.f32 3.8918573e-05, %v1459_v21 }
 0x1ce   : > { %v1445_v15 = vld [vmem:[#allocation2 + $0x8] sm:$0xff]  ;;  %v1461_v44 = vadd.f32 0.00028619796, %v1460_v42  ;;  %v1472_v45 = vadd.f32 0.001143296, %v1471_v43 }
 0x1cf   : > { %v2065_v46 = vadd.f32 %v1450_v39, %v1445_v15 }
 0x1d0   : > { %v1462_v16 = vmul.f32 %v1461_v44, %v1459_v21  ;;  %v1473_v48 = vmul.f32 %v1472_v45, %v1459_v21 }
 0x1d1   : > { %v2068_v32 = vmul.f32 0.70710677, %v2065_v46 }
 0x1d2   : > { %v1463_v47 = vadd.f32 0.0036580483, %v1462_v16  ;;  %v1474_v49 = vadd.f32 0.014752088, %v1473_v48 }
 0x1d3   : > { %v1498_v41 = vmul.f32 %v2068_v32, %v2068_v32 }
 0x1d4   : > { %v1475_v50 = vmul.f32 %v1474_v49, %v1459_v21  ;;  %v1464_v53 = vmul.f32 %v1463_v47, %v1459_v21 }
 0x1d5   : > { %v1499_v52 = vmin.f32 %v1498_v41, 16.0 }
 0x1d6   : > { %v1476_v54 = vadd.f32 0.112945676, %v1475_v50  ;;  %v1465_v62 = vadd.f32 0.05243302, %v1464_v53  ;;  %v1455_v50 = vmul.f32 0.5, %v2065_v46 }
 0x1d7   : > { %v1500_v51 = vmul.f32 2.1237322e-06, %v1499_v52  ;;  %v1511_v56 = vmul.f32 3.8918573e-05, %v1499_v52 }
 0x1d8   : > { %v1477_v57 = vmul.f32 %v1476_v54, %v1459_v21  ;;  %v1466_v5 = vmul.f32 %v1465_v62, %v1459_v21 }
 0x1d9   : > { %v1501_v58 = vadd.f32 0.00028619796, %v1500_v51  ;;  %v1512_v59 = vadd.f32 0.001143296, %v1511_v56 }
 0x1da   : > { %v1478_v63 = vadd.f32 0.4994258, %v1477_v57  ;;  %v1467_v10 = vadd.f32 0.18741608, %v1466_v5 }
 0x1db   : > { %v1502_v0 = vmul.f32 %v1501_v58, %v1499_v52  ;;  %v1513_v1 = vmul.f32 %v1512_v59, %v1499_v52 }
 0x1dc   : > { %v1479_v2 = vmul.f32 %v1478_v63, %v1459_v21  ;;  %v1468_v19 = vmul.f32 %v1467_v10, %v1459_v21 }
 0x1dd   : > { %v1514_v4 = vadd.f32 0.014752088, %v1513_v1  ;;  %v1503_v7 = vadd.f32 0.0036580483, %v1502_v0 }
 0x1de   : > { %v1480_v6 = vadd.f32 1.0, %v1479_v2  ;;  %v1469_v55 = vadd.f32 1.1283791, %v1468_v19 }
 0x1df   : > { %v1515_v8 = vmul.f32 %v1514_v4, %v1499_v52  ;;  %v1504_v13 = vmul.f32 %v1503_v7, %v1499_v52 }
 0x1e0   : > { %1759 = vrcp.f32 %v1480_v6  ;;  %v1492_v25 = vand.u32 2147483648, %v1480_v6  ;;  %v1490_v30 = vand.u32 2147483647, %v1480_v6  ;;  %vm1486_vm2 = vweird.f32 %v1480_v6 }
 0x1e1   : > { %v1516_v9 = vadd.f32 0.112945676, %v1515_v8  ;;  %v1505_v20 = vadd.f32 0.05243302, %v1504_v13  ;;  %v1470_v60 = vmul.f32 %v1469_v55, %v1456_v14 }
 0x1e2   : > { %v1493_v33 = vor.u32 1.1754944e-38, %v1492_v25  ;;  %vm1491_vm4 = vcmp.eq.f32.partialorder %v1490_v30, 8.507059e+37 }
 0x1e3   : > { %v1517_v31 = vmul.f32 %v1516_v9, %v1499_v52  ;;  %v1506_v26 = vmul.f32 %v1505_v20, %v1499_v52 }
 0x1e5   : > { %v1518_v18 = vadd.f32 0.4994258, %v1517_v31  ;;  %v1507_v34 = vadd.f32 0.18741608, %v1506_v26 }
 0x1e6   : > { %v1760_v35 = vpop.eup %1759 }
 0x1e7   : > { %v1482_v22 = vmul.f32 %v1760_v35, %v1480_v6  ;;  %v1519_v23 = vmul.f32 %v1518_v18, %v1499_v52  ;;  %vm1487_vm0 = vweird.f32 %v1760_v35  ;;  %v1508_v39 = vmul.f32 %v1507_v34, %v1499_v52 }
 0x1e8   : > { %vm1488_vm3 = vmor %vm1486_vm2, %vm1487_vm0 }
 0x1e9   : > { %v1483_v17 = vsub.f32 1.0, %v1482_v22  ;;  %v1520_v24 = vadd.f32 1.0, %v1519_v23  ;;  %v1509_v43 = vadd.f32 1.1283791, %v1508_v39 }
 0x1eb   : > { %v1484_v29 = vmul.f32 %v1760_v35, %v1483_v17  ;;  %1761 = vrcp.f32 %v1520_v24  ;;  %v1532_v21 = vand.u32 2147483648, %v1520_v24  ;;  %v1530_v14 = vand.u32 2147483647, %v1520_v24 }
 0x1ec   : > { %vm1526_vm6 = vweird.f32 %v1520_v24  ;;  %v1510_v48 = vmul.f32 %v1509_v43, %v2068_v32 }
 0x1ed   : > { %v1485_v12 = vadd.f32 %v1760_v35, %v1484_v29  ;;  %v1533_v16 = vor.u32 1.1754944e-38, %v1532_v21  ;;  %vm1531_vm8 = vcmp.eq.f32.partialorder %v1530_v14, 8.507059e+37 }
 0x1ef   : > { %v1489_v36 = vsel %vm1488_vm3, %v1760_v35, %v1485_v12 }
 0x1f0   : > { %v1494_v37 = vsel %vm1491_vm4, %v1493_v33, %v1489_v36 }
 0x1f1   : > { %v1762_v38 = vpop.eup %1761  ;;  %v1495_v27 = vmul.f32 %v1494_v37, %v1470_v60 }
 0x1f2   : > { %v1522_v28 = vmul.f32 %v1762_v38, %v1520_v24  ;;  %vm1527_vm5 = vweird.f32 %v1762_v38 }
 0x1f3   : > { %v1678_v61 = vclamps-f32 %v1495_v27, 1.0  ;;  %vm1528_vm7 = vmor %vm1526_vm6, %vm1527_vm5 }
 0x1f4   : > { %v1523_v11 = vsub.f32 1.0, %v1522_v28 }
 0x1f5   : > { %v1538_v42 = vadd.f32 1.0, %v1678_v61 }
 0x1f6   : > { %v1524_v15 = vmul.f32 %v1762_v38, %v1523_v11 }
 0x1f7   : > { %v1540_v44 = vmul.f32 %v1538_v42, %v1454_v40 }
 0x1f8   : > { %v1525_v45 = vadd.f32 %v1762_v38, %v1524_v15 }
 0x1f9   : > { %1542 = vst [vmem:[%s244_s6] sm:$0xff] %v1540_v44 }
 0x1fa   : > { %v1529_v47 = vsel %vm1528_vm7, %v1762_v38, %v1525_v45 }
 0x1fb   : > { %v1534_v3 = vsel %vm1531_vm8, %v1533_v16, %v1529_v47 }
 0x1fc   : > { %v1535_v49 = vmul.f32 %v1534_v3, %v1510_v48 }
 0x1fe   : > { %v1679_v41 = vclamps-f32 %v1535_v49, 1.0 }
 0x200   : > { %v1539_v52 = vadd.f32 1.0, %v1679_v41 }
 0x202   : > { %v1541_v53 = vmul.f32 %v1539_v52, %v1455_v50 }
 0x204   : > { %1543 = vst [vmem:[%s244_s6 + $0x8] sm:$0xff] %v1541_v53 }
 0x205 PF: > { %s15_s18 = sadd.s32 1, %s1769_s18  }
 0x206   : > { %p12_p4 = scmp.ge.s32.totalorder %s15_s18, 4  }
 0x208   :  { %14 = sbr.rel (!%p12_p4) target bundleno = 1 (0x1), region = 89 }

</bundles_post_ra>
